<compile_context>
chip_gen: v7x
topology: tpu7x:2x2x1
jax: 0.10.0
libtpu: 0.0.40
codegen_flags: <defaults>
</compile_context>

<pallas_src>
import math
from functools import partial

import jax
import jax.numpy as jnp
from jax.experimental import pallas as pl
from jax.experimental.pallas import tpu as pltpu

_MM_DTYPE = jnp.bfloat16  # MXU input dtype (accumulation stays fp32)


# ----------------------------- fused Pallas kernel -----------------------------

def _encoder_kernel(tok_ref, emb_w_ref, emb_b_ref,
                    wqkv_ref, bqkv_ref, wo_ref, bo_ref,
                    ln1_g_ref, ln1_b_ref,
                    w1_ref, b1_ref, w2_ref, b2_ref,
                    ln2_g_ref, ln2_b_ref,
                    norm_g_ref, norm_b_ref,
                    proj_w_ref, proj_b_ref,
                    o_ref, *, n_heads, e_layers):
    """One batch element: embedding -> e_layers encoder layers -> LN -> projection."""

    def mm(a, w, b=None):
        out = jnp.dot(a.astype(_MM_DTYPE), w.astype(_MM_DTYPE),
                      preferred_element_type=jnp.float32)
        if b is not None:
            out = out + b
        return out

    def layernorm(x, g, b):
        # LayerNorm over last dim, eps=1e-5, biased variance (PyTorch default), fp32
        mu = jnp.mean(x, axis=-1, keepdims=True)
        xc = x - mu
        var = jnp.mean(xc * xc, axis=-1, keepdims=True)
        return xc * jax.lax.rsqrt(var + 1e-5) * g + b

    # inverted embedding (DataEmbedding_inverted); dropout = identity at inference
    x = mm(tok_ref[0], emb_w_ref[...], emb_b_ref[...])          # (Ntok, D) fp32

    D = x.shape[-1]
    E = D // n_heads
    scale = 1.0 / math.sqrt(E)

    for l in range(e_layers):                                    # static unroll
        # --- AttentionLayer(FullAttention(mask_flag=False)) with fused QKV ---
        qkv = mm(x, wqkv_ref[l], bqkv_ref[l])                    # (Ntok, 3D)
        heads = []
        for h in range(n_heads):                                 # static unroll
            q_h = qkv[:, h * E:(h + 1) * E]
            k_h = qkv[:, D + h * E:D + (h + 1) * E]
            v_h = qkv[:, 2 * D + h * E:2 * D + (h + 1) * E]
            # scores = q @ k^T via transposed contraction (no in-kernel transpose)
            s = jax.lax.dot_general(
                q_h.astype(_MM_DTYPE), k_h.astype(_MM_DTYPE),
                dimension_numbers=(((1,), (1,)), ((), ())),
                preferred_element_type=jnp.float32) * scale      # (Ntok, Ntok) fp32
            s = s - jnp.max(s, axis=-1, keepdims=True)
            p = jnp.exp(s)
            p = p * pl.reciprocal(jnp.sum(p, axis=-1, keepdims=True), approx=True)
            heads.append(mm(p, v_h))                             # (Ntok, E)
        a = jnp.concatenate(heads, axis=-1)                      # (Ntok, D)
        a = mm(a, wo_ref[l], bo_ref[l])                          # output projection

        # residual + norm1
        x1 = layernorm(x + a, ln1_g_ref[l], ln1_b_ref[l])

        # FFN: Conv1d(k=1) -> ReLU -> Conv1d(k=1)  (activation='relu')
        hdn = jnp.maximum(mm(x1, w1_ref[l], b1_ref[l]), 0.0)
        y = mm(hdn, w2_ref[l], b2_ref[l])

        # residual + norm2
        x = layernorm(x1 + y, ln2_g_ref[l], ln2_b_ref[l])

    # Encoder final LayerNorm + projection head (d_model -> pred_len)
    x = layernorm(x, norm_g_ref[...], norm_b_ref[...])
    o_ref[0] = mm(x, proj_w_ref[...], proj_b_ref[...])


def fused_itransformer_encoder(tokens, params, *, n_heads):
    """tokens: [B, Ntok, seq_len] -> [B, Ntok, pred_len] (single fused pallas_call)."""
    B, Ntok, L = tokens.shape
    e_layers, D, _ = params['wqkv'].shape
    F = params['w1'].shape[-1]
    P = params['proj_w'].shape[-1]

    args = (tokens,
            params['emb_w'], params['emb_b'],
            params['wqkv'], params['bqkv'],
            params['wo'], params['bo'],
            params['ln1_g'], params['ln1_b'],
            params['w1'], params['b1'],
            params['w2'], params['b2'],
            params['ln2_g'], params['ln2_b'],
            params['norm_g'], params['norm_b'],
            params['proj_w'], params['proj_b'])

    # Replicated (weight) blocks: full array, same block index for every grid
    # step -> stays resident in VMEM across the batch loop.
    rep2 = lambda shape: pl.BlockSpec(shape, lambda i: (0, 0))
    rep3 = lambda shape: pl.BlockSpec(shape, lambda i: (0, 0, 0))
    in_specs = [pl.BlockSpec((1, Ntok, L), lambda i: (i, 0, 0))]
    for a in args[1:]:
        in_specs.append(rep3(a.shape) if a.ndim == 3 else rep2(a.shape))

    # Advisory cost estimate for XLA scheduling around the custom call.
    E = D // n_heads
    mmf = lambda m, k, n: 2 * m * k * n
    per_b = mmf(Ntok, L, D) + mmf(Ntok, D, P)
    per_b += e_layers * (mmf(Ntok, D, 3 * D) + mmf(Ntok, D, D)
                         + n_heads * (mmf(Ntok, E, Ntok) + mmf(Ntok, Ntok, E))
                         + mmf(Ntok, D, F) + mmf(Ntok, F, D))
    flops = B * per_b
    transcendentals = B * (e_layers * (n_heads * Ntok * Ntok + 2 * Ntok) + Ntok)
    bytes_accessed = 4 * (sum(int(a.size) for a in args) + B * Ntok * P)

    return pl.pallas_call(
        partial(_encoder_kernel, n_heads=n_heads, e_layers=e_layers),
        out_shape=jax.ShapeDtypeStruct((B, Ntok, P), jnp.float32),
        grid=(B,),
        in_specs=in_specs,
        out_specs=pl.BlockSpec((1, Ntok, P), lambda i: (i, 0, 0)),
        compiler_params=pltpu.CompilerParams(
            dimension_semantics=("parallel",),
            vmem_limit_bytes=64 * 1024 * 1024),
        cost_estimate=pl.CostEstimate(flops=flops,
                                      transcendentals=transcendentals,
                                      bytes_accessed=bytes_accessed),
    )(*args)


# --------------------------- parameters (synthetic) ---------------------------

def init_params(key, seq_len, d_model, d_ff, n_heads, e_layers, pred_len):
    def dense(k, fan_in, fan_out):
        k1, k2 = jax.random.split(k)
        w = jax.random.normal(k1, (fan_in, fan_out), jnp.float32) * 0.05
        b = jax.random.normal(k2, (1, fan_out), jnp.float32) * 0.05
        return w, b

    def stacked_dense(k, fan_in, fan_out):
        ws, bs = [], []
        for kk in jax.random.split(k, e_layers):
            w, b = dense(kk, fan_in, fan_out)
            ws.append(w)
            bs.append(b)
        return jnp.stack(ws), jnp.stack(bs)   # (e_layers, in, out), (e_layers, 1, out)

    keys = jax.random.split(key, 6)
    params = {}
    params['emb_w'], params['emb_b'] = dense(keys[0], seq_len, d_model)      # DataEmbedding_inverted
    # fused Q|K|V projection == three separate d_model->d_model linears
    params['wqkv'], params['bqkv'] = stacked_dense(keys[1], d_model, 3 * d_model)
    params['wo'], params['bo'] = stacked_dense(keys[2], d_model, d_model)    # attention out proj
    params['w1'], params['b1'] = stacked_dense(keys[3], d_model, d_ff)       # Conv1d(d_model, d_ff, 1)
    params['w2'], params['b2'] = stacked_dense(keys[4], d_ff, d_model)       # Conv1d(d_ff, d_model, 1)
    params['ln1_g'] = jnp.ones((e_layers, 1, d_model), jnp.float32)
    params['ln1_b'] = jnp.zeros((e_layers, 1, d_model), jnp.float32)
    params['ln2_g'] = jnp.ones((e_layers, 1, d_model), jnp.float32)
    params['ln2_b'] = jnp.zeros((e_layers, 1, d_model), jnp.float32)
    params['norm_g'] = jnp.ones((1, d_model), jnp.float32)                   # Encoder final LayerNorm
    params['norm_b'] = jnp.zeros((1, d_model), jnp.float32)
    params['proj_w'], params['proj_b'] = dense(keys[5], d_model, pred_len)   # projection
    return params


# ------------------------------ model forward ------------------------------

def itransformer_forward(params, history_data, future_data, *, n_heads):
    """history_data/future_data: [B, L, N, C] (C = 1 target channel + C-1 time marks)."""
    B, L, N, C = history_data.shape

    # data_transformation_4_xformer: only x_enc / x_mark_enc feed iTransformer
    x_enc = history_data[..., 0]                         # [B, L, N]
    x_mark_enc = history_data[:, :, 0, 1:]               # [B, L, C-1]
    # TODO(synk): x_dec / x_mark_dec of data_transformation_4_xformer are unused by
    # the iTransformer forward pass, so they are not materialized here.

    # non-stationary normalization (fp32, matches unbiased=False)
    means = jnp.mean(x_enc, axis=1, keepdims=True)                       # [B, 1, N]
    x = x_enc - means
    stdev = jnp.sqrt(jnp.var(x, axis=1, keepdims=True) + 1e-5)
    x = x / stdev

    # inverted tokens: each variate and each time-feature becomes a token
    tokens = jnp.concatenate([jnp.transpose(x, (0, 2, 1)),
                              jnp.transpose(x_mark_enc, (0, 2, 1))], axis=1)   # [B, Ntok, L]

    # single fused Pallas kernel: embedding + encoder layers + final LN + projection
    dec = fused_itransformer_encoder(tokens, params, n_heads=n_heads)          # [B, Ntok, pred_len]

    # de-normalization (variate tokens come first, so [:, :, :N] is valid)
    dec = jnp.transpose(dec, (0, 2, 1))[:, :, :N]                              # [B, pred_len, N]
    dec = dec * stdev[:, 0, :][:, None, :] + means[:, 0, :][:, None, :]
    return dec[..., None]                                                      # [B, pred_len, N, 1]


# ----------------------------------- main -----------------------------------

if __name__ == "__main__":
    # small shapes consistent with the module; d_model/d_ff chosen lane-dense (x128)
    B, L, N, C = 2, 8, 4, 3          # batch, seq_len, num variates, 1 target + 2 time marks
    seq_len, label_len, pred_len = L, 4, 8
    d_model, d_ff, n_heads, e_layers = 128, 256, 4, 2

    key = jax.random.PRNGKey(0)
    kp, kh, kf = jax.random.split(key, 3)
    params = init_params(kp, seq_len, d_model, d_ff, n_heads, e_layers, pred_len)
    history_data = jax.random.normal(kh, (B, L, N, C), jnp.float32)
    future_data = jax.random.normal(kf, (B, pred_len, N, C), jnp.float32)

    fwd = jax.jit(partial(itransformer_forward, n_heads=n_heads))
    out = fwd(params, history_data, future_data)
    out = jax.block_until_ready(out)

    assert out.shape == (B, pred_len, N, 1), out.shape
    assert bool(jnp.all(jnp.isfinite(out)))
    print("KERNEL_OK")
</pallas_src>

<mosaic_0001>
module attributes {stable_mosaic.version = 11 : i64} {
  func.func @_encoder_kernel(%arg0: i32, %arg1: memref<1x6x8xf32, #tpu.memory_space<vmem>>, %arg2: memref<8x128xf32, #tpu.memory_space<vmem>>, %arg3: memref<1x128xf32, #tpu.memory_space<vmem>>, %arg4: memref<2x128x384xf32, #tpu.memory_space<vmem>>, %arg5: memref<2x1x384xf32, #tpu.memory_space<vmem>>, %arg6: memref<2x128x128xf32, #tpu.memory_space<vmem>>, %arg7: memref<2x1x128xf32, #tpu.memory_space<vmem>>, %arg8: memref<2x1x128xf32, #tpu.memory_space<vmem>>, %arg9: memref<2x1x128xf32, #tpu.memory_space<vmem>>, %arg10: memref<2x128x256xf32, #tpu.memory_space<vmem>>, %arg11: memref<2x1x256xf32, #tpu.memory_space<vmem>>, %arg12: memref<2x256x128xf32, #tpu.memory_space<vmem>>, %arg13: memref<2x1x128xf32, #tpu.memory_space<vmem>>, %arg14: memref<2x1x128xf32, #tpu.memory_space<vmem>>, %arg15: memref<2x1x128xf32, #tpu.memory_space<vmem>>, %arg16: memref<1x128xf32, #tpu.memory_space<vmem>>, %arg17: memref<1x128xf32, #tpu.memory_space<vmem>>, %arg18: memref<128x8xf32, #tpu.memory_space<vmem>>, %arg19: memref<1x8xf32, #tpu.memory_space<vmem>>, %arg20: memref<1x6x8xf32, #tpu.memory_space<vmem>>) attributes {dimension_semantics = [#tpu.dimension_semantics<parallel>], iteration_bounds = array<i64: 2>, scalar_prefetch = 0 : i64, scratch_operands = 0 : i64, tpu.core_type = #tpu.core_type<tc>, window_params = [{transform_indices = @transform_0, window_bounds = array<i64: 1, 6, 8>}, {pipeline_mode = #tpu.pipeline_mode<synchronous>, transform_indices = @transform_1, window_bounds = array<i64: 8, 128>}, {pipeline_mode = #tpu.pipeline_mode<synchronous>, transform_indices = @transform_2, window_bounds = array<i64: 1, 128>}, {pipeline_mode = #tpu.pipeline_mode<synchronous>, transform_indices = @transform_3, window_bounds = array<i64: 2, 128, 384>}, {pipeline_mode = #tpu.pipeline_mode<synchronous>, transform_indices = @transform_4, window_bounds = array<i64: 2, 1, 384>}, {pipeline_mode = #tpu.pipeline_mode<synchronous>, transform_indices = @transform_5, window_bounds = array<i64: 2, 128, 128>}, {pipeline_mode = #tpu.pipeline_mode<synchronous>, transform_indices = @transform_6, window_bounds = array<i64: 2, 1, 128>}, {pipeline_mode = #tpu.pipeline_mode<synchronous>, transform_indices = @transform_7, window_bounds = array<i64: 2, 1, 128>}, {pipeline_mode = #tpu.pipeline_mode<synchronous>, transform_indices = @transform_8, window_bounds = array<i64: 2, 1, 128>}, {pipeline_mode = #tpu.pipeline_mode<synchronous>, transform_indices = @transform_9, window_bounds = array<i64: 2, 128, 256>}, {pipeline_mode = #tpu.pipeline_mode<synchronous>, transform_indices = @transform_10, window_bounds = array<i64: 2, 1, 256>}, {pipeline_mode = #tpu.pipeline_mode<synchronous>, transform_indices = @transform_11, window_bounds = array<i64: 2, 256, 128>}, {pipeline_mode = #tpu.pipeline_mode<synchronous>, transform_indices = @transform_12, window_bounds = array<i64: 2, 1, 128>}, {pipeline_mode = #tpu.pipeline_mode<synchronous>, transform_indices = @transform_13, window_bounds = array<i64: 2, 1, 128>}, {pipeline_mode = #tpu.pipeline_mode<synchronous>, transform_indices = @transform_14, window_bounds = array<i64: 2, 1, 128>}, {pipeline_mode = #tpu.pipeline_mode<synchronous>, transform_indices = @transform_15, window_bounds = array<i64: 1, 128>}, {pipeline_mode = #tpu.pipeline_mode<synchronous>, transform_indices = @transform_16, window_bounds = array<i64: 1, 128>}, {pipeline_mode = #tpu.pipeline_mode<synchronous>, transform_indices = @transform_17, window_bounds = array<i64: 128, 8>}, {pipeline_mode = #tpu.pipeline_mode<synchronous>, transform_indices = @transform_18, window_bounds = array<i64: 1, 8>}, {transform_indices = @transform_19, window_bounds = array<i64: 1, 6, 8>}]} {
    %c0 = arith.constant 0 : index
    %c0_0 = arith.constant 0 : index
    %c0_1 = arith.constant 0 : index
    %0 = vector.load %arg1[%c0, %c0_0, %c0_1] : memref<1x6x8xf32, #tpu.memory_space<vmem>>, vector<1x6x8xf32>
    %1 = vector.shape_cast %0 : vector<1x6x8xf32> to vector<6x8xf32>
    %c0_2 = arith.constant 0 : index
    %c0_3 = arith.constant 0 : index
    %2 = vector.load %arg2[%c0_2, %c0_3] : memref<8x128xf32, #tpu.memory_space<vmem>>, vector<8x128xf32>
    %c0_4 = arith.constant 0 : index
    %c0_5 = arith.constant 0 : index
    %3 = vector.load %arg3[%c0_4, %c0_5] : memref<1x128xf32, #tpu.memory_space<vmem>>, vector<1x128xf32>
    %4 = arith.truncf %1 : vector<6x8xf32> to vector<6x8xbf16>
    %5 = arith.truncf %2 : vector<8x128xf32> to vector<8x128xbf16>
    %cst = arith.constant dense<0.000000e+00> : vector<6x128xf32>
    %6 = tpu.matmul %4, %5, %cst {dimension_numbers = #tpu.dot_dimension_numbers<[1], [0], [0], [1], [0, 0, 1, 1], [], []>} : vector<6x8xbf16>, vector<8x128xbf16>, vector<6x128xf32> -> vector<6x128xf32>
    %7 = vector.broadcast %3 : vector<1x128xf32> to vector<6x128xf32>
    %8 = arith.addf %6, %7 : vector<6x128xf32>
    %c0_6 = arith.constant 0 : index
    %c0_7 = arith.constant 0 : index
    %c0_8 = arith.constant 0 : index
    %9 = vector.load %arg4[%c0_6, %c0_7, %c0_8] : memref<2x128x384xf32, #tpu.memory_space<vmem>>, vector<1x128x384xf32>
    %10 = vector.shape_cast %9 : vector<1x128x384xf32> to vector<128x384xf32>
    %c0_9 = arith.constant 0 : index
    %c0_10 = arith.constant 0 : index
    %c0_11 = arith.constant 0 : index
    %11 = vector.load %arg5[%c0_9, %c0_10, %c0_11] : memref<2x1x384xf32, #tpu.memory_space<vmem>>, vector<1x1x384xf32>
    %12 = vector.shape_cast %11 : vector<1x1x384xf32> to vector<1x384xf32>
    %13 = arith.truncf %8 : vector<6x128xf32> to vector<6x128xbf16>
    %14 = arith.truncf %10 : vector<128x384xf32> to vector<128x384xbf16>
    %cst_12 = arith.constant dense<0.000000e+00> : vector<6x384xf32>
    %15 = tpu.matmul %13, %14, %cst_12 {dimension_numbers = #tpu.dot_dimension_numbers<[1], [0], [0], [1], [0, 0, 1, 1], [], []>} : vector<6x128xbf16>, vector<128x384xbf16>, vector<6x384xf32> -> vector<6x384xf32>
    %16 = vector.broadcast %12 : vector<1x384xf32> to vector<6x384xf32>
    %17 = arith.addf %15, %16 : vector<6x384xf32>
    %18 = vector.extract_strided_slice %17 {offsets = [0, 0], sizes = [6, 32], strides = [1, 1]} : vector<6x384xf32> to vector<6x32xf32>
    %19 = vector.extract_strided_slice %17 {offsets = [0, 128], sizes = [6, 32], strides = [1, 1]} : vector<6x384xf32> to vector<6x32xf32>
    %20 = vector.extract_strided_slice %17 {offsets = [0, 256], sizes = [6, 32], strides = [1, 1]} : vector<6x384xf32> to vector<6x32xf32>
    %21 = arith.truncf %18 : vector<6x32xf32> to vector<6x32xbf16>
    %22 = arith.truncf %19 : vector<6x32xf32> to vector<6x32xbf16>
    %cst_13 = arith.constant dense<0.000000e+00> : vector<6x6xf32>
    %23 = tpu.matmul %21, %22, %cst_13 {dimension_numbers = #tpu.dot_dimension_numbers<[1], [1], [0], [0], [0, 0, 1, 0], [], []>} : vector<6x32xbf16>, vector<6x32xbf16>, vector<6x6xf32> -> vector<6x6xf32>
    %cst_14 = arith.constant 0.176776692 : f32
    %24 = vector.broadcast %cst_14 : f32 to vector<6x6xf32>
    %25 = arith.mulf %23, %24 : vector<6x6xf32>
    %cst_15 = arith.constant dense<0xFF800000> : vector<6xf32>
    %26 = vector.multi_reduction <maximumf>, %25, %cst_15 [1] : vector<6x6xf32> to vector<6xf32>
    %27 = vector.shape_cast %26 : vector<6xf32> to vector<6x1xf32>
    %28 = vector.broadcast %27 : vector<6x1xf32> to vector<6x6xf32>
    %29 = arith.subf %25, %28 : vector<6x6xf32>
    %30 = math.exp %29 : vector<6x6xf32>
    %cst_16 = arith.constant dense<0.000000e+00> : vector<6xf32>
    %31 = vector.multi_reduction <add>, %30, %cst_16 [1] : vector<6x6xf32> to vector<6xf32>
    %32 = vector.shape_cast %31 : vector<6xf32> to vector<6x1xf32>
    %33 = tpu.reciprocal %32 {approx = true} : vector<6x1xf32> -> vector<6x1xf32>
    %34 = vector.broadcast %33 : vector<6x1xf32> to vector<6x6xf32>
    %35 = arith.mulf %30, %34 : vector<6x6xf32>
    %36 = arith.truncf %35 : vector<6x6xf32> to vector<6x6xbf16>
    %37 = arith.truncf %20 : vector<6x32xf32> to vector<6x32xbf16>
    %cst_17 = arith.constant dense<0.000000e+00> : vector<6x32xf32>
    %38 = tpu.matmul %36, %37, %cst_17 {dimension_numbers = #tpu.dot_dimension_numbers<[1], [0], [0], [1], [0, 0, 1, 1], [], []>} : vector<6x6xbf16>, vector<6x32xbf16>, vector<6x32xf32> -> vector<6x32xf32>
    %39 = vector.extract_strided_slice %17 {offsets = [0, 32], sizes = [6, 32], strides = [1, 1]} : vector<6x384xf32> to vector<6x32xf32>
    %40 = vector.extract_strided_slice %17 {offsets = [0, 160], sizes = [6, 32], strides = [1, 1]} : vector<6x384xf32> to vector<6x32xf32>
    %41 = vector.extract_strided_slice %17 {offsets = [0, 288], sizes = [6, 32], strides = [1, 1]} : vector<6x384xf32> to vector<6x32xf32>
    %42 = arith.truncf %39 : vector<6x32xf32> to vector<6x32xbf16>
    %43 = arith.truncf %40 : vector<6x32xf32> to vector<6x32xbf16>
    %cst_18 = arith.constant dense<0.000000e+00> : vector<6x6xf32>
    %44 = tpu.matmul %42, %43, %cst_18 {dimension_numbers = #tpu.dot_dimension_numbers<[1], [1], [0], [0], [0, 0, 1, 0], [], []>} : vector<6x32xbf16>, vector<6x32xbf16>, vector<6x6xf32> -> vector<6x6xf32>
    %cst_19 = arith.constant 0.176776692 : f32
    %45 = vector.broadcast %cst_19 : f32 to vector<6x6xf32>
    %46 = arith.mulf %44, %45 : vector<6x6xf32>
    %cst_20 = arith.constant dense<0xFF800000> : vector<6xf32>
    %47 = vector.multi_reduction <maximumf>, %46, %cst_20 [1] : vector<6x6xf32> to vector<6xf32>
    %48 = vector.shape_cast %47 : vector<6xf32> to vector<6x1xf32>
    %49 = vector.broadcast %48 : vector<6x1xf32> to vector<6x6xf32>
    %50 = arith.subf %46, %49 : vector<6x6xf32>
    %51 = math.exp %50 : vector<6x6xf32>
    %cst_21 = arith.constant dense<0.000000e+00> : vector<6xf32>
    %52 = vector.multi_reduction <add>, %51, %cst_21 [1] : vector<6x6xf32> to vector<6xf32>
    %53 = vector.shape_cast %52 : vector<6xf32> to vector<6x1xf32>
    %54 = tpu.reciprocal %53 {approx = true} : vector<6x1xf32> -> vector<6x1xf32>
    %55 = vector.broadcast %54 : vector<6x1xf32> to vector<6x6xf32>
    %56 = arith.mulf %51, %55 : vector<6x6xf32>
    %57 = arith.truncf %56 : vector<6x6xf32> to vector<6x6xbf16>
    %58 = arith.truncf %41 : vector<6x32xf32> to vector<6x32xbf16>
    %cst_22 = arith.constant dense<0.000000e+00> : vector<6x32xf32>
    %59 = tpu.matmul %57, %58, %cst_22 {dimension_numbers = #tpu.dot_dimension_numbers<[1], [0], [0], [1], [0, 0, 1, 1], [], []>} : vector<6x6xbf16>, vector<6x32xbf16>, vector<6x32xf32> -> vector<6x32xf32>
    %60 = vector.extract_strided_slice %17 {offsets = [0, 64], sizes = [6, 32], strides = [1, 1]} : vector<6x384xf32> to vector<6x32xf32>
    %61 = vector.extract_strided_slice %17 {offsets = [0, 192], sizes = [6, 32], strides = [1, 1]} : vector<6x384xf32> to vector<6x32xf32>
    %62 = vector.extract_strided_slice %17 {offsets = [0, 320], sizes = [6, 32], strides = [1, 1]} : vector<6x384xf32> to vector<6x32xf32>
    %63 = arith.truncf %60 : vector<6x32xf32> to vector<6x32xbf16>
    %64 = arith.truncf %61 : vector<6x32xf32> to vector<6x32xbf16>
    %cst_23 = arith.constant dense<0.000000e+00> : vector<6x6xf32>
    %65 = tpu.matmul %63, %64, %cst_23 {dimension_numbers = #tpu.dot_dimension_numbers<[1], [1], [0], [0], [0, 0, 1, 0], [], []>} : vector<6x32xbf16>, vector<6x32xbf16>, vector<6x6xf32> -> vector<6x6xf32>
    %cst_24 = arith.constant 0.176776692 : f32
    %66 = vector.broadcast %cst_24 : f32 to vector<6x6xf32>
    %67 = arith.mulf %65, %66 : vector<6x6xf32>
    %cst_25 = arith.constant dense<0xFF800000> : vector<6xf32>
    %68 = vector.multi_reduction <maximumf>, %67, %cst_25 [1] : vector<6x6xf32> to vector<6xf32>
    %69 = vector.shape_cast %68 : vector<6xf32> to vector<6x1xf32>
    %70 = vector.broadcast %69 : vector<6x1xf32> to vector<6x6xf32>
    %71 = arith.subf %67, %70 : vector<6x6xf32>
    %72 = math.exp %71 : vector<6x6xf32>
    %cst_26 = arith.constant dense<0.000000e+00> : vector<6xf32>
    %73 = vector.multi_reduction <add>, %72, %cst_26 [1] : vector<6x6xf32> to vector<6xf32>
    %74 = vector.shape_cast %73 : vector<6xf32> to vector<6x1xf32>
    %75 = tpu.reciprocal %74 {approx = true} : vector<6x1xf32> -> vector<6x1xf32>
    %76 = vector.broadcast %75 : vector<6x1xf32> to vector<6x6xf32>
    %77 = arith.mulf %72, %76 : vector<6x6xf32>
    %78 = arith.truncf %77 : vector<6x6xf32> to vector<6x6xbf16>
    %79 = arith.truncf %62 : vector<6x32xf32> to vector<6x32xbf16>
    %cst_27 = arith.constant dense<0.000000e+00> : vector<6x32xf32>
    %80 = tpu.matmul %78, %79, %cst_27 {dimension_numbers = #tpu.dot_dimension_numbers<[1], [0], [0], [1], [0, 0, 1, 1], [], []>} : vector<6x6xbf16>, vector<6x32xbf16>, vector<6x32xf32> -> vector<6x32xf32>
    %81 = vector.extract_strided_slice %17 {offsets = [0, 96], sizes = [6, 32], strides = [1, 1]} : vector<6x384xf32> to vector<6x32xf32>
    %82 = vector.extract_strided_slice %17 {offsets = [0, 224], sizes = [6, 32], strides = [1, 1]} : vector<6x384xf32> to vector<6x32xf32>
    %83 = vector.extract_strided_slice %17 {offsets = [0, 352], sizes = [6, 32], strides = [1, 1]} : vector<6x384xf32> to vector<6x32xf32>
    %84 = arith.truncf %81 : vector<6x32xf32> to vector<6x32xbf16>
    %85 = arith.truncf %82 : vector<6x32xf32> to vector<6x32xbf16>
    %cst_28 = arith.constant dense<0.000000e+00> : vector<6x6xf32>
    %86 = tpu.matmul %84, %85, %cst_28 {dimension_numbers = #tpu.dot_dimension_numbers<[1], [1], [0], [0], [0, 0, 1, 0], [], []>} : vector<6x32xbf16>, vector<6x32xbf16>, vector<6x6xf32> -> vector<6x6xf32>
    %cst_29 = arith.constant 0.176776692 : f32
    %87 = vector.broadcast %cst_29 : f32 to vector<6x6xf32>
    %88 = arith.mulf %86, %87 : vector<6x6xf32>
    %cst_30 = arith.constant dense<0xFF800000> : vector<6xf32>
    %89 = vector.multi_reduction <maximumf>, %88, %cst_30 [1] : vector<6x6xf32> to vector<6xf32>
    %90 = vector.shape_cast %89 : vector<6xf32> to vector<6x1xf32>
    %91 = vector.broadcast %90 : vector<6x1xf32> to vector<6x6xf32>
    %92 = arith.subf %88, %91 : vector<6x6xf32>
    %93 = math.exp %92 : vector<6x6xf32>
    %cst_31 = arith.constant dense<0.000000e+00> : vector<6xf32>
    %94 = vector.multi_reduction <add>, %93, %cst_31 [1] : vector<6x6xf32> to vector<6xf32>
    %95 = vector.shape_cast %94 : vector<6xf32> to vector<6x1xf32>
    %96 = tpu.reciprocal %95 {approx = true} : vector<6x1xf32> -> vector<6x1xf32>
    %97 = vector.broadcast %96 : vector<6x1xf32> to vector<6x6xf32>
    %98 = arith.mulf %93, %97 : vector<6x6xf32>
    %99 = arith.truncf %98 : vector<6x6xf32> to vector<6x6xbf16>
    %100 = arith.truncf %83 : vector<6x32xf32> to vector<6x32xbf16>
    %cst_32 = arith.constant dense<0.000000e+00> : vector<6x32xf32>
    %101 = tpu.matmul %99, %100, %cst_32 {dimension_numbers = #tpu.dot_dimension_numbers<[1], [0], [0], [1], [0, 0, 1, 1], [], []>} : vector<6x6xbf16>, vector<6x32xbf16>, vector<6x32xf32> -> vector<6x32xf32>
    %102 = tpu.concatenate %38, %59, %80, %101 in 1 : vector<6x32xf32>, vector<6x32xf32>, vector<6x32xf32>, vector<6x32xf32> -> vector<6x128xf32>
    %c0_33 = arith.constant 0 : index
    %c0_34 = arith.constant 0 : index
    %c0_35 = arith.constant 0 : index
    %103 = vector.load %arg6[%c0_33, %c0_34, %c0_35] : memref<2x128x128xf32, #tpu.memory_space<vmem>>, vector<1x128x128xf32>
    %104 = vector.shape_cast %103 : vector<1x128x128xf32> to vector<128x128xf32>
    %c0_36 = arith.constant 0 : index
    %c0_37 = arith.constant 0 : index
    %c0_38 = arith.constant 0 : index
    %105 = vector.load %arg7[%c0_36, %c0_37, %c0_38] : memref<2x1x128xf32, #tpu.memory_space<vmem>>, vector<1x1x128xf32>
    %106 = vector.shape_cast %105 : vector<1x1x128xf32> to vector<1x128xf32>
    %107 = arith.truncf %102 : vector<6x128xf32> to vector<6x128xbf16>
    %108 = arith.truncf %104 : vector<128x128xf32> to vector<128x128xbf16>
    %cst_39 = arith.constant dense<0.000000e+00> : vector<6x128xf32>
    %109 = tpu.matmul %107, %108, %cst_39 {dimension_numbers = #tpu.dot_dimension_numbers<[1], [0], [0], [1], [0, 0, 1, 1], [], []>} : vector<6x128xbf16>, vector<128x128xbf16>, vector<6x128xf32> -> vector<6x128xf32>
    %110 = vector.broadcast %106 : vector<1x128xf32> to vector<6x128xf32>
    %111 = arith.addf %109, %110 : vector<6x128xf32>
    %112 = arith.addf %8, %111 : vector<6x128xf32>
    %c0_40 = arith.constant 0 : index
    %c0_41 = arith.constant 0 : index
    %c0_42 = arith.constant 0 : index
    %113 = vector.load %arg8[%c0_40, %c0_41, %c0_42] : memref<2x1x128xf32, #tpu.memory_space<vmem>>, vector<1x1x128xf32>
    %114 = vector.shape_cast %113 : vector<1x1x128xf32> to vector<1x128xf32>
    %c0_43 = arith.constant 0 : index
    %c0_44 = arith.constant 0 : index
    %c0_45 = arith.constant 0 : index
    %115 = vector.load %arg9[%c0_43, %c0_44, %c0_45] : memref<2x1x128xf32, #tpu.memory_space<vmem>>, vector<1x1x128xf32>
    %116 = vector.shape_cast %115 : vector<1x1x128xf32> to vector<1x128xf32>
    %cst_46 = arith.constant dense<0.000000e+00> : vector<6xf32>
    %117 = vector.multi_reduction <add>, %112, %cst_46 [1] : vector<6x128xf32> to vector<6xf32>
    %118 = vector.shape_cast %117 : vector<6xf32> to vector<6x1xf32>
    %cst_47 = arith.constant 1.280000e+02 : f32
    %119 = vector.broadcast %cst_47 : f32 to vector<6x1xf32>
    %120 = arith.divf %118, %119 : vector<6x1xf32>
    %121 = vector.broadcast %120 : vector<6x1xf32> to vector<6x128xf32>
    %122 = arith.subf %112, %121 : vector<6x128xf32>
    %123 = arith.mulf %122, %122 : vector<6x128xf32>
    %cst_48 = arith.constant dense<0.000000e+00> : vector<6xf32>
    %124 = vector.multi_reduction <add>, %123, %cst_48 [1] : vector<6x128xf32> to vector<6xf32>
    %125 = vector.shape_cast %124 : vector<6xf32> to vector<6x1xf32>
    %cst_49 = arith.constant 1.280000e+02 : f32
    %126 = vector.broadcast %cst_49 : f32 to vector<6x1xf32>
    %127 = arith.divf %125, %126 : vector<6x1xf32>
    %cst_50 = arith.constant 9.99999974E-6 : f32
    %128 = vector.broadcast %cst_50 : f32 to vector<6x1xf32>
    %129 = arith.addf %127, %128 : vector<6x1xf32>
    %130 = math.rsqrt %129 : vector<6x1xf32>
    %131 = vector.broadcast %130 : vector<6x1xf32> to vector<6x128xf32>
    %132 = arith.mulf %122, %131 : vector<6x128xf32>
    %133 = vector.broadcast %114 : vector<1x128xf32> to vector<6x128xf32>
    %134 = arith.mulf %132, %133 : vector<6x128xf32>
    %135 = vector.broadcast %116 : vector<1x128xf32> to vector<6x128xf32>
    %136 = arith.addf %134, %135 : vector<6x128xf32>
    %c0_51 = arith.constant 0 : index
    %c0_52 = arith.constant 0 : index
    %c0_53 = arith.constant 0 : index
    %137 = vector.load %arg10[%c0_51, %c0_52, %c0_53] : memref<2x128x256xf32, #tpu.memory_space<vmem>>, vector<1x128x256xf32>
    %138 = vector.shape_cast %137 : vector<1x128x256xf32> to vector<128x256xf32>
    %c0_54 = arith.constant 0 : index
    %c0_55 = arith.constant 0 : index
    %c0_56 = arith.constant 0 : index
    %139 = vector.load %arg11[%c0_54, %c0_55, %c0_56] : memref<2x1x256xf32, #tpu.memory_space<vmem>>, vector<1x1x256xf32>
    %140 = vector.shape_cast %139 : vector<1x1x256xf32> to vector<1x256xf32>
    %141 = arith.truncf %136 : vector<6x128xf32> to vector<6x128xbf16>
    %142 = arith.truncf %138 : vector<128x256xf32> to vector<128x256xbf16>
    %cst_57 = arith.constant dense<0.000000e+00> : vector<6x256xf32>
    %143 = tpu.matmul %141, %142, %cst_57 {dimension_numbers = #tpu.dot_dimension_numbers<[1], [0], [0], [1], [0, 0, 1, 1], [], []>} : vector<6x128xbf16>, vector<128x256xbf16>, vector<6x256xf32> -> vector<6x256xf32>
    %144 = vector.broadcast %140 : vector<1x256xf32> to vector<6x256xf32>
    %145 = arith.addf %143, %144 : vector<6x256xf32>
    %cst_58 = arith.constant 0.000000e+00 : f32
    %146 = vector.broadcast %cst_58 : f32 to vector<6x256xf32>
    %147 = arith.maximumf %145, %146 : vector<6x256xf32>
    %c0_59 = arith.constant 0 : index
    %c0_60 = arith.constant 0 : index
    %c0_61 = arith.constant 0 : index
    %148 = vector.load %arg12[%c0_59, %c0_60, %c0_61] : memref<2x256x128xf32, #tpu.memory_space<vmem>>, vector<1x256x128xf32>
    %149 = vector.shape_cast %148 : vector<1x256x128xf32> to vector<256x128xf32>
    %c0_62 = arith.constant 0 : index
    %c0_63 = arith.constant 0 : index
    %c0_64 = arith.constant 0 : index
    %150 = vector.load %arg13[%c0_62, %c0_63, %c0_64] : memref<2x1x128xf32, #tpu.memory_space<vmem>>, vector<1x1x128xf32>
    %151 = vector.shape_cast %150 : vector<1x1x128xf32> to vector<1x128xf32>
    %152 = arith.truncf %147 : vector<6x256xf32> to vector<6x256xbf16>
    %153 = arith.truncf %149 : vector<256x128xf32> to vector<256x128xbf16>
    %cst_65 = arith.constant dense<0.000000e+00> : vector<6x128xf32>
    %154 = tpu.matmul %152, %153, %cst_65 {dimension_numbers = #tpu.dot_dimension_numbers<[1], [0], [0], [1], [0, 0, 1, 1], [], []>} : vector<6x256xbf16>, vector<256x128xbf16>, vector<6x128xf32> -> vector<6x128xf32>
    %155 = vector.broadcast %151 : vector<1x128xf32> to vector<6x128xf32>
    %156 = arith.addf %154, %155 : vector<6x128xf32>
    %157 = arith.addf %136, %156 : vector<6x128xf32>
    %c0_66 = arith.constant 0 : index
    %c0_67 = arith.constant 0 : index
    %c0_68 = arith.constant 0 : index
    %158 = vector.load %arg14[%c0_66, %c0_67, %c0_68] : memref<2x1x128xf32, #tpu.memory_space<vmem>>, vector<1x1x128xf32>
    %159 = vector.shape_cast %158 : vector<1x1x128xf32> to vector<1x128xf32>
    %c0_69 = arith.constant 0 : index
    %c0_70 = arith.constant 0 : index
    %c0_71 = arith.constant 0 : index
    %160 = vector.load %arg15[%c0_69, %c0_70, %c0_71] : memref<2x1x128xf32, #tpu.memory_space<vmem>>, vector<1x1x128xf32>
    %161 = vector.shape_cast %160 : vector<1x1x128xf32> to vector<1x128xf32>
    %cst_72 = arith.constant dense<0.000000e+00> : vector<6xf32>
    %162 = vector.multi_reduction <add>, %157, %cst_72 [1] : vector<6x128xf32> to vector<6xf32>
    %163 = vector.shape_cast %162 : vector<6xf32> to vector<6x1xf32>
    %cst_73 = arith.constant 1.280000e+02 : f32
    %164 = vector.broadcast %cst_73 : f32 to vector<6x1xf32>
    %165 = arith.divf %163, %164 : vector<6x1xf32>
    %166 = vector.broadcast %165 : vector<6x1xf32> to vector<6x128xf32>
    %167 = arith.subf %157, %166 : vector<6x128xf32>
    %168 = arith.mulf %167, %167 : vector<6x128xf32>
    %cst_74 = arith.constant dense<0.000000e+00> : vector<6xf32>
    %169 = vector.multi_reduction <add>, %168, %cst_74 [1] : vector<6x128xf32> to vector<6xf32>
    %170 = vector.shape_cast %169 : vector<6xf32> to vector<6x1xf32>
    %cst_75 = arith.constant 1.280000e+02 : f32
    %171 = vector.broadcast %cst_75 : f32 to vector<6x1xf32>
    %172 = arith.divf %170, %171 : vector<6x1xf32>
    %cst_76 = arith.constant 9.99999974E-6 : f32
    %173 = vector.broadcast %cst_76 : f32 to vector<6x1xf32>
    %174 = arith.addf %172, %173 : vector<6x1xf32>
    %175 = math.rsqrt %174 : vector<6x1xf32>
    %176 = vector.broadcast %175 : vector<6x1xf32> to vector<6x128xf32>
    %177 = arith.mulf %167, %176 : vector<6x128xf32>
    %178 = vector.broadcast %159 : vector<1x128xf32> to vector<6x128xf32>
    %179 = arith.mulf %177, %178 : vector<6x128xf32>
    %180 = vector.broadcast %161 : vector<1x128xf32> to vector<6x128xf32>
    %181 = arith.addf %179, %180 : vector<6x128xf32>
    %c1 = arith.constant 1 : index
    %c0_77 = arith.constant 0 : index
    %c0_78 = arith.constant 0 : index
    %182 = vector.load %arg4[%c1, %c0_77, %c0_78] : memref<2x128x384xf32, #tpu.memory_space<vmem>>, vector<1x128x384xf32>
    %183 = vector.shape_cast %182 : vector<1x128x384xf32> to vector<128x384xf32>
    %c1_79 = arith.constant 1 : index
    %c0_80 = arith.constant 0 : index
    %c0_81 = arith.constant 0 : index
    %184 = vector.load %arg5[%c1_79, %c0_80, %c0_81] : memref<2x1x384xf32, #tpu.memory_space<vmem>>, vector<1x1x384xf32>
    %185 = vector.shape_cast %184 : vector<1x1x384xf32> to vector<1x384xf32>
    %186 = arith.truncf %181 : vector<6x128xf32> to vector<6x128xbf16>
    %187 = arith.truncf %183 : vector<128x384xf32> to vector<128x384xbf16>
    %cst_82 = arith.constant dense<0.000000e+00> : vector<6x384xf32>
    %188 = tpu.matmul %186, %187, %cst_82 {dimension_numbers = #tpu.dot_dimension_numbers<[1], [0], [0], [1], [0, 0, 1, 1], [], []>} : vector<6x128xbf16>, vector<128x384xbf16>, vector<6x384xf32> -> vector<6x384xf32>
    %189 = vector.broadcast %185 : vector<1x384xf32> to vector<6x384xf32>
    %190 = arith.addf %188, %189 : vector<6x384xf32>
    %191 = vector.extract_strided_slice %190 {offsets = [0, 0], sizes = [6, 32], strides = [1, 1]} : vector<6x384xf32> to vector<6x32xf32>
    %192 = vector.extract_strided_slice %190 {offsets = [0, 128], sizes = [6, 32], strides = [1, 1]} : vector<6x384xf32> to vector<6x32xf32>
    %193 = vector.extract_strided_slice %190 {offsets = [0, 256], sizes = [6, 32], strides = [1, 1]} : vector<6x384xf32> to vector<6x32xf32>
    %194 = arith.truncf %191 : vector<6x32xf32> to vector<6x32xbf16>
    %195 = arith.truncf %192 : vector<6x32xf32> to vector<6x32xbf16>
    %cst_83 = arith.constant dense<0.000000e+00> : vector<6x6xf32>
    %196 = tpu.matmul %194, %195, %cst_83 {dimension_numbers = #tpu.dot_dimension_numbers<[1], [1], [0], [0], [0, 0, 1, 0], [], []>} : vector<6x32xbf16>, vector<6x32xbf16>, vector<6x6xf32> -> vector<6x6xf32>
    %cst_84 = arith.constant 0.176776692 : f32
    %197 = vector.broadcast %cst_84 : f32 to vector<6x6xf32>
    %198 = arith.mulf %196, %197 : vector<6x6xf32>
    %cst_85 = arith.constant dense<0xFF800000> : vector<6xf32>
    %199 = vector.multi_reduction <maximumf>, %198, %cst_85 [1] : vector<6x6xf32> to vector<6xf32>
    %200 = vector.shape_cast %199 : vector<6xf32> to vector<6x1xf32>
    %201 = vector.broadcast %200 : vector<6x1xf32> to vector<6x6xf32>
    %202 = arith.subf %198, %201 : vector<6x6xf32>
    %203 = math.exp %202 : vector<6x6xf32>
    %cst_86 = arith.constant dense<0.000000e+00> : vector<6xf32>
    %204 = vector.multi_reduction <add>, %203, %cst_86 [1] : vector<6x6xf32> to vector<6xf32>
    %205 = vector.shape_cast %204 : vector<6xf32> to vector<6x1xf32>
    %206 = tpu.reciprocal %205 {approx = true} : vector<6x1xf32> -> vector<6x1xf32>
    %207 = vector.broadcast %206 : vector<6x1xf32> to vector<6x6xf32>
    %208 = arith.mulf %203, %207 : vector<6x6xf32>
    %209 = arith.truncf %208 : vector<6x6xf32> to vector<6x6xbf16>
    %210 = arith.truncf %193 : vector<6x32xf32> to vector<6x32xbf16>
    %cst_87 = arith.constant dense<0.000000e+00> : vector<6x32xf32>
    %211 = tpu.matmul %209, %210, %cst_87 {dimension_numbers = #tpu.dot_dimension_numbers<[1], [0], [0], [1], [0, 0, 1, 1], [], []>} : vector<6x6xbf16>, vector<6x32xbf16>, vector<6x32xf32> -> vector<6x32xf32>
    %212 = vector.extract_strided_slice %190 {offsets = [0, 32], sizes = [6, 32], strides = [1, 1]} : vector<6x384xf32> to vector<6x32xf32>
    %213 = vector.extract_strided_slice %190 {offsets = [0, 160], sizes = [6, 32], strides = [1, 1]} : vector<6x384xf32> to vector<6x32xf32>
    %214 = vector.extract_strided_slice %190 {offsets = [0, 288], sizes = [6, 32], strides = [1, 1]} : vector<6x384xf32> to vector<6x32xf32>
    %215 = arith.truncf %212 : vector<6x32xf32> to vector<6x32xbf16>
    %216 = arith.truncf %213 : vector<6x32xf32> to vector<6x32xbf16>
    %cst_88 = arith.constant dense<0.000000e+00> : vector<6x6xf32>
    %217 = tpu.matmul %215, %216, %cst_88 {dimension_numbers = #tpu.dot_dimension_numbers<[1], [1], [0], [0], [0, 0, 1, 0], [], []>} : vector<6x32xbf16>, vector<6x32xbf16>, vector<6x6xf32> -> vector<6x6xf32>
    %cst_89 = arith.constant 0.176776692 : f32
    %218 = vector.broadcast %cst_89 : f32 to vector<6x6xf32>
    %219 = arith.mulf %217, %218 : vector<6x6xf32>
    %cst_90 = arith.constant dense<0xFF800000> : vector<6xf32>
    %220 = vector.multi_reduction <maximumf>, %219, %cst_90 [1] : vector<6x6xf32> to vector<6xf32>
    %221 = vector.shape_cast %220 : vector<6xf32> to vector<6x1xf32>
    %222 = vector.broadcast %221 : vector<6x1xf32> to vector<6x6xf32>
    %223 = arith.subf %219, %222 : vector<6x6xf32>
    %224 = math.exp %223 : vector<6x6xf32>
    %cst_91 = arith.constant dense<0.000000e+00> : vector<6xf32>
    %225 = vector.multi_reduction <add>, %224, %cst_91 [1] : vector<6x6xf32> to vector<6xf32>
    %226 = vector.shape_cast %225 : vector<6xf32> to vector<6x1xf32>
    %227 = tpu.reciprocal %226 {approx = true} : vector<6x1xf32> -> vector<6x1xf32>
    %228 = vector.broadcast %227 : vector<6x1xf32> to vector<6x6xf32>
    %229 = arith.mulf %224, %228 : vector<6x6xf32>
    %230 = arith.truncf %229 : vector<6x6xf32> to vector<6x6xbf16>
    %231 = arith.truncf %214 : vector<6x32xf32> to vector<6x32xbf16>
    %cst_92 = arith.constant dense<0.000000e+00> : vector<6x32xf32>
    %232 = tpu.matmul %230, %231, %cst_92 {dimension_numbers = #tpu.dot_dimension_numbers<[1], [0], [0], [1], [0, 0, 1, 1], [], []>} : vector<6x6xbf16>, vector<6x32xbf16>, vector<6x32xf32> -> vector<6x32xf32>
    %233 = vector.extract_strided_slice %190 {offsets = [0, 64], sizes = [6, 32], strides = [1, 1]} : vector<6x384xf32> to vector<6x32xf32>
    %234 = vector.extract_strided_slice %190 {offsets = [0, 192], sizes = [6, 32], strides = [1, 1]} : vector<6x384xf32> to vector<6x32xf32>
    %235 = vector.extract_strided_slice %190 {offsets = [0, 320], sizes = [6, 32], strides = [1, 1]} : vector<6x384xf32> to vector<6x32xf32>
    %236 = arith.truncf %233 : vector<6x32xf32> to vector<6x32xbf16>
    %237 = arith.truncf %234 : vector<6x32xf32> to vector<6x32xbf16>
    %cst_93 = arith.constant dense<0.000000e+00> : vector<6x6xf32>
    %238 = tpu.matmul %236, %237, %cst_93 {dimension_numbers = #tpu.dot_dimension_numbers<[1], [1], [0], [0], [0, 0, 1, 0], [], []>} : vector<6x32xbf16>, vector<6x32xbf16>, vector<6x6xf32> -> vector<6x6xf32>
    %cst_94 = arith.constant 0.176776692 : f32
    %239 = vector.broadcast %cst_94 : f32 to vector<6x6xf32>
    %240 = arith.mulf %238, %239 : vector<6x6xf32>
    %cst_95 = arith.constant dense<0xFF800000> : vector<6xf32>
    %241 = vector.multi_reduction <maximumf>, %240, %cst_95 [1] : vector<6x6xf32> to vector<6xf32>
    %242 = vector.shape_cast %241 : vector<6xf32> to vector<6x1xf32>
    %243 = vector.broadcast %242 : vector<6x1xf32> to vector<6x6xf32>
    %244 = arith.subf %240, %243 : vector<6x6xf32>
    %245 = math.exp %244 : vector<6x6xf32>
    %cst_96 = arith.constant dense<0.000000e+00> : vector<6xf32>
    %246 = vector.multi_reduction <add>, %245, %cst_96 [1] : vector<6x6xf32> to vector<6xf32>
    %247 = vector.shape_cast %246 : vector<6xf32> to vector<6x1xf32>
    %248 = tpu.reciprocal %247 {approx = true} : vector<6x1xf32> -> vector<6x1xf32>
    %249 = vector.broadcast %248 : vector<6x1xf32> to vector<6x6xf32>
    %250 = arith.mulf %245, %249 : vector<6x6xf32>
    %251 = arith.truncf %250 : vector<6x6xf32> to vector<6x6xbf16>
    %252 = arith.truncf %235 : vector<6x32xf32> to vector<6x32xbf16>
    %cst_97 = arith.constant dense<0.000000e+00> : vector<6x32xf32>
    %253 = tpu.matmul %251, %252, %cst_97 {dimension_numbers = #tpu.dot_dimension_numbers<[1], [0], [0], [1], [0, 0, 1, 1], [], []>} : vector<6x6xbf16>, vector<6x32xbf16>, vector<6x32xf32> -> vector<6x32xf32>
    %254 = vector.extract_strided_slice %190 {offsets = [0, 96], sizes = [6, 32], strides = [1, 1]} : vector<6x384xf32> to vector<6x32xf32>
    %255 = vector.extract_strided_slice %190 {offsets = [0, 224], sizes = [6, 32], strides = [1, 1]} : vector<6x384xf32> to vector<6x32xf32>
    %256 = vector.extract_strided_slice %190 {offsets = [0, 352], sizes = [6, 32], strides = [1, 1]} : vector<6x384xf32> to vector<6x32xf32>
    %257 = arith.truncf %254 : vector<6x32xf32> to vector<6x32xbf16>
    %258 = arith.truncf %255 : vector<6x32xf32> to vector<6x32xbf16>
    %cst_98 = arith.constant dense<0.000000e+00> : vector<6x6xf32>
    %259 = tpu.matmul %257, %258, %cst_98 {dimension_numbers = #tpu.dot_dimension_numbers<[1], [1], [0], [0], [0, 0, 1, 0], [], []>} : vector<6x32xbf16>, vector<6x32xbf16>, vector<6x6xf32> -> vector<6x6xf32>
    %cst_99 = arith.constant 0.176776692 : f32
    %260 = vector.broadcast %cst_99 : f32 to vector<6x6xf32>
    %261 = arith.mulf %259, %260 : vector<6x6xf32>
    %cst_100 = arith.constant dense<0xFF800000> : vector<6xf32>
    %262 = vector.multi_reduction <maximumf>, %261, %cst_100 [1] : vector<6x6xf32> to vector<6xf32>
    %263 = vector.shape_cast %262 : vector<6xf32> to vector<6x1xf32>
    %264 = vector.broadcast %263 : vector<6x1xf32> to vector<6x6xf32>
    %265 = arith.subf %261, %264 : vector<6x6xf32>
    %266 = math.exp %265 : vector<6x6xf32>
    %cst_101 = arith.constant dense<0.000000e+00> : vector<6xf32>
    %267 = vector.multi_reduction <add>, %266, %cst_101 [1] : vector<6x6xf32> to vector<6xf32>
    %268 = vector.shape_cast %267 : vector<6xf32> to vector<6x1xf32>
    %269 = tpu.reciprocal %268 {approx = true} : vector<6x1xf32> -> vector<6x1xf32>
    %270 = vector.broadcast %269 : vector<6x1xf32> to vector<6x6xf32>
    %271 = arith.mulf %266, %270 : vector<6x6xf32>
    %272 = arith.truncf %271 : vector<6x6xf32> to vector<6x6xbf16>
    %273 = arith.truncf %256 : vector<6x32xf32> to vector<6x32xbf16>
    %cst_102 = arith.constant dense<0.000000e+00> : vector<6x32xf32>
    %274 = tpu.matmul %272, %273, %cst_102 {dimension_numbers = #tpu.dot_dimension_numbers<[1], [0], [0], [1], [0, 0, 1, 1], [], []>} : vector<6x6xbf16>, vector<6x32xbf16>, vector<6x32xf32> -> vector<6x32xf32>
    %275 = tpu.concatenate %211, %232, %253, %274 in 1 : vector<6x32xf32>, vector<6x32xf32>, vector<6x32xf32>, vector<6x32xf32> -> vector<6x128xf32>
    %c1_103 = arith.constant 1 : index
    %c0_104 = arith.constant 0 : index
    %c0_105 = arith.constant 0 : index
    %276 = vector.load %arg6[%c1_103, %c0_104, %c0_105] : memref<2x128x128xf32, #tpu.memory_space<vmem>>, vector<1x128x128xf32>
    %277 = vector.shape_cast %276 : vector<1x128x128xf32> to vector<128x128xf32>
    %c1_106 = arith.constant 1 : index
    %c0_107 = arith.constant 0 : index
    %c0_108 = arith.constant 0 : index
    %278 = vector.load %arg7[%c1_106, %c0_107, %c0_108] : memref<2x1x128xf32, #tpu.memory_space<vmem>>, vector<1x1x128xf32>
    %279 = vector.shape_cast %278 : vector<1x1x128xf32> to vector<1x128xf32>
    %280 = arith.truncf %275 : vector<6x128xf32> to vector<6x128xbf16>
    %281 = arith.truncf %277 : vector<128x128xf32> to vector<128x128xbf16>
    %cst_109 = arith.constant dense<0.000000e+00> : vector<6x128xf32>
    %282 = tpu.matmul %280, %281, %cst_109 {dimension_numbers = #tpu.dot_dimension_numbers<[1], [0], [0], [1], [0, 0, 1, 1], [], []>} : vector<6x128xbf16>, vector<128x128xbf16>, vector<6x128xf32> -> vector<6x128xf32>
    %283 = vector.broadcast %279 : vector<1x128xf32> to vector<6x128xf32>
    %284 = arith.addf %282, %283 : vector<6x128xf32>
    %285 = arith.addf %181, %284 : vector<6x128xf32>
    %c1_110 = arith.constant 1 : index
    %c0_111 = arith.constant 0 : index
    %c0_112 = arith.constant 0 : index
    %286 = vector.load %arg8[%c1_110, %c0_111, %c0_112] : memref<2x1x128xf32, #tpu.memory_space<vmem>>, vector<1x1x128xf32>
    %287 = vector.shape_cast %286 : vector<1x1x128xf32> to vector<1x128xf32>
    %c1_113 = arith.constant 1 : index
    %c0_114 = arith.constant 0 : index
    %c0_115 = arith.constant 0 : index
    %288 = vector.load %arg9[%c1_113, %c0_114, %c0_115] : memref<2x1x128xf32, #tpu.memory_space<vmem>>, vector<1x1x128xf32>
    %289 = vector.shape_cast %288 : vector<1x1x128xf32> to vector<1x128xf32>
    %cst_116 = arith.constant dense<0.000000e+00> : vector<6xf32>
    %290 = vector.multi_reduction <add>, %285, %cst_116 [1] : vector<6x128xf32> to vector<6xf32>
    %291 = vector.shape_cast %290 : vector<6xf32> to vector<6x1xf32>
    %cst_117 = arith.constant 1.280000e+02 : f32
    %292 = vector.broadcast %cst_117 : f32 to vector<6x1xf32>
    %293 = arith.divf %291, %292 : vector<6x1xf32>
    %294 = vector.broadcast %293 : vector<6x1xf32> to vector<6x128xf32>
    %295 = arith.subf %285, %294 : vector<6x128xf32>
    %296 = arith.mulf %295, %295 : vector<6x128xf32>
    %cst_118 = arith.constant dense<0.000000e+00> : vector<6xf32>
    %297 = vector.multi_reduction <add>, %296, %cst_118 [1] : vector<6x128xf32> to vector<6xf32>
    %298 = vector.shape_cast %297 : vector<6xf32> to vector<6x1xf32>
    %cst_119 = arith.constant 1.280000e+02 : f32
    %299 = vector.broadcast %cst_119 : f32 to vector<6x1xf32>
    %300 = arith.divf %298, %299 : vector<6x1xf32>
    %cst_120 = arith.constant 9.99999974E-6 : f32
    %301 = vector.broadcast %cst_120 : f32 to vector<6x1xf32>
    %302 = arith.addf %300, %301 : vector<6x1xf32>
    %303 = math.rsqrt %302 : vector<6x1xf32>
    %304 = vector.broadcast %303 : vector<6x1xf32> to vector<6x128xf32>
    %305 = arith.mulf %295, %304 : vector<6x128xf32>
    %306 = vector.broadcast %287 : vector<1x128xf32> to vector<6x128xf32>
    %307 = arith.mulf %305, %306 : vector<6x128xf32>
    %308 = vector.broadcast %289 : vector<1x128xf32> to vector<6x128xf32>
    %309 = arith.addf %307, %308 : vector<6x128xf32>
    %c1_121 = arith.constant 1 : index
    %c0_122 = arith.constant 0 : index
    %c0_123 = arith.constant 0 : index
    %310 = vector.load %arg10[%c1_121, %c0_122, %c0_123] : memref<2x128x256xf32, #tpu.memory_space<vmem>>, vector<1x128x256xf32>
    %311 = vector.shape_cast %310 : vector<1x128x256xf32> to vector<128x256xf32>
    %c1_124 = arith.constant 1 : index
    %c0_125 = arith.constant 0 : index
    %c0_126 = arith.constant 0 : index
    %312 = vector.load %arg11[%c1_124, %c0_125, %c0_126] : memref<2x1x256xf32, #tpu.memory_space<vmem>>, vector<1x1x256xf32>
    %313 = vector.shape_cast %312 : vector<1x1x256xf32> to vector<1x256xf32>
    %314 = arith.truncf %309 : vector<6x128xf32> to vector<6x128xbf16>
    %315 = arith.truncf %311 : vector<128x256xf32> to vector<128x256xbf16>
    %cst_127 = arith.constant dense<0.000000e+00> : vector<6x256xf32>
    %316 = tpu.matmul %314, %315, %cst_127 {dimension_numbers = #tpu.dot_dimension_numbers<[1], [0], [0], [1], [0, 0, 1, 1], [], []>} : vector<6x128xbf16>, vector<128x256xbf16>, vector<6x256xf32> -> vector<6x256xf32>
    %317 = vector.broadcast %313 : vector<1x256xf32> to vector<6x256xf32>
    %318 = arith.addf %316, %317 : vector<6x256xf32>
    %cst_128 = arith.constant 0.000000e+00 : f32
    %319 = vector.broadcast %cst_128 : f32 to vector<6x256xf32>
    %320 = arith.maximumf %318, %319 : vector<6x256xf32>
    %c1_129 = arith.constant 1 : index
    %c0_130 = arith.constant 0 : index
    %c0_131 = arith.constant 0 : index
    %321 = vector.load %arg12[%c1_129, %c0_130, %c0_131] : memref<2x256x128xf32, #tpu.memory_space<vmem>>, vector<1x256x128xf32>
    %322 = vector.shape_cast %321 : vector<1x256x128xf32> to vector<256x128xf32>
    %c1_132 = arith.constant 1 : index
    %c0_133 = arith.constant 0 : index
    %c0_134 = arith.constant 0 : index
    %323 = vector.load %arg13[%c1_132, %c0_133, %c0_134] : memref<2x1x128xf32, #tpu.memory_space<vmem>>, vector<1x1x128xf32>
    %324 = vector.shape_cast %323 : vector<1x1x128xf32> to vector<1x128xf32>
    %325 = arith.truncf %320 : vector<6x256xf32> to vector<6x256xbf16>
    %326 = arith.truncf %322 : vector<256x128xf32> to vector<256x128xbf16>
    %cst_135 = arith.constant dense<0.000000e+00> : vector<6x128xf32>
    %327 = tpu.matmul %325, %326, %cst_135 {dimension_numbers = #tpu.dot_dimension_numbers<[1], [0], [0], [1], [0, 0, 1, 1], [], []>} : vector<6x256xbf16>, vector<256x128xbf16>, vector<6x128xf32> -> vector<6x128xf32>
    %328 = vector.broadcast %324 : vector<1x128xf32> to vector<6x128xf32>
    %329 = arith.addf %327, %328 : vector<6x128xf32>
    %330 = arith.addf %309, %329 : vector<6x128xf32>
    %c1_136 = arith.constant 1 : index
    %c0_137 = arith.constant 0 : index
    %c0_138 = arith.constant 0 : index
    %331 = vector.load %arg14[%c1_136, %c0_137, %c0_138] : memref<2x1x128xf32, #tpu.memory_space<vmem>>, vector<1x1x128xf32>
    %332 = vector.shape_cast %331 : vector<1x1x128xf32> to vector<1x128xf32>
    %c1_139 = arith.constant 1 : index
    %c0_140 = arith.constant 0 : index
    %c0_141 = arith.constant 0 : index
    %333 = vector.load %arg15[%c1_139, %c0_140, %c0_141] : memref<2x1x128xf32, #tpu.memory_space<vmem>>, vector<1x1x128xf32>
    %334 = vector.shape_cast %333 : vector<1x1x128xf32> to vector<1x128xf32>
    %cst_142 = arith.constant dense<0.000000e+00> : vector<6xf32>
    %335 = vector.multi_reduction <add>, %330, %cst_142 [1] : vector<6x128xf32> to vector<6xf32>
    %336 = vector.shape_cast %335 : vector<6xf32> to vector<6x1xf32>
    %cst_143 = arith.constant 1.280000e+02 : f32
    %337 = vector.broadcast %cst_143 : f32 to vector<6x1xf32>
    %338 = arith.divf %336, %337 : vector<6x1xf32>
    %339 = vector.broadcast %338 : vector<6x1xf32> to vector<6x128xf32>
    %340 = arith.subf %330, %339 : vector<6x128xf32>
    %341 = arith.mulf %340, %340 : vector<6x128xf32>
    %cst_144 = arith.constant dense<0.000000e+00> : vector<6xf32>
    %342 = vector.multi_reduction <add>, %341, %cst_144 [1] : vector<6x128xf32> to vector<6xf32>
    %343 = vector.shape_cast %342 : vector<6xf32> to vector<6x1xf32>
    %cst_145 = arith.constant 1.280000e+02 : f32
    %344 = vector.broadcast %cst_145 : f32 to vector<6x1xf32>
    %345 = arith.divf %343, %344 : vector<6x1xf32>
    %cst_146 = arith.constant 9.99999974E-6 : f32
    %346 = vector.broadcast %cst_146 : f32 to vector<6x1xf32>
    %347 = arith.addf %345, %346 : vector<6x1xf32>
    %348 = math.rsqrt %347 : vector<6x1xf32>
    %349 = vector.broadcast %348 : vector<6x1xf32> to vector<6x128xf32>
    %350 = arith.mulf %340, %349 : vector<6x128xf32>
    %351 = vector.broadcast %332 : vector<1x128xf32> to vector<6x128xf32>
    %352 = arith.mulf %350, %351 : vector<6x128xf32>
    %353 = vector.broadcast %334 : vector<1x128xf32> to vector<6x128xf32>
    %354 = arith.addf %352, %353 : vector<6x128xf32>
    %c0_147 = arith.constant 0 : index
    %c0_148 = arith.constant 0 : index
    %355 = vector.load %arg16[%c0_147, %c0_148] : memref<1x128xf32, #tpu.memory_space<vmem>>, vector<1x128xf32>
    %c0_149 = arith.constant 0 : index
    %c0_150 = arith.constant 0 : index
    %356 = vector.load %arg17[%c0_149, %c0_150] : memref<1x128xf32, #tpu.memory_space<vmem>>, vector<1x128xf32>
    %cst_151 = arith.constant dense<0.000000e+00> : vector<6xf32>
    %357 = vector.multi_reduction <add>, %354, %cst_151 [1] : vector<6x128xf32> to vector<6xf32>
    %358 = vector.shape_cast %357 : vector<6xf32> to vector<6x1xf32>
    %cst_152 = arith.constant 1.280000e+02 : f32
    %359 = vector.broadcast %cst_152 : f32 to vector<6x1xf32>
    %360 = arith.divf %358, %359 : vector<6x1xf32>
    %361 = vector.broadcast %360 : vector<6x1xf32> to vector<6x128xf32>
    %362 = arith.subf %354, %361 : vector<6x128xf32>
    %363 = arith.mulf %362, %362 : vector<6x128xf32>
    %cst_153 = arith.constant dense<0.000000e+00> : vector<6xf32>
    %364 = vector.multi_reduction <add>, %363, %cst_153 [1] : vector<6x128xf32> to vector<6xf32>
    %365 = vector.shape_cast %364 : vector<6xf32> to vector<6x1xf32>
    %cst_154 = arith.constant 1.280000e+02 : f32
    %366 = vector.broadcast %cst_154 : f32 to vector<6x1xf32>
    %367 = arith.divf %365, %366 : vector<6x1xf32>
    %cst_155 = arith.constant 9.99999974E-6 : f32
    %368 = vector.broadcast %cst_155 : f32 to vector<6x1xf32>
    %369 = arith.addf %367, %368 : vector<6x1xf32>
    %370 = math.rsqrt %369 : vector<6x1xf32>
    %371 = vector.broadcast %370 : vector<6x1xf32> to vector<6x128xf32>
    %372 = arith.mulf %362, %371 : vector<6x128xf32>
    %373 = vector.broadcast %355 : vector<1x128xf32> to vector<6x128xf32>
    %374 = arith.mulf %372, %373 : vector<6x128xf32>
    %375 = vector.broadcast %356 : vector<1x128xf32> to vector<6x128xf32>
    %376 = arith.addf %374, %375 : vector<6x128xf32>
    %c0_156 = arith.constant 0 : index
    %c0_157 = arith.constant 0 : index
    %377 = vector.load %arg18[%c0_156, %c0_157] : memref<128x8xf32, #tpu.memory_space<vmem>>, vector<128x8xf32>
    %c0_158 = arith.constant 0 : index
    %c0_159 = arith.constant 0 : index
    %378 = vector.load %arg19[%c0_158, %c0_159] : memref<1x8xf32, #tpu.memory_space<vmem>>, vector<1x8xf32>
    %379 = arith.truncf %376 : vector<6x128xf32> to vector<6x128xbf16>
    %380 = arith.truncf %377 : vector<128x8xf32> to vector<128x8xbf16>
    %cst_160 = arith.constant dense<0.000000e+00> : vector<6x8xf32>
    %381 = tpu.matmul %379, %380, %cst_160 {dimension_numbers = #tpu.dot_dimension_numbers<[1], [0], [0], [1], [0, 0, 1, 1], [], []>} : vector<6x128xbf16>, vector<128x8xbf16>, vector<6x8xf32> -> vector<6x8xf32>
    %382 = vector.broadcast %378 : vector<1x8xf32> to vector<6x8xf32>
    %383 = arith.addf %381, %382 : vector<6x8xf32>
    %c0_161 = arith.constant 0 : index
    %c0_162 = arith.constant 0 : index
    %c0_163 = arith.constant 0 : index
    %384 = vector.load %arg20[%c0_161, %c0_162, %c0_163] : memref<1x6x8xf32, #tpu.memory_space<vmem>>, vector<1x6x8xf32>
    %385 = vector.shape_cast %384 : vector<1x6x8xf32> to vector<6x8xf32>
    %386 = vector.shape_cast %383 : vector<6x8xf32> to vector<1x6x8xf32>
    tpu.vector_store %arg20[%c0_161, %c0_162, %c0_163], %386 {strides = array<i32>} : memref<1x6x8xf32, #tpu.memory_space<vmem>>, vector<1x6x8xf32>,
    return
  }
  func.func @transform_0(%arg0: i32) -> (i32, i32, i32) {
    %c0_i32 = arith.constant 0 : i32
    %c0_i32_0 = arith.constant 0 : i32
    %c0_i32_1 = arith.constant 0 : i32
    return %arg0, %c0_i32, %c0_i32_0 : i32, i32, i32
  }
  func.func @transform_1(%arg0: i32) -> (i32, i32) {
    %c0_i32 = arith.constant 0 : i32
    %c0_i32_0 = arith.constant 0 : i32
    %c0_i32_1 = arith.constant 0 : i32
    return %c0_i32, %c0_i32_0 : i32, i32
  }
  func.func @transform_2(%arg0: i32) -> (i32, i32) {
    %c0_i32 = arith.constant 0 : i32
    %c0_i32_0 = arith.constant 0 : i32
    %c0_i32_1 = arith.constant 0 : i32
    return %c0_i32, %c0_i32_0 : i32, i32
  }
  func.func @transform_3(%arg0: i32) -> (i32, i32, i32) {
    %c0_i32 = arith.constant 0 : i32
    %c0_i32_0 = arith.constant 0 : i32
    %c0_i32_1 = arith.constant 0 : i32
    %c0_i32_2 = arith.constant 0 : i32
    return %c0_i32, %c0_i32_0, %c0_i32_1 : i32, i32, i32
  }
  func.func @transform_4(%arg0: i32) -> (i32, i32, i32) {
    %c0_i32 = arith.constant 0 : i32
    %c0_i32_0 = arith.constant 0 : i32
    %c0_i32_1 = arith.constant 0 : i32
    %c0_i32_2 = arith.constant 0 : i32
    return %c0_i32, %c0_i32_0, %c0_i32_1 : i32, i32, i32
  }
  func.func @transform_5(%arg0: i32) -> (i32, i32, i32) {
    %c0_i32 = arith.constant 0 : i32
    %c0_i32_0 = arith.constant 0 : i32
    %c0_i32_1 = arith.constant 0 : i32
    %c0_i32_2 = arith.constant 0 : i32
    return %c0_i32, %c0_i32_0, %c0_i32_1 : i32, i32, i32
  }
  func.func @transform_6(%arg0: i32) -> (i32, i32, i32) {
    %c0_i32 = arith.constant 0 : i32
    %c0_i32_0 = arith.constant 0 : i32
    %c0_i32_1 = arith.constant 0 : i32
    %c0_i32_2 = arith.constant 0 : i32
    return %c0_i32, %c0_i32_0, %c0_i32_1 : i32, i32, i32
  }
  func.func @transform_7(%arg0: i32) -> (i32, i32, i32) {
    %c0_i32 = arith.constant 0 : i32
    %c0_i32_0 = arith.constant 0 : i32
    %c0_i32_1 = arith.constant 0 : i32
    %c0_i32_2 = arith.constant 0 : i32
    return %c0_i32, %c0_i32_0, %c0_i32_1 : i32, i32, i32
  }
  func.func @transform_8(%arg0: i32) -> (i32, i32, i32) {
    %c0_i32 = arith.constant 0 : i32
    %c0_i32_0 = arith.constant 0 : i32
    %c0_i32_1 = arith.constant 0 : i32
    %c0_i32_2 = arith.constant 0 : i32
    return %c0_i32, %c0_i32_0, %c0_i32_1 : i32, i32, i32
  }
  func.func @transform_9(%arg0: i32) -> (i32, i32, i32) {
    %c0_i32 = arith.constant 0 : i32
    %c0_i32_0 = arith.constant 0 : i32
    %c0_i32_1 = arith.constant 0 : i32
    %c0_i32_2 = arith.constant 0 : i32
    return %c0_i32, %c0_i32_0, %c0_i32_1 : i32, i32, i32
  }
  func.func @transform_10(%arg0: i32) -> (i32, i32, i32) {
    %c0_i32 = arith.constant 0 : i32
    %c0_i32_0 = arith.constant 0 : i32
    %c0_i32_1 = arith.constant 0 : i32
    %c0_i32_2 = arith.constant 0 : i32
    return %c0_i32, %c0_i32_0, %c0_i32_1 : i32, i32, i32
  }
  func.func @transform_11(%arg0: i32) -> (i32, i32, i32) {
    %c0_i32 = arith.constant 0 : i32
    %c0_i32_0 = arith.constant 0 : i32
    %c0_i32_1 = arith.constant 0 : i32
    %c0_i32_2 = arith.constant 0 : i32
    return %c0_i32, %c0_i32_0, %c0_i32_1 : i32, i32, i32
  }
  func.func @transform_12(%arg0: i32) -> (i32, i32, i32) {
    %c0_i32 = arith.constant 0 : i32
    %c0_i32_0 = arith.constant 0 : i32
    %c0_i32_1 = arith.constant 0 : i32
    %c0_i32_2 = arith.constant 0 : i32
    return %c0_i32, %c0_i32_0, %c0_i32_1 : i32, i32, i32
  }
  func.func @transform_13(%arg0: i32) -> (i32, i32, i32) {
    %c0_i32 = arith.constant 0 : i32
    %c0_i32_0 = arith.constant 0 : i32
    %c0_i32_1 = arith.constant 0 : i32
    %c0_i32_2 = arith.constant 0 : i32
    return %c0_i32, %c0_i32_0, %c0_i32_1 : i32, i32, i32
  }
  func.func @transform_14(%arg0: i32) -> (i32, i32, i32) {
    %c0_i32 = arith.constant 0 : i32
    %c0_i32_0 = arith.constant 0 : i32
    %c0_i32_1 = arith.constant 0 : i32
    %c0_i32_2 = arith.constant 0 : i32
    return %c0_i32, %c0_i32_0, %c0_i32_1 : i32, i32, i32
  }
  func.func @transform_15(%arg0: i32) -> (i32, i32) {
    %c0_i32 = arith.constant 0 : i32
    %c0_i32_0 = arith.constant 0 : i32
    %c0_i32_1 = arith.constant 0 : i32
    return %c0_i32, %c0_i32_0 : i32, i32
  }
  func.func @transform_16(%arg0: i32) -> (i32, i32) {
    %c0_i32 = arith.constant 0 : i32
    %c0_i32_0 = arith.constant 0 : i32
    %c0_i32_1 = arith.constant 0 : i32
    return %c0_i32, %c0_i32_0 : i32, i32
  }
  func.func @transform_17(%arg0: i32) -> (i32, i32) {
    %c0_i32 = arith.constant 0 : i32
    %c0_i32_0 = arith.constant 0 : i32
    %c0_i32_1 = arith.constant 0 : i32
    return %c0_i32, %c0_i32_0 : i32, i32
  }
  func.func @transform_18(%arg0: i32) -> (i32, i32) {
    %c0_i32 = arith.constant 0 : i32
    %c0_i32_0 = arith.constant 0 : i32
    %c0_i32_1 = arith.constant 0 : i32
    return %c0_i32, %c0_i32_0 : i32, i32
  }
  func.func @transform_19(%arg0: i32) -> (i32, i32, i32) {
    %c0_i32 = arith.constant 0 : i32
    %c0_i32_0 = arith.constant 0 : i32
    %c0_i32_1 = arith.constant 0 : i32
    return %arg0, %c0_i32, %c0_i32_0 : i32, i32, i32
  }
}

</mosaic_0001>

<bundles_post_ra>
// kernel: itransformer_forward.1
= control target key start
LH: loop header
LB: loop body
LE: loop exit
PB: predicated region body
PF: predicated region fallthrough
CT: control target
= control target key end

     0   :  { %s5564_s0 = inlined_call_operand.hbm [shape: f32[2,6,8], index: 0, kind: input, shape index: {}]   ;;  %s5565_s1 = inlined_call_operand.hbm [shape: f32[8,128], index: 1, kind: input, shape index: {}]   ;;  %s5566_s2 = inlined_call_operand.hbm [shape: f32[1,128], index: 2, kind: input, shape index: {}]   ;;  %s5567_s3 = inlined_call_operand.hbm [shape: f32[2,128,384], index: 3, kind: input, shape index: {}]   ;;  %s5568_s4 = inlined_call_operand.hbm [shape: f32[2,1,384], index: 4, kind: input, shape index: {}]   ;;  %s5569_s5 = inlined_call_operand.hbm [shape: f32[2,128,128], index: 5, kind: input, shape index: {}]   ;;  %s5570_s6 = inlined_call_operand.hbm [shape: f32[2,1,128], index: 6, kind: input, shape index: {}]   ;;  %s5571_s7 = inlined_call_operand.hbm [shape: f32[2,1,128], index: 7, kind: input, shape index: {}]   ;;  %s5572_s8 = inlined_call_operand.hbm [shape: f32[2,1,128], index: 8, kind: input, shape index: {}]   ;;  %s5573_s9 = inlined_call_operand.hbm [shape: f32[2,128,256], index: 9, kind: input, shape index: {}]   ;;  %s5574_s10 = inlined_call_operand.hbm [shape: f32[2,1,256], index: 10, kind: input, shape index: {}]   ;;  %s5575_s11 = inlined_call_operand.hbm [shape: f32[2,256,128], index: 11, kind: input, shape index: {}]   ;;  %s5576_s12 = inlined_call_operand.hbm [shape: f32[2,1,128], index: 12, kind: input, shape index: {}]   ;;  %s5577_s13 = inlined_call_operand.hbm [shape: f32[2,1,128], index: 13, kind: input, shape index: {}]   ;;  %s5578_s14 = inlined_call_operand.hbm [shape: f32[2,1,128], index: 14, kind: input, shape index: {}]   ;;  %s5579_s15 = inlined_call_operand.hbm [shape: f32[1,128], index: 15, kind: input, shape index: {}]   ;;  %s5580_s16 = inlined_call_operand.hbm [shape: f32[1,128], index: 16, kind: input, shape index: {}]   ;;  %s5581_s17 = inlined_call_operand.hbm [shape: f32[128,8], index: 17, kind: input, shape index: {}]   ;;  %s5582_s18 = inlined_call_operand.hbm [shape: f32[1,8], index: 18, kind: input, shape index: {}]   ;;  %s5583_s19 = inlined_call_operand.hbm [shape: f32[2,6,8], index: 19, kind: output, shape index: {}]  }
   0x1   :  { %5608 = sst [smem:[#allocation50_spill]] %s5564_s0 }
   0x2   :  { %5609 = sst [smem:[#allocation51_spill]] %s5565_s1 }
   0x3   :  { %5610 = sst [smem:[#allocation52_spill]] %s5566_s2 }
   0x4   :  { %5611 = sst [smem:[#allocation53_spill]] %s5567_s3 }
   0x5   :  { %5612 = sst [smem:[#allocation54_spill]] %s5568_s4 }
   0x6   :  { %5613 = sst [smem:[#allocation55_spill]] %s5569_s5 }
   0x7   :  { %5614 = sst [smem:[#allocation56_spill]] %s5570_s6 }
   0x8   :  { %5615 = sst [smem:[#allocation57_spill]] %s5580_s16 }
   0x9   :  { %5616 = sst [smem:[#allocation58_spill]] %s5582_s18 }
   0xa   :  { %5617 = sst [smem:[#allocation59_spill]] %s5583_s19 }
   0xb   :  { %24 = vsyncpa [#allocation3], 0 }
   0xc   :  { %26 = vsyncpa [#allocation3 + $0x1], 0 }
   0xd   :  { %27 = vsyncpa [#allocation6], 0 }
   0xe   :  { %28 = vsyncpa [#allocation9], 0 }
   0xf   :  { %29 = vsyncpa [#allocation12], 0 }
  0x10   :  { %30 = vsyncpa [#allocation15], 0 }
  0x11   :  { %31 = vsyncpa [#allocation18], 0 }
  0x12   :  { %32 = vsyncpa [#allocation21], 0 }
  0x13   :  { %33 = vsyncpa [#allocation24], 0 }
  0x14   :  { %34 = vsyncpa [#allocation27], 0 }
  0x15   :  { %35 = vsyncpa [#allocation30], 0 }
  0x16   :  { %36 = vsyncpa [#allocation4], 0 }
  0x17   :  { %38 = vsyncpa [#allocation4 + $0x1], 0  ;;  %s4700_s0 = smov 0   ;;  %s4702_s30 = smov 0  }
  0x18   :  { %s4704_s20 = smov 0   ;;  %s4706_s21 = smov 0  }
  0x19 LB: > { %5618 = sst [smem:[#allocation44_spill]] %s4549_s0  ;;  %s4563_s1 = smov [#allocation5]   ;;  %s4561_s21 = sphi %s4706_s21, %s5679_s21   ;;  %s4557_s20 = sphi %s4704_s20, %s5678_s20   ;;  %s4553_s30 = sphi %s4702_s30, %s5677_s30   ;;  %s4549_s0 = sphi %s4700_s0, %s5676_s0  }
  0x1a   : > { %5619 = sst [smem:[#allocation45_spill]] %s4553_s30  ;;  %s492_s22 = sshll.u32 %s4563_s1, 4  ;;  %s493_s22 = int_to_ptr.vmem [resolvable:$true] %s492_s22 }
  0x1b   : > { %5620 = sst [smem:[#allocation46_spill]] %s4557_s20  ;;  %s4721_s2 = sadd.s32 4294967295, %s4561_s21  }
  0x1c   : > { %5621 = sst [smem:[#allocation47_spill]] %s4561_s21  ;;  %p3234_p0 = scmp.ge.s32.totalorder %s4561_s21, 1 }
  0x1d   : > { %5622 = sst [smem:[#allocation48_spill]] %s4721_s2  ;;  %p5593_p1 = scmp.eq.s32.totalorder %s4721_s2, 0 }
  0x1e   : > { %p479_p2 = scmp.lt.s32.totalorder %s4561_s21, 3  ;;  %s4564_s24 = smov [#allocation8]  }
  0x1f   : > { %s513_s25 = sshll.u32 %s4564_s24, 4  ;;  %s4565_s26 = smov [#allocation11]   ;;  %s4733_s25 = int_to_ptr.vmem [resolvable:$true] %s513_s25 }
  0x20   : > { %p4726_p3 = pnand %p3234_p0, %p479_p2  ;;  %s539_s27 = sshll.u32 %s4565_s26, 4  ;;  %s4741_s27 = int_to_ptr.vmem [resolvable:$true] %s539_s27 }
  0x21   : > { %s5626_s1 = sld [smem:[#allocation51_spill]] }
  0x22   : > { %s5623_s23 = scalar_select %p4726_p3, 1, 0 }
  0x23   : > { %p3715_p5 = pneg %p4726_p3 }
  0x24   : > { %5624 = sst [smem:[#allocation49_spill]] %s5623_s23 }
  0x25   : > { %p4737_p6 = pnand %p3715_p5, %p5593_p1 }
  0x27   : > { %s3925_s19 = scalar_lea.hbm %s5626_s1, 128  ;;  %p4751_p8 = pneg %p4737_p6 }
  0x28   : > { %p3926_p7 = scmp.ne.s32.totalorder %s5626_s1, %s3925_s19  ;;  %p3932_p11 = scmp.lt.u32.totalorder %s3925_s19, %s5626_s1 }
  0x2a   : > { %p3928_p9 = pnand %p4751_p8, %p3926_p7 }
  0x2c   : > { %p3929_p10 = pneg %p3928_p9 }
  0x2e   : > { %p3934_p12 = pnand %p3932_p11, %p3929_p10 }
  0x30   : > { %3937 = shalt.err (!%p3934_p12)
}
  0x31   : > { %s3938_s28 = scalar_lea.vmem %s493_s22, 128  ;;  %p3946_p5 = scmp.lt.s32.totalorder %s493_s22, %s493_s22 }
  0x32   : > { %p3939_p13 = scmp.ne.s32.totalorder %s493_s22, %s3938_s28  ;;  %p3947_p4 = scmp.lt.s32.totalorder %s3938_s28, %s3938_s28 }
  0x34   : > { %p3941_p0 = pnand %p3939_p13, %p4751_p8  ;;  %p3948_p1 = por %p3947_p4, %p3946_p5 }
  0x36   : > { %p3942_p2 = pneg %p3941_p0 }
  0x38   : > { %p3949_p3 = pnand %p3948_p1, %p3942_p2 }
  0x3a   : > { %3952 = shalt.err (!%p3949_p3)
}
  0x3b   : > { %3718 = dma.hbm_to_vmem [thread:$0]  (!%p4737_p6), %s5626_s1, 128, %s493_s22, [#allocation6]  }
  0x3c   : > { %s5628_s29 = sld [smem:[#allocation53_spill]] }
  0x42   : > { %s3953_s26 = scalar_lea.hbm %s5628_s29, 12288 }
  0x43   : > { %p3954_p7 = scmp.ne.s32.totalorder %s5628_s29, %s3953_s26  ;;  %p3960_p1 = scmp.lt.u32.totalorder %s3953_s26, %s5628_s29 }
  0x45   : > { %p3956_p9 = pnand %p3954_p7, %p4751_p8 }
  0x47   : > { %p3957_p4 = pneg %p3956_p9 }
  0x49   : > { %p3962_p3 = pnand %p3960_p1, %p3957_p4 }
  0x4b   : > { %3965 = shalt.err (!%p3962_p3)
}
  0x4c   : > { %s3966_s22 = scalar_lea.vmem %s4733_s25, 12288  ;;  %p3974_p13 = scmp.lt.s32.totalorder %s4733_s25, %s4733_s25 }
  0x4d   : > { %p3967_p10 = scmp.ne.s32.totalorder %s4733_s25, %s3966_s22  ;;  %p3975_p0 = scmp.lt.s32.totalorder %s3966_s22, %s3966_s22 }
  0x4f   : > { %p3969_p11 = pnand %p3967_p10, %p4751_p8  ;;  %p3976_p2 = por %p3975_p0, %p3974_p13 }
  0x51   : > { %p3970_p12 = pneg %p3969_p11 }
  0x53   : > { %p3977_p5 = pnand %p3976_p2, %p3970_p12 }
  0x55   : > { %3980 = shalt.err (!%p3977_p5)
}
  0x56   : > { %s4566_s30 = smov 384   ;;  %s4567_s20 = smov 24  }
  0x57   : > { %3724 = dma.hbm_to_vmem [thread:$0]  (!%p4737_p6), %s5628_s29, 12288, %s4733_s25, [#allocation9], %s4566_s30, %s4566_s30, %s4567_s20  }
  0x58   : > { %s5629_s5 = sld [smem:[#allocation55_spill]] }
  0x5e   : > { %s3981_s2 = scalar_lea.hbm %s5629_s5, 4096 }
  0x5f   : > { %p3982_p7 = scmp.ne.s32.totalorder %s5629_s5, %s3981_s2  ;;  %p3988_p1 = scmp.lt.u32.totalorder %s3981_s2, %s5629_s5 }
  0x61   : > { %p3984_p9 = pnand %p3982_p7, %p4751_p8 }
  0x63   : > { %p3985_p4 = pneg %p3984_p9 }
  0x65   : > { %p3990_p3 = pnand %p3988_p1, %p3985_p4 }
  0x67   : > { %3993 = shalt.err (!%p3990_p3)
}
  0x68   : > { %s3994_s25 = scalar_lea.vmem %s4741_s27, 4096  ;;  %p4002_p13 = scmp.lt.s32.totalorder %s4741_s27, %s4741_s27 }
  0x69   : > { %p3995_p10 = scmp.ne.s32.totalorder %s4741_s27, %s3994_s25  ;;  %p4003_p0 = scmp.lt.s32.totalorder %s3994_s25, %s3994_s25 }
  0x6b   : > { %p3997_p11 = pnand %p3995_p10, %p4751_p8  ;;  %p4004_p2 = por %p4003_p0, %p4002_p13 }
  0x6d   : > { %p3998_p12 = pneg %p3997_p11 }
  0x6f   : > { %p4005_p5 = pnand %p4004_p2, %p3998_p12 }
  0x71   : > { %4008 = shalt.err (!%p4005_p5)
}
  0x72   : > { %s4568_s30 = smov 128   ;;  %s4569_s1 = smov 8  }
  0x73   : > { %3730 = dma.hbm_to_vmem [thread:$0]  (!%p4737_p6), %s5629_s5, 4096, %s4741_s27, [#allocation12], %s4568_s30, %s4568_s30, %s4569_s1  }
  0x74   : > { %s4570_s0 = smov [#allocation14]   ;;  %s4571_s19 = smov [#allocation17]  }
  0x75   : > { %s565_s23 = sshll.u32 %s4570_s0, 4  ;;  %s591_s2 = sshll.u32 %s4571_s19, 4  ;;  %s566_s23 = int_to_ptr.vmem [resolvable:$true] %s565_s23  ;;  %s592_s2 = int_to_ptr.vmem [resolvable:$true] %s591_s2 }
  0x76   : > { %s4009_s22 = scalar_lea.hbm %s5571_s7, 32 }
  0x77   : > { %p4010_p7 = scmp.ne.s32.totalorder %s5571_s7, %s4009_s22  ;;  %p4016_p1 = scmp.lt.u32.totalorder %s4009_s22, %s5571_s7 }
  0x79   : > { %p4012_p9 = pnand %p4010_p7, %p4751_p8 }
  0x7b   : > { %p4013_p4 = pneg %p4012_p9 }
  0x7d   : > { %p4018_p3 = pnand %p4016_p1, %p4013_p4 }
  0x7f   : > { %4021 = shalt.err (!%p4018_p3)
}
  0x80   : > { %s4022_s27 = scalar_lea.vmem %s566_s23, 32  ;;  %p4030_p13 = scmp.lt.s32.totalorder %s566_s23, %s566_s23 }
  0x81   : > { %p4023_p10 = scmp.ne.s32.totalorder %s566_s23, %s4022_s27  ;;  %p4031_p0 = scmp.lt.s32.totalorder %s4022_s27, %s4022_s27 }
  0x83   : > { %p4025_p11 = pnand %p4023_p10, %p4751_p8  ;;  %p4032_p2 = por %p4031_p0, %p4030_p13 }
  0x85   : > { %p4026_p12 = pneg %p4025_p11 }
  0x87   : > { %p4033_p5 = pnand %p4032_p2, %p4026_p12 }
  0x89   : > { %4036 = shalt.err (!%p4033_p5)
}
  0x8a   : > { %s5605_s29 = smov 16   ;;  %s5603_s20 = smov 1  }
  0x8b   : > { %3736 = dma.hbm_to_vmem [thread:$0]  (!%p4737_p6), %s5571_s7, 32, %s566_s23, [#allocation15], %s5605_s29, %s5605_s29, %s5603_s20  }
  0x8c   : > { %s4037_s19 = scalar_lea.hbm %s5573_s9, 8192 }
  0x8d   : > { %p4038_p7 = scmp.ne.s32.totalorder %s5573_s9, %s4037_s19  ;;  %p4044_p1 = scmp.lt.u32.totalorder %s4037_s19, %s5573_s9 }
  0x8f   : > { %p4040_p9 = pnand %p4038_p7, %p4751_p8 }
  0x91   : > { %p4041_p4 = pneg %p4040_p9 }
  0x93   : > { %p4046_p3 = pnand %p4044_p1, %p4041_p4 }
  0x95   : > { %4049 = shalt.err (!%p4046_p3)
}
  0x96   : > { %s4050_s27 = scalar_lea.vmem %s592_s2, 8192  ;;  %p4058_p13 = scmp.lt.s32.totalorder %s592_s2, %s592_s2 }
  0x97   : > { %p4051_p10 = scmp.ne.s32.totalorder %s592_s2, %s4050_s27  ;;  %p4059_p0 = scmp.lt.s32.totalorder %s4050_s27, %s4050_s27 }
  0x99   : > { %p4053_p11 = pnand %p4051_p10, %p4751_p8  ;;  %p4060_p2 = por %p4059_p0, %p4058_p13 }
  0x9b   : > { %p4054_p12 = pneg %p4053_p11 }
  0x9d   : > { %p4061_p5 = pnand %p4060_p2, %p4054_p12 }
  0x9f   : > { %4064 = shalt.err (!%p4061_p5)
}
  0xa0   : > { %s4574_s23 = smov 256   ;;  %s4575_s21 = smov [#allocation20]  }
  0xa1   : > { %3742 = dma.hbm_to_vmem [thread:$0]  (!%p4737_p6), %s5573_s9, 8192, %s592_s2, [#allocation18], %s4574_s23, %s4574_s23, %s5605_s29  }
  0xa2   : > { %s617_s0 = sshll.u32 %s4575_s21, 4  ;;  %s4576_s19 = smov [#allocation23]   ;;  %s618_s0 = int_to_ptr.vmem [resolvable:$true] %s617_s0 }
  0xa3   : > { %s643_s26 = sshll.u32 %s4576_s19, 4  ;;  %s4065_s25 = scalar_lea.hbm %s5575_s11, 8192  ;;  %s4856_s26 = int_to_ptr.vmem [resolvable:$true] %s643_s26 }
  0xa4   : > { %p4066_p7 = scmp.ne.s32.totalorder %s5575_s11, %s4065_s25  ;;  %p4072_p1 = scmp.lt.u32.totalorder %s4065_s25, %s5575_s11 }
  0xa6   : > { %p4068_p9 = pnand %p4066_p7, %p4751_p8 }
  0xa8   : > { %p4069_p4 = pneg %p4068_p9 }
  0xaa   : > { %p4074_p3 = pnand %p4072_p1, %p4069_p4 }
  0xac   : > { %4077 = shalt.err (!%p4074_p3)
}
  0xad   : > { %s4078_s23 = scalar_lea.vmem %s618_s0, 8192  ;;  %p4086_p13 = scmp.lt.s32.totalorder %s618_s0, %s618_s0 }
  0xae   : > { %p4079_p10 = scmp.ne.s32.totalorder %s618_s0, %s4078_s23  ;;  %p4087_p0 = scmp.lt.s32.totalorder %s4078_s23, %s4078_s23 }
  0xb0   : > { %p4081_p11 = pnand %p4079_p10, %p4751_p8  ;;  %p4088_p2 = por %p4087_p0, %p4086_p13 }
  0xb2   : > { %p4082_p12 = pneg %p4081_p11 }
  0xb4   : > { %p4089_p5 = pnand %p4088_p2, %p4082_p12 }
  0xb6   : > { %4092 = shalt.err (!%p4089_p5)
}
  0xb7   : > { %3748 = dma.hbm_to_vmem [thread:$0]  (!%p4737_p6), %s5575_s11, 8192, %s618_s0, [#allocation21], %s4568_s30, %s4568_s30, %s4569_s1  }
  0xb8   : > { %s4093_s28 = scalar_lea.hbm %s5577_s13, 32 }
  0xb9   : > { %p4094_p7 = scmp.ne.s32.totalorder %s5577_s13, %s4093_s28  ;;  %p4100_p1 = scmp.lt.u32.totalorder %s4093_s28, %s5577_s13 }
  0xbb   : > { %p4096_p9 = pnand %p4094_p7, %p4751_p8 }
  0xbd   : > { %p4097_p4 = pneg %p4096_p9 }
  0xbf   : > { %p4102_p3 = pnand %p4100_p1, %p4097_p4 }
  0xc1   : > { %4105 = shalt.err (!%p4102_p3)
}
  0xc2   : > { %s4106_s0 = scalar_lea.vmem %s4856_s26, 32  ;;  %p4114_p13 = scmp.lt.s32.totalorder %s4856_s26, %s4856_s26 }
  0xc3   : > { %p4107_p10 = scmp.ne.s32.totalorder %s4856_s26, %s4106_s0  ;;  %p4115_p0 = scmp.lt.s32.totalorder %s4106_s0, %s4106_s0 }
  0xc5   : > { %p4109_p11 = pnand %p4107_p10, %p4751_p8  ;;  %p4116_p2 = por %p4115_p0, %p4114_p13 }
  0xc7   : > { %p4110_p12 = pneg %p4109_p11 }
  0xc9   : > { %p4117_p5 = pnand %p4116_p2, %p4110_p12 }
  0xcb   : > { %4120 = shalt.err (!%p4117_p5)
}
  0xcc   : > { %s5630_s2 = smov 1   ;;  %s4577_s18 = smov [#allocation26]  }
  0xcd   : > { %3754 = dma.hbm_to_vmem [thread:$0]  (!%p4737_p6), %s5577_s13, 32, %s4856_s26, [#allocation24], %s5605_s29, %s5605_s29, %s5630_s2  }
  0xce   : > { %s670_s21 = sshll.u32 %s4577_s18, 4  ;;  %s4578_s19 = smov [#allocation29]   ;;  %s671_s21 = int_to_ptr.vmem [resolvable:$true] %s670_s21 }
  0xcf   : > { %s691_s28 = sshll.u32 %s4578_s19, 4  ;;  %s4121_s27 = scalar_lea.hbm %s5579_s15, 16  ;;  %s4905_s28 = int_to_ptr.vmem [resolvable:$true] %s691_s28 }
  0xd0   : > { %p4122_p7 = scmp.ne.s32.totalorder %s5579_s15, %s4121_s27  ;;  %p4128_p1 = scmp.lt.u32.totalorder %s4121_s27, %s5579_s15 }
  0xd2   : > { %p4124_p9 = pnand %p4122_p7, %p4751_p8 }
  0xd4   : > { %p4125_p4 = pneg %p4124_p9 }
  0xd6   : > { %p4130_p3 = pnand %p4128_p1, %p4125_p4 }
  0xd8   : > { %4133 = shalt.err (!%p4130_p3)
}
  0xd9   : > { %s4134_s20 = scalar_lea.vmem %s671_s21, 16  ;;  %s4141_s18 = scalar_lea.vmem %s671_s21, 32 }
  0xda   : > { %p4135_p10 = scmp.ne.s32.totalorder %s671_s21, %s4134_s20  ;;  %p4142_p13 = scmp.lt.s32.totalorder %s671_s21, %s671_s21 }
  0xdb   : > { %p4143_p0 = scmp.lt.s32.totalorder %s4141_s18, %s4134_s20 }
  0xdc   : > { %p4137_p11 = pnand %p4135_p10, %p4751_p8 }
  0xdd   : > { %p4144_p2 = por %p4143_p0, %p4142_p13 }
  0xde   : > { %p4138_p12 = pneg %p4137_p11 }
  0xe0   : > { %p4145_p5 = pnand %p4144_p2, %p4138_p12 }
  0xe2   : > { %4148 = shalt.err (!%p4145_p5)
}
  0xe3   : > { %3760 = dma.hbm_to_vmem [thread:$0]  (!%p4737_p6), %s5579_s15, 16, %s671_s21, [#allocation27]  }
  0xe4   : > { %s4149_s16 = scalar_lea.hbm %s5581_s17, 2048 }
  0xe5   : > { %p4150_p7 = scmp.ne.s32.totalorder %s5581_s17, %s4149_s16  ;;  %p4156_p1 = scmp.lt.u32.totalorder %s4149_s16, %s5581_s17 }
  0xe7   : > { %p4152_p9 = pnand %p4150_p7, %p4751_p8 }
  0xe9   : > { %p4153_p4 = pneg %p4152_p9 }
  0xeb   : > { %p4158_p3 = pnand %p4156_p1, %p4153_p4 }
  0xed   : > { %4161 = shalt.err (!%p4158_p3)
}
  0xee   : > { %s4162_s21 = scalar_lea.vmem %s4905_s28, 2048  ;;  %p4170_p13 = scmp.lt.s32.totalorder %s4905_s28, %s4905_s28 }
  0xef   : > { %p4163_p10 = scmp.ne.s32.totalorder %s4905_s28, %s4162_s21  ;;  %p4171_p0 = scmp.lt.s32.totalorder %s4162_s21, %s4162_s21 }
  0xf1   : > { %p4165_p11 = pnand %p4163_p10, %p4751_p8  ;;  %p4172_p2 = por %p4171_p0, %p4170_p13 }
  0xf3   : > { %p4166_p12 = pneg %p4165_p11 }
  0xf5   : > { %p4173_p5 = pnand %p4172_p2, %p4166_p12 }
  0xf7   : > { %4176 = shalt.err (!%p4173_p5)
}
  0xf8   : > { %3766 = dma.hbm_to_vmem [thread:$0]  (!%p4737_p6), %s5581_s17, 2048, %s4905_s28, [#allocation30], %s4568_s30, %s4568_s30, %s4569_s1  }
  0xf9   : > { %s4579_s22 = smov [#allocation7]   ;;  %s4580_s27 = smov [#allocation10]  }
  0xfa   : > { %s503_s25 = sshll.u32 %s4579_s22, 4  ;;  %s526_s16 = sshll.u32 %s4580_s27, 4  ;;  %s504_s25 = int_to_ptr.vmem [resolvable:$true] %s503_s25  ;;  %s4951_s16 = int_to_ptr.vmem [resolvable:$true] %s526_s16 }
  0xfb   : > { %s5631_s26 = sld [smem:[#allocation52_spill]] }
 0x101   : > { %s4177_s20 = scalar_lea.hbm %s5631_s26, 16 }
 0x102   : > { %p4178_p7 = scmp.ne.s32.totalorder %s5631_s26, %s4177_s20  ;;  %p4184_p1 = scmp.lt.u32.totalorder %s4177_s20, %s5631_s26 }
 0x104   : > { %p4180_p9 = pnand %p4178_p7, %p4751_p8 }
 0x106   : > { %p4181_p4 = pneg %p4180_p9 }
 0x108   : > { %p4186_p3 = pnand %p4184_p1, %p4181_p4 }
 0x10a   : > { %4189 = shalt.err (!%p4186_p3)
}
 0x10b   : > { %s4190_s1 = scalar_lea.vmem %s504_s25, 16  ;;  %s4197_s28 = scalar_lea.vmem %s504_s25, 32 }
 0x10c   : > { %p4191_p10 = scmp.ne.s32.totalorder %s504_s25, %s4190_s1  ;;  %p4198_p13 = scmp.lt.s32.totalorder %s504_s25, %s504_s25 }
 0x10d   : > { %p4199_p0 = scmp.lt.s32.totalorder %s4197_s28, %s4190_s1 }
 0x10e   : > { %p4193_p11 = pnand %p4191_p10, %p4751_p8 }
 0x10f   : > { %p4200_p2 = por %p4199_p0, %p4198_p13 }
 0x110   : > { %p4194_p12 = pneg %p4193_p11 }
 0x112   : > { %p4201_p5 = pnand %p4200_p2, %p4194_p12 }
 0x114   : > { %4204 = shalt.err (!%p4201_p5)
}
 0x115   : > { %3721 = dma.hbm_to_vmem [thread:$0]  (!%p4737_p6), %s5631_s26, 16, %s504_s25, [#allocation6]  }
 0x116   : > { %s5632_s4 = sld [smem:[#allocation54_spill]] }
 0x11c   : > { %s4205_s0 = scalar_lea.hbm %s5632_s4, 96 }
 0x11d   : > { %p4206_p7 = scmp.ne.s32.totalorder %s5632_s4, %s4205_s0  ;;  %p4212_p1 = scmp.lt.u32.totalorder %s4205_s0, %s5632_s4 }
 0x11f   : > { %p4208_p9 = pnand %p4206_p7, %p4751_p8 }
 0x121   : > { %p4209_p4 = pneg %p4208_p9 }
 0x123   : > { %p4214_p3 = pnand %p4212_p1, %p4209_p4 }
 0x125   : > { %4217 = shalt.err (!%p4214_p3)
}
 0x126   : > { %s4218_s25 = scalar_lea.vmem %s4951_s16, 96  ;;  %p4226_p13 = scmp.lt.s32.totalorder %s4951_s16, %s4951_s16 }
 0x127   : > { %p4219_p10 = scmp.ne.s32.totalorder %s4951_s16, %s4218_s25  ;;  %p4227_p0 = scmp.lt.s32.totalorder %s4218_s25, %s4218_s25 }
 0x129   : > { %p4221_p11 = pnand %p4219_p10, %p4751_p8  ;;  %p4228_p2 = por %p4227_p0, %p4226_p13 }
 0x12b   : > { %p4222_p12 = pneg %p4221_p11 }
 0x12d   : > { %p4229_p5 = pnand %p4228_p2, %p4222_p12 }
 0x12f   : > { %4232 = shalt.err (!%p4229_p5)
}
 0x130   : > { %s4581_s30 = smov 48   ;;  %s4582_s1 = smov 3  }
 0x131   : > { %3727 = dma.hbm_to_vmem [thread:$0]  (!%p4737_p6), %s5632_s4, 96, %s4951_s16, [#allocation9], %s4581_s30, %s4581_s30, %s4582_s1  }
 0x132   : > { %s4583_s19 = smov [#allocation13]   ;;  %s4584_s27 = smov [#allocation16]  }
 0x133   : > { %s552_s22 = sshll.u32 %s4583_s19, 4  ;;  %s578_s0 = sshll.u32 %s4584_s27, 4  ;;  %s553_s22 = int_to_ptr.vmem [resolvable:$true] %s552_s22  ;;  %s4994_s0 = int_to_ptr.vmem [resolvable:$true] %s578_s0 }
 0x134   : > { %s5633_s6 = sld [smem:[#allocation56_spill]] }
 0x13a   : > { %s4233_s21 = scalar_lea.hbm %s5633_s6, 32 }
 0x13b   : > { %p4234_p7 = scmp.ne.s32.totalorder %s5633_s6, %s4233_s21  ;;  %p4240_p1 = scmp.lt.u32.totalorder %s4233_s21, %s5633_s6 }
 0x13d   : > { %p4236_p9 = pnand %p4234_p7, %p4751_p8 }
 0x13f   : > { %p4237_p4 = pneg %p4236_p9 }
 0x141   : > { %p4242_p3 = pnand %p4240_p1, %p4237_p4 }
 0x143   : > { %4245 = shalt.err (!%p4242_p3)
}
 0x144   : > { %s4246_s30 = scalar_lea.vmem %s553_s22, 32  ;;  %p4254_p13 = scmp.lt.s32.totalorder %s553_s22, %s553_s22 }
 0x145   : > { %p4247_p10 = scmp.ne.s32.totalorder %s553_s22, %s4246_s30  ;;  %p4255_p0 = scmp.lt.s32.totalorder %s4246_s30, %s4246_s30 }
 0x147   : > { %p4249_p11 = pnand %p4247_p10, %p4751_p8  ;;  %p4256_p2 = por %p4255_p0, %p4254_p13 }
 0x149   : > { %p4250_p12 = pneg %p4249_p11 }
 0x14b   : > { %p4257_p5 = pnand %p4256_p2, %p4250_p12 }
 0x14d   : > { %4260 = shalt.err (!%p4257_p5)
}
 0x14e   : > { %s5634_s1 = smov 16   ;;  %s4261_s20 = scalar_lea.hbm %s5572_s8, 32 }
 0x14f   : > { %3733 = dma.hbm_to_vmem [thread:$0]  (!%p4737_p6), %s5633_s6, 32, %s553_s22, [#allocation12], %s5634_s1, %s5634_s1, %s5630_s2  }
 0x150   : > { %p4262_p7 = scmp.ne.s32.totalorder %s5572_s8, %s4261_s20  ;;  %p4268_p1 = scmp.lt.u32.totalorder %s4261_s20, %s5572_s8 }
 0x152   : > { %p4264_p9 = pnand %p4262_p7, %p4751_p8 }
 0x154   : > { %p4265_p4 = pneg %p4264_p9 }
 0x156   : > { %p4270_p3 = pnand %p4268_p1, %p4265_p4 }
 0x158   : > { %4273 = shalt.err (!%p4270_p3)
}
 0x159   : > { %s4274_s22 = scalar_lea.vmem %s4994_s0, 32  ;;  %p4282_p13 = scmp.lt.s32.totalorder %s4994_s0, %s4994_s0 }
 0x15a   : > { %p4275_p10 = scmp.ne.s32.totalorder %s4994_s0, %s4274_s22  ;;  %p4283_p0 = scmp.lt.s32.totalorder %s4274_s22, %s4274_s22 }
 0x15c   : > { %p4277_p11 = pnand %p4275_p10, %p4751_p8  ;;  %p4284_p2 = por %p4283_p0, %p4282_p13 }
 0x15e   : > { %p4278_p12 = pneg %p4277_p11 }
 0x160   : > { %p4285_p5 = pnand %p4284_p2, %p4278_p12 }
 0x162   : > { %4288 = shalt.err (!%p4285_p5)
}
 0x163   : > { %3739 = dma.hbm_to_vmem [thread:$0]  (!%p4737_p6), %s5572_s8, 32, %s4994_s0, [#allocation15], %s5634_s1, %s5634_s1, %s5630_s2  }
 0x164   : > { %s4585_s29 = smov [#allocation19]   ;;  %s4289_s20 = scalar_lea.hbm %s5574_s10, 64 }
 0x165   : > { %s604_s19 = sshll.u32 %s4585_s29, 4  ;;  %p4290_p7 = scmp.ne.s32.totalorder %s5574_s10, %s4289_s20  ;;  %s605_s19 = int_to_ptr.vmem [resolvable:$true] %s604_s19 }
 0x166   : > { %p4296_p1 = scmp.lt.u32.totalorder %s4289_s20, %s5574_s10 }
 0x167   : > { %p4292_p9 = pnand %p4290_p7, %p4751_p8 }
 0x169   : > { %p4293_p4 = pneg %p4292_p9 }
 0x16b   : > { %p4298_p3 = pnand %p4296_p1, %p4293_p4 }
 0x16d   : > { %4301 = shalt.err (!%p4298_p3)
}
 0x16e   : > { %s4302_s0 = scalar_lea.vmem %s605_s19, 64  ;;  %p4310_p13 = scmp.lt.s32.totalorder %s605_s19, %s605_s19 }
 0x16f   : > { %p4303_p10 = scmp.ne.s32.totalorder %s605_s19, %s4302_s0  ;;  %p4311_p0 = scmp.lt.s32.totalorder %s4302_s0, %s4302_s0 }
 0x171   : > { %p4305_p11 = pnand %p4303_p10, %p4751_p8  ;;  %p4312_p2 = por %p4311_p0, %p4310_p13 }
 0x173   : > { %p4306_p12 = pneg %p4305_p11 }
 0x175   : > { %p4313_p5 = pnand %p4312_p2, %p4306_p12 }
 0x177   : > { %4316 = shalt.err (!%p4313_p5)
}
 0x178   : > { %s4586_s22 = smov 32   ;;  %s4587_s16 = smov 2  }
 0x179   : > { %3745 = dma.hbm_to_vmem [thread:$0]  (!%p4737_p6), %s5574_s10, 64, %s605_s19, [#allocation18], %s4586_s22, %s4586_s22, %s4587_s16  }
 0x17a   : > { %s4588_s27 = smov [#allocation22]   ;;  %s4589_s20 = smov [#allocation25]  }
 0x17b   : > { %s630_s23 = sshll.u32 %s4588_s27, 4  ;;  %s656_s21 = sshll.u32 %s4589_s20, 4  ;;  %s631_s23 = int_to_ptr.vmem [resolvable:$true] %s630_s23  ;;  %s657_s21 = int_to_ptr.vmem [resolvable:$true] %s656_s21 }
 0x17c   : > { %s4317_s28 = scalar_lea.hbm %s5576_s12, 32 }
 0x17d   : > { %p4318_p7 = scmp.ne.s32.totalorder %s5576_s12, %s4317_s28  ;;  %p4324_p1 = scmp.lt.u32.totalorder %s4317_s28, %s5576_s12 }
 0x17f   : > { %p4320_p9 = pnand %p4318_p7, %p4751_p8 }
 0x181   : > { %p4321_p4 = pneg %p4320_p9 }
 0x183   : > { %p4326_p3 = pnand %p4324_p1, %p4321_p4 }
 0x185   : > { %4329 = shalt.err (!%p4326_p3)
}
 0x186   : > { %s4330_s19 = scalar_lea.vmem %s631_s23, 32  ;;  %p4338_p13 = scmp.lt.s32.totalorder %s631_s23, %s631_s23 }
 0x187   : > { %p4331_p10 = scmp.ne.s32.totalorder %s631_s23, %s4330_s19  ;;  %p4339_p0 = scmp.lt.s32.totalorder %s4330_s19, %s4330_s19 }
 0x189   : > { %p4333_p11 = pnand %p4331_p10, %p4751_p8  ;;  %p4340_p2 = por %p4339_p0, %p4338_p13 }
 0x18b   : > { %p4334_p12 = pneg %p4333_p11 }
 0x18d   : > { %p4341_p5 = pnand %p4340_p2, %p4334_p12 }
 0x18f   : > { %4344 = shalt.err (!%p4341_p5)
}
 0x190   : > { %3751 = dma.hbm_to_vmem [thread:$0]  (!%p4737_p6), %s5576_s12, 32, %s631_s23, [#allocation21], %s5634_s1, %s5634_s1, %s5630_s2  }
 0x191   : > { %s4345_s16 = scalar_lea.hbm %s5578_s14, 32 }
 0x192   : > { %p4346_p7 = scmp.ne.s32.totalorder %s5578_s14, %s4345_s16  ;;  %p4352_p1 = scmp.lt.u32.totalorder %s4345_s16, %s5578_s14 }
 0x194   : > { %p4348_p9 = pnand %p4346_p7, %p4751_p8 }
 0x196   : > { %p4349_p4 = pneg %p4348_p9 }
 0x198   : > { %p4354_p3 = pnand %p4352_p1, %p4349_p4 }
 0x19a   : > { %4357 = shalt.err (!%p4354_p3)
}
 0x19b   : > { %s4358_s18 = scalar_lea.vmem %s657_s21, 32  ;;  %p4366_p13 = scmp.lt.s32.totalorder %s657_s21, %s657_s21 }
 0x19c   : > { %p4359_p10 = scmp.ne.s32.totalorder %s657_s21, %s4358_s18  ;;  %p4367_p0 = scmp.lt.s32.totalorder %s4358_s18, %s4358_s18 }
 0x19e   : > { %p4361_p11 = pnand %p4359_p10, %p4751_p8  ;;  %p4368_p2 = por %p4367_p0, %p4366_p13 }
 0x1a0   : > { %p4362_p12 = pneg %p4361_p11 }
 0x1a2   : > { %p4369_p5 = pnand %p4368_p2, %p4362_p12 }
 0x1a4   : > { %4372 = shalt.err (!%p4369_p5)
}
 0x1a5   : > { %3757 = dma.hbm_to_vmem [thread:$0]  (!%p4737_p6), %s5578_s14, 32, %s657_s21, [#allocation24], %s5634_s1, %s5634_s1, %s5630_s2  }
 0x1a6   : > { %s4590_s28 = smov [#allocation28]   ;;  %s4591_s19 = smov [#allocation31]  }
 0x1a7   : > { %s681_s0 = sshll.u32 %s4590_s28, 4  ;;  %s705_s4 = sshll.u32 %s4591_s19, 4  ;;  %s682_s0 = int_to_ptr.vmem [resolvable:$true] %s681_s0  ;;  %s706_s4 = int_to_ptr.vmem [resolvable:$true] %s705_s4 }
 0x1a8   : > { %s5635_s22 = sld [smem:[#allocation57_spill]] }
 0x1ae   : > { %s4373_s16 = scalar_lea.hbm %s5635_s22, 16 }
 0x1af   : > { %p4374_p7 = scmp.ne.s32.totalorder %s5635_s22, %s4373_s16  ;;  %p4380_p1 = scmp.lt.u32.totalorder %s4373_s16, %s5635_s22 }
 0x1b1   : > { %p4376_p9 = pnand %p4374_p7, %p4751_p8 }
 0x1b3   : > { %p4377_p4 = pneg %p4376_p9 }
 0x1b5   : > { %p4382_p3 = pnand %p4380_p1, %p4377_p4 }
 0x1b7   : > { %4385 = shalt.err (!%p4382_p3)
}
 0x1b8   : > { %s4386_s2 = scalar_lea.vmem %s682_s0, 16  ;;  %s4393_s1 = scalar_lea.vmem %s682_s0, 32 }
 0x1b9   : > { %p4387_p10 = scmp.ne.s32.totalorder %s682_s0, %s4386_s2  ;;  %p4394_p13 = scmp.lt.s32.totalorder %s682_s0, %s682_s0 }
 0x1ba   : > { %p4395_p0 = scmp.lt.s32.totalorder %s4393_s1, %s4386_s2 }
 0x1bb   : > { %p4389_p11 = pnand %p4387_p10, %p4751_p8 }
 0x1bc   : > { %p4396_p2 = por %p4395_p0, %p4394_p13 }
 0x1bd   : > { %p4390_p12 = pneg %p4389_p11 }
 0x1bf   : > { %p4397_p5 = pnand %p4396_p2, %p4390_p12 }
 0x1c1   : > { %4400 = shalt.err (!%p4397_p5)
}
 0x1c2   : > { %3763 = dma.hbm_to_vmem [thread:$0]  (!%p4737_p6), %s5635_s22, 16, %s682_s0, [#allocation27]  }
 0x1c3   : > { %s5636_s28 = sld [smem:[#allocation58_spill]] }
 0x1c9   : > { %s4401_s19 = scalar_lea.hbm %s5636_s28, 16 }
 0x1ca   : > { %p4402_p7 = scmp.ne.s32.totalorder %s5636_s28, %s4401_s19  ;;  %p4408_p1 = scmp.lt.u32.totalorder %s4401_s19, %s5636_s28 }
 0x1cc   : > { %p4404_p9 = pnand %p4402_p7, %p4751_p8 }
 0x1ce   : > { %p4405_p4 = pneg %p4404_p9 }
 0x1d0   : > { %p4410_p3 = pnand %p4408_p1, %p4405_p4 }
 0x1d2   : > { %4413 = shalt.err (!%p4410_p3)
}
 0x1d3   : > { %s4414_s29 = scalar_lea.vmem %s706_s4, 16  ;;  %s4421_s0 = scalar_lea.vmem %s706_s4, 32 }
 0x1d4   : > { %p4415_p10 = scmp.ne.s32.totalorder %s706_s4, %s4414_s29  ;;  %p4422_p13 = scmp.lt.s32.totalorder %s706_s4, %s706_s4 }
 0x1d5   : > { %p4423_p0 = scmp.lt.s32.totalorder %s4421_s0, %s4414_s29 }
 0x1d6   : > { %p4417_p11 = pnand %p4415_p10, %p4751_p8 }
 0x1d7   : > { %p4424_p2 = por %p4423_p0, %p4422_p13 }
 0x1d8   : > { %p4418_p12 = pneg %p4417_p11 }
 0x1da   : > { %p4425_p5 = pnand %p4424_p2, %p4418_p12 }
 0x1dc   : > { %4428 = shalt.err (!%p4425_p5)
}
 0x1dd   : > { %s5637_s2 = sld [smem:[#allocation47_spill]]  ;;  %s5638_s1 = sld [smem:[#allocation46_spill]] }
 0x1de   : > { %s5639_s21 = sld [smem:[#allocation45_spill]]  ;;  %s5640_s24 = sld [smem:[#allocation44_spill]] }
 0x1df   : > { %s5641_s18 = sld [smem:[#allocation48_spill]] }
 0x1e0   : > { %3769 = dma.hbm_to_vmem [thread:$0]  (!%p4737_p6), %s5636_s28, 16, %s706_s4, [#allocation30]  }
 0x1e3   : > { %s3233_s23 = sadd.s32 4294967294, %s5637_s2   ;;  %s5141_s3 = sadd.s32 1, %s5637_s2  }
 0x1e4   : > { %s51_s25 = sadd.s32 1, %s5638_s1  ;;  %s48_s19 = ssub.s32 %s5637_s2, %s5141_s3 }
 0x1e5   : > { %p58_p8 = scmp.ne.s32.totalorder %s5638_s1, %s5639_s21  ;;  %p49_p7 = scmp.eq.s32.totalorder %s48_s19, 0 }
 0x1e6   : > { %p59_p9 = scmp.eq.s32.totalorder %s5637_s2, 0  ;;  %p64_p4 = scmp.ne.s32.totalorder %s5639_s21, %s5640_s24 }
 0x1e7   : > { %p466_p1 = scmp.eq.s32.totalorder %s5641_s18, 1  ;;  %p5642_p10 = scmp.eq.s32.totalorder %s5641_s18, 0 }
 0x1e8   : > { %s5153_s5 = scalar_select %p49_p7, %s5638_s1, %s51_s25  }
 0x1e9   : > { %p60_p3 = por %p59_p9, %p58_p8  ;;  %p5157_p11 = por %p5642_p10, %p64_p4 }
 0x1ea   : > { %p5161_p6 = por %p466_p1, %p58_p8  ;;  %p472_p12 = scmp.eq.s32.totalorder %s3233_s23, 1 }
 0x1eb   : > { %p3796_p13 = scmp.lt.s32.totalorder %s5637_s2, 2  ;;  %s716_s16 = sand.u32 1, %s5638_s1  }
 0x1ec   : > { %s5644_s4 = scalar_select %p5161_p6, 1, 0 }
 0x1ed   : > { %p5167_p0 = por %p472_p12, %p64_p4  ;;  %s3254_s29 = sshll.u32 %s716_s16, 3 }
 0x1ee   : > { %s3255_s0 = sshll.u32 %s5637_s2, 7  ;;  %s5646_s21 = sld [smem:[#allocation50_spill]] }
 0x1ef   : > { %s5645_s30 = scalar_select %p5167_p0, 1, 0 }
 0x1f0   : > { %s720_s25 = scalar_lea.vmem [#allocation2], %s3254_s29  ;;  %p5177_p2 = pnand %p3796_p13, %p60_p3 }
 0x1f1   : > { %s727_s19 = sshll.u32 %s720_s25, 4  ;;  %s717_s2 = scalar_lea.sflag [#allocation3], %s716_s16  ;;  %s5181_s19 = int_to_ptr.vmem [resolvable:$true] %s727_s19 }
 0x1f2   : > { %p4431_p8 = pneg %p5177_p2 }
 0x1f4   : > { %s5647_s24 = smov %s5646_s21  ;;  %s5175_s18 = scalar_lea.hbm %s5646_s21, %s3255_s0 }
 0x1f5   : > { %s4429_s1 = scalar_lea.hbm %s5175_s18, 128  ;;  %s4434_s27 = scalar_lea.hbm %s5647_s24, 256 }
 0x1f6   : > { %p4430_p5 = scmp.ne.s32.totalorder %s5175_s18, %s4429_s1  ;;  %p4435_p4 = scmp.lt.u32.totalorder %s5175_s18, %s5647_s24 }
 0x1f7   : > { %p4436_p1 = scmp.lt.u32.totalorder %s4434_s27, %s4429_s1  ;;  %p4438_p10 = scmp.lt.u32.totalorder %s4429_s1, %s5175_s18 }
 0x1f8   : > { %p4432_p7 = pnand %p4431_p8, %p4430_p5 }
 0x1f9   : > { %p4437_p3 = por %p4436_p1, %p4435_p4 }
 0x1fa   : > { %p4433_p9 = pneg %p4432_p7 }
 0x1fb   : > { %p4439_p12 = por %p4438_p10, %p4437_p3 }
 0x1fd   : > { %p4440_p13 = pnand %p4439_p12, %p4433_p9 }
 0x1ff   : > { %4443 = shalt.err (!%p4440_p13)
}
 0x200   : > { %s4444_s16 = scalar_lea.vmem %s5181_s19, 128  ;;  %s4592_s25 = smov [#allocation2]  }
 0x201   : > { %p4445_p5 = scmp.ne.s32.totalorder %s5181_s19, %s4444_s16  ;;  %s4449_s0 = sshll.u32 %s4592_s25, 4  ;;  %s4450_s0 = int_to_ptr.vmem [resolvable:$false] %s4449_s0 }
 0x202   : > { %s4451_s29 = scalar_lea.vmem %s4450_s0, 256  ;;  %p4452_p6 = scmp.lt.s32.totalorder %s5181_s19, %s4450_s0 }
 0x203   : > { %p4447_p7 = pnand %p4445_p5, %p4431_p8  ;;  %p4453_p4 = scmp.lt.s32.totalorder %s4451_s29, %s4444_s16 }
 0x205   : > { %p4448_p0 = pneg %p4447_p7  ;;  %p4454_p1 = por %p4453_p4, %p4452_p6 }
 0x207   : > { %p4455_p3 = pnand %p4454_p1, %p4448_p0 }
 0x209   : > { %4458 = shalt.err (!%p4455_p3)
}
 0x20a   : > { %3773 = dma.hbm_to_vmem [thread:$0]  (!%p5177_p2), %s5175_s18, 128, %s5181_s19, %s717_s2  }
 0x20b   : > { %s5649_s1 = sld [smem:[#allocation49_spill]] }
 0x211   : > { %p5650_p9 = scmp.ne.s32.totalorder %s5649_s1, 0 }
 0x212   : > { %s5651_s27 = sld [smem:[#allocation45_spill]] (!%p5650_p9) }
 0x213   : > { %736 = sbr.rel (%p5650_p9) target bundleno = 6764 (0x1a6c), region = 96 }
 0x218   : > { %s5211_s20 = sand.u32 (!%p5650_p9), 1, %s5651_s27  }
 0x219   : > { %s3257_s21 = sshll.u32 (!%p5650_p9), %s5211_s20, 3  ;;  %s739_s16 = scalar_lea.sflag (!%p5650_p9), [#allocation3], %s5211_s20 }
 0x21a   : > { %s742_s25 = scalar_lea.vmem [#allocation2], %s3257_s21 }
 0x21b   : > { %4504 = dma.done.wait (%p5157_p11), %s739_s16, 128  }
 0x21c   : > { %4506 = vsyncadd (%p5157_p11), %s739_s16, 4294967168  ;;  %s5652_s18 = sld [smem:[#allocation48_spill]] }
 0x222   : > { %p5653_p6 = scmp.eq.s32.totalorder %s5652_s18, 0 }
 0x224   : > { %4508 = dma.done.wait (%p5653_p6), [#allocation6], 144   ;;  %p5654_p0 = pmov %p5653_p6 }
 0x226   : > { %4510 = vsyncadd (%p5654_p0), [#allocation6], 4294967152  ;;  %p5655_p2 = pmov %p5654_p0 }
 0x227   : > { %p5656_p8 = pmov %p5654_p0 }
 0x228   : > { %4512 = dma.done.wait (%p5655_p2), [#allocation9], 12384  }
 0x229   : > { %4514 = vsyncadd (%p5656_p8), [#allocation9], 4294954912  ;;  %p5657_p10 = pmov %p5654_p0 }
 0x22a   : > { %p5658_p12 = pmov %p5654_p0 }
 0x22b   : > { %4516 = dma.done.wait (%p5657_p10), [#allocation12], 4128  }
 0x22c   : > { %4518 = vsyncadd (%p5658_p12), [#allocation12], 4294963168  ;;  %p5659_p11 = pmov %p5654_p0 }
 0x22d   : > { %p5660_p13 = pmov %p5654_p0 }
 0x22e   : > { %4520 = dma.done.wait (%p5659_p11), [#allocation15], 64  }
 0x22f   : > { %4522 = vsyncadd (%p5660_p13), [#allocation15], 4294967232  ;;  %p5661_p5 = pmov %p5654_p0 }
 0x230   : > { %p5662_p7 = pmov %p5654_p0 }
 0x231   : > { %4524 = dma.done.wait (%p5661_p5), [#allocation18], 8256  }
 0x232   : > { %4526 = vsyncadd (%p5662_p7), [#allocation18], 4294959040  ;;  %p5663_p4 = pmov %p5654_p0 }
 0x233   : > { %p5664_p1 = pmov %p5654_p0 }
 0x234   : > { %4528 = dma.done.wait (%p5663_p4), [#allocation21], 8224  }
 0x235   : > { %4530 = vsyncadd (%p5664_p1), [#allocation21], 4294959072  ;;  %p5665_p3 = pmov %p5654_p0 }
 0x236   : > { %p5666_p9 = pmov %p5654_p0 }
 0x237   : > { %4532 = dma.done.wait (%p5665_p3), [#allocation24], 64  }
 0x238   : > { %4534 = vsyncadd (%p5666_p9), [#allocation24], 4294967232  ;;  %p5667_p6 = pmov %p5654_p0 }
 0x23a   : > { %4536 = dma.done.wait (%p5667_p6), [#allocation27], 32  }
 0x23b   : > { %4538 = vsyncadd (%p5654_p0), [#allocation27], 4294967264  ;;  %p5668_p2 = pmov %p5654_p0 }
 0x23c   : > { %p5669_p8 = pmov %p5654_p0 }
 0x23d   : > { %4540 = dma.done.wait (%p5668_p2), [#allocation30], 2064  }
 0x23e   : > { %4542 = vsyncadd (%p5669_p8), [#allocation30], 4294965232  ;;  %v4593_v0 = vmov 0.0   ;;  %vm4594_vm0 = vmmov 0   ;;  %v871_v1 = vld [vmem:[#allocation5] sm:$0xff]  ;;  %vm885_vm1 = vcmask 1043456  }
 0x23f   : > { %3437 = vmatprep.subr.bf16.mxu0 %v4593_v0  ;;  %3439 = vmatprep.mubr.msk.bf16.mxu0 %vm4594_vm0, %v4593_v0  ;;  %v870_v2 = vld [vmem:[%s742_s25] sm:$0x3f]  ;;  %v874_v4 = vpack.c.bf16 %v871_v1, %v871_v1  ;;  %v932_v7 = vld [vmem:[#allocation8 + $0x18] sm:$0xff]  ;;  %vm881_vm2 = vcmask 64512   ;;  %vm1168_vm3 = vcmask 1042432   ;;  %vm1102_vm4 = vcmask 261120  }
 0x240   : > { %v930_v3 = vld [vmem:[#allocation8 + $0x8] sm:$0xff]  ;;  %v933_v5 = vld [vmem:[#allocation8 + $0x20] sm:$0xff]  ;;  %v931_v10 = vld [vmem:[#allocation8 + $0x10] sm:$0xff]  ;;  %v873_v14 = vpack.c.bf16 %v870_v2, %v870_v2  ;;  %s4596_s6 = smov 64   ;;  %s4597_s19 = smov 96   ;;  %vm1150_vm5 = vcmask 46080  }
 0x241   : > { %v929_v6 = vld [vmem:[#allocation8] sm:$0xff]  ;;  %v980_v8 = vpack.c.bf16 %v933_v5, %v930_v3  ;;  %v934_v11 = vld [vmem:[#allocation8 + $0x28] sm:$0xff]  ;;  %v936_v12 = vld [vmem:[#allocation8 + $0x38] sm:$0xff]  ;;  %v887_v13 = vsel %vm885_vm1, %v874_v4, 0  ;;  %s4598_s23 = smov 32   ;;  %vm1164_vm6 = vcmask 48128  }
 0x242   : > { %v979_v9 = vpack.c.bf16 %v932_v7, %v929_v6  ;;  %v939_v15 = vld [vmem:[#allocation8 + $0x50] sm:$0xff]  ;;  %v938_v17 = vld [vmem:[#allocation8 + $0x48] sm:$0xff]  ;;  %3438 = vmatpush3.bf16.msra.mxu0 %v887_v13  ;;  %v981_v18 = vpack.c.bf16 %v934_v11, %v931_v10  ;;  %v937_v22 = vld [vmem:[#allocation8 + $0x40] sm:$0xff]  ;;  %vm1561_vm7 = vcmask 523264   ;;  %vm1563_vm8 = vcmask 785408   ;;  %s3311_s2 = sshll.u32 %s5652_s18, 7 }
 0x243   : > { %v935_v16 = vld [vmem:[#allocation8 + $0x30] sm:$0xff]  ;;  %1019 = vmatprep.subr.bf16.mxu1 %v980_v8  ;;  %v983_v19 = vpack.c.bf16 %v939_v15, %v936_v12  ;;  %v942_v20 = vld [vmem:[#allocation8 + $0x68] sm:$0xff]  ;;  %3443 = vmatprep.subr.bf16.mxu0 %v4593_v0  ;;  %v940_v23 = vld [vmem:[#allocation8 + $0x58] sm:$0xff]  ;;  %v4595_v15 = vmov 0   ;;  %vm1640_vm9 = vcmask 1045504   ;;  %s868_s0 = scalar_lea.vmem [#allocation32], %s3257_s21 }
 0x244   : > { %1020 = vmatpush1.bf16.msra.mxu1 %v979_v9  ;;  %v982_v21 = vpack.c.bf16 %v938_v17, %v935_v16  ;;  %v945_v24 = vld [vmem:[#allocation8 + $0x80] sm:$0xff]  ;;  %v944_v27 = vld [vmem:[#allocation8 + $0x78] sm:$0xff]  ;;  %v951_v29 = vld [vmem:[#allocation8 + $0xb0] sm:$0xff]  ;;  %v984_v30 = vpack.c.bf16 %v940_v23, %v937_v22  ;;  %1051 = vmatprep.mubr.bf16.mxu1 %v4595_v15  ;;  %v1004_v23 = vlaneseq  ;;  %s2992_s29 = sshll.u32 %s868_s0, 4  ;;  %vm2976_vm10 = vcmask 62464   ;;  %s5670_s16 = sld [smem:[#allocation59_spill]]  ;;  %s5522_s29 = int_to_ptr.vmem [resolvable:$true] %s2992_s29 }
 0x245   : > { %1021 = vmatprep.subr.bf16.mxu1 %v983_v19  ;;  %v986_v25 = vpack.c.bf16 %v945_v24, %v942_v20  ;;  %v941_v26 = vld [vmem:[#allocation8 + $0x60] sm:$0xff]  ;;  %3440 = vmatmul.mubr.msk.bf16.vlgmr.msra.gmra.mrb[0].mxu0 %vm881_vm2, %v873_v14  ;;  %v948_v28 = vld [vmem:[#allocation8 + $0x98] sm:$0xff]  ;;  %v943_v32 = vld [vmem:[#allocation8 + $0x70] sm:$0xff]  ;;  %s2979_s18 = scalar_lea.sflag [#allocation4], %s5211_s20  ;;  %s4459_s21 = scalar_lea.vmem %s5522_s29, 128 }
 0x246   : > { %3444 = vmatpush3.bf16.msra.mxu0 %v981_v18  ;;  %3459 = vmatprep.mubr.msk.bf16.mxu0 %vm4594_vm0, %v4593_v0  ;;  %v985_v31 = vpack.c.bf16 %v944_v27, %v941_v26  ;;  %v946_v33 = vld [vmem:[#allocation8 + $0x88] sm:$0xff]  ;;  %v989_v34 = vpack.c.bf16 %v951_v29, %v948_v28  ;;  %v947_v35 = vld [vmem:[#allocation8 + $0x90] sm:$0xff]  ;;  %v957_v38 = vld [vmem:[#allocation8 + $0xe0] sm:$0xff]  ;;  %v5281_v24 = vshrl.u32 %v1004_v23, 7  ;;  %p4460_p10 = scmp.ne.s32.totalorder %s5522_s29, %s4459_s21  ;;  %p5671_p12 = scmp.ne.s32.totalorder %s5644_s4, 0 }
 0x247   : > { %3445 = vmatprep.subr.bf16.mxu0 %v4593_v0  ;;  %v950_v36 = vld [vmem:[#allocation8 + $0xa8] sm:$0xff]  ;;  %v987_v39 = vpack.c.bf16 %v946_v33, %v943_v32  ;;  %v949_v41 = vld [vmem:[#allocation8 + $0xa0] sm:$0xff]  ;;  %v952_v42 = vld [vmem:[#allocation8 + $0xb8] sm:$0xff] }
 0x248   : > { %1022 = vmatpush1.bf16.msra.mxu1 %v982_v21  ;;  %v954_v37 = vld [vmem:[#allocation8 + $0xc8] sm:$0xff]  ;;  %v988_v40 = vpack.c.bf16 %v950_v36, %v947_v35  ;;  %v953_v44 = vld [vmem:[#allocation8 + $0xc0] sm:$0xff]  ;;  %v956_v45 = vld [vmem:[#allocation8 + $0xd8] sm:$0xff]  ;;  %v990_v48 = vpack.c.bf16 %v952_v42, %v949_v41  ;;  %v5285_v27 = vsub.s32 1, %v5281_v24  ;;  %v5288_v28 = vsub.s32 0, %v5281_v24  ;;  %p4461_p11 = pnand %p4460_p10, %p5671_p12 }
 0x249   : > { %1023 = vmatprep.subr.bf16.mxu1 %v986_v25  ;;  %v992_v43 = vpack.c.bf16 %v957_v38, %v954_v37  ;;  %v960_v46 = vld [vmem:[#allocation8 + $0xf8] sm:$0xff]  ;;  %v963_v47 = vld [vmem:[#allocation8 + $0x110] sm:$0xff]  ;;  %v991_v49 = vpack.c.bf16 %v956_v45, %v953_v44  ;;  %v958_v51 = vld [vmem:[#allocation8 + $0xe8] sm:$0xff]  ;;  %v1014_v25 = vsub.s32 2, %v5281_v24 }
 0x24a   : > { %3446 = vmatpush3.bf16.msra.mxu0 %v984_v30  ;;  %v955_v50 = vld [vmem:[#allocation8 + $0xd0] sm:$0xff]  ;;  %v995_v52 = vpack.c.bf16 %v963_v47, %v960_v46  ;;  %v962_v54 = vld [vmem:[#allocation8 + $0x108] sm:$0xff]  ;;  %v969_v56 = vld [vmem:[#allocation8 + $0x140] sm:$0xff]  ;;  %s5520_s25 = scalar_lea.hbm %s5670_s16, %s3311_s2  ;;  %p4462_p13 = pneg %p4461_p11 }
 0x24b   : > { %3447 = vmatprep.subr.bf16.mxu0 %v4593_v0  ;;  %v959_v53 = vld [vmem:[#allocation8 + $0xf0] sm:$0xff]  ;;  %v966_v55 = vld [vmem:[#allocation8 + $0x128] sm:$0xff]  ;;  %v993_v57 = vpack.c.bf16 %v958_v51, %v955_v50  ;;  %v961_v59 = vld [vmem:[#allocation8 + $0x100] sm:$0xff] }
 0x24c   : > { %1024 = vmatpush1.bf16.msra.mxu1 %v985_v31  ;;  %v994_v58 = vpack.c.bf16 %v962_v54, %v959_v53  ;;  %v964_v60 = vld [vmem:[#allocation8 + $0x118] sm:$0xff]  ;;  %v998_v61 = vpack.c.bf16 %v969_v56, %v966_v55  ;;  %v965_v62 = vld [vmem:[#allocation8 + $0x120] sm:$0xff]  ;;  %v967_v3 = vld [vmem:[#allocation8 + $0x130] sm:$0xff] }
 0x24d   : > { %1025 = vmatprep.subr.bf16.mxu1 %v989_v34  ;;  %v968_v63 = vld [vmem:[#allocation8 + $0x138] sm:$0xff]  ;;  %v996_v1 = vpack.c.bf16 %v964_v60, %v961_v59  ;;  %v970_v4 = vld [vmem:[#allocation8 + $0x148] sm:$0xff]  ;;  %v975_v7 = vld [vmem:[#allocation8 + $0x170] sm:$0xff] }
 0x24e   : > { %3448 = vmatpush3.bf16.msra.mxu0 %v987_v39  ;;  %v997_v2 = vpack.c.bf16 %v968_v63, %v965_v62  ;;  %v999_v5 = vpack.c.bf16 %v970_v4, %v967_v3  ;;  %v972_v6 = vld [vmem:[#allocation8 + $0x158] sm:$0xff]  ;;  %v971_v9 = vld [vmem:[#allocation8 + $0x150] sm:$0xff]  ;;  %v974_v10 = vld [vmem:[#allocation8 + $0x168] sm:$0xff] }
 0x24f   : > { %3449 = vmatprep.subr.bf16.mxu0 %v4593_v0  ;;  %v1001_v8 = vpack.c.bf16 %v975_v7, %v972_v6  ;;  %v973_v11 = vld [vmem:[#allocation8 + $0x160] sm:$0xff]  ;;  %v1000_v12 = vpack.c.bf16 %v974_v10, %v971_v9  ;;  %v976_v13 = vld [vmem:[#allocation8 + $0x178] sm:$0xff] }
 0x250   : > { %1026 = vmatpush1.bf16.msra.mxu1 %v988_v40  ;;  %v1002_v14 = vpack.c.bf16 %v976_v13, %v973_v11  ;;  %v3277_v16 = vld [vmem:[#allocation7] ss:$0 sm:$0xff]  ;;  %v977_v26 = vld [vmem:[#allocation10] sm:$0x7] }
 0x251   : > { %1027 = vmatprep.subr.bf16.mxu1 %v992_v43  ;;  %v1015_v29 = vrot.slane %v977_v26, %v1014_v25  ;;  %v1011_v30 = vrot.slane %v977_v26, %v5285_v27  ;;  %v1007_v31 = vrot.slane %v977_v26, %v5288_v28 }
 0x252   : > { %3450 = vmatpush3.bf16.msra.mxu0 %v990_v48 }
 0x253   : > { %3451 = vmatprep.subr.bf16.mxu0 %v4593_v0 }
 0x254   : > { %1028 = vmatpush1.bf16.msra.mxu1 %v991_v49 }
 0x255   : > { %1029 = vmatprep.subr.bf16.mxu1 %v995_v52 }
 0x256   : > { %3452 = vmatpush3.bf16.msra.mxu0 %v993_v57 }
 0x257   : > { %3453 = vmatprep.subr.bf16.mxu0 %v4593_v0 }
 0x258   : > { %1030 = vmatpush1.bf16.msra.mxu1 %v994_v58 }
 0x259   : > { %1031 = vmatprep.subr.bf16.mxu1 %v998_v61 }
 0x25a   : > { %3454 = vmatpush3.bf16.msra.mxu0 %v996_v1 }
 0x25b   : > { %3455 = vmatprep.subr.bf16.mxu0 %v4593_v0 }
 0x25c   : > { %1032 = vmatpush1.bf16.msra.mxu1 %v997_v2 }
 0x25d   : > { %1033 = vmatprep.subr.bf16.mxu1 %v1001_v8 }
 0x25e   : > { %3456 = vmatpush3.bf16.msra.mxu0 %v999_v5 }
 0x25f   : > { %3457 = vmatprep.subr.bf16.mxu0 %v4593_v0 }
 0x260   : > { %1034 = vmatpush1.bf16.msra.mxu1 %v1000_v12 }
 0x261   : > { %3463 = vmatprep.subr.bf16.mxu1 %v4593_v0 }
 0x262   : > { %3458 = vmatpush3.bf16.msra.mxu0 %v1002_v14 }
 0x263   : > { %3469 = vmatprep.subr.bf16.mxu0 %v4593_v0 }
 0x318   : > { %v923_v17 = vpop.f32.mrb[0].mxu0 }
 0x319   : > { %v5273_v18 = vadd.f32 %v3277_v16, %v923_v17  ;;  %v3441_v19 = vpop.f32.mrb[1].mxu0 }
 0x31a   : > { %v926_v20 = vpop.f32.mrb[2].mxu0 }
 0x31b   : > { %v978_v21 = vpack.c.bf16 %v5273_v18, %v5273_v18  ;;  %v3442_v22 = vpop.f32.mrb[3].mxu0 }
 0x31d   : > { %1052 = vmatmul.mubr.bf16.vlgmr.msra.gmra.mrb[0].mxu1 %v978_v21  ;;  %3460 = vmatmul.mubr.bf16.vlgmr.msra.gmra.mrb[4].mxu0 %v978_v21 }
 0x31e   : > { %3465 = vmatprep.mubr.msk.bf16.mxu1 %vm4594_vm0, %v4593_v0  ;;  %3471 = vmatprep.mubr.msk.bf16.mxu0 %vm4594_vm0, %v4593_v0 }
 0x3f0   : > { %v1053_v32 = vpop.f32.mrb[0].mxu1  ;;  %v1094_v33 = vpop.f32.mrb[4].mxu0 }
 0x3f1   : > { %v1095_v34 = vadd.f32 %v1094_v33, %v1015_v29  ;;  %v1055_v35 = vpop.f32.mrb[1].mxu1  ;;  %v3461_v36 = vpop.f32.mrb[5].mxu0  ;;  %v1054_v43 = vadd.f32 %v1053_v32, %v1007_v31 }
 0x3f2   : > { %v1056_v37 = vadd.f32 %v1055_v35, %v1011_v30  ;;  %v1057_v38 = vpop.f32.mrb[2].mxu1  ;;  %v1097_v39 = vpop.f32.mrb[6].mxu0 }
 0x3f3   : > { %v5294_v40 = vpack.c.bf16 %v1095_v34, %v1095_v34  ;;  %v1058_v41 = vpop.f32.mrb[3].mxu1  ;;  %v3462_v42 = vpop.f32.mrb[7].mxu0  ;;  %v1100_v47 = vpack.c.bf16 %v1054_v43, %v1054_v43 }
 0x3f4   : > { %v1101_v44 = vpack.c.bf16 %v1056_v37, %v1056_v37 }
 0x3f5   : > { %v1170_v45 = vsel %vm1168_vm3, %v5294_v40, 0 }
 0x3f6   : > { %1328 = vrot.lane.b32.xlu1 %v1101_v44, %s4596_s6  ;;  %1216 = vrot.lane.b32.xlu0 %v1101_v44, %s4597_s19  ;;  %v1107_v46 = vsel %vm1102_vm4, %v1101_v44, 0 }
 0x3f7   : > { %3470 = vmatpush3.bf16.msra.mxu0 %v1170_v45  ;;  %3464 = vmatpush3.bf16.xpose.msra.mxu1 %v1107_v46 }
 0x3f8   : > { %3475 = vmatprep.subr.bf16.mxu1 %v4593_v0  ;;  %3481 = vmatprep.subr.bf16.mxu0 %v4593_v0 }
 0x3fa   : > { %1326 = vrot.lane.b32.xlu1 %v1100_v47, %s4596_s6  ;;  %1213 = vrot.lane.b32.xlu0 %v1100_v47, %s4597_s19 }
 0x3fe   : > { %1437 = vrot.lane.b32.xlu1 %v1100_v47, %s4598_s23  ;;  %1439 = vrot.lane.b32.xlu0 %v1101_v44, %s4598_s23 }
 0x3ff   : > { %3466 = vmatmul.mubr.msk.bf16.vlgmr.msra.gmra.mrb[4].mxu1 %vm1102_vm4, %v1100_v47 }
 0x400   : > { %3477 = vmatprep.mubr.msk.bf16.mxu1 %vm4594_vm0, %v4593_v0 }
 0x468   : > { %v1217_v48 = vpop.permute.xlu0 %1216  ;;  %v1329_v50 = vpop.permute.xlu1 %1328 }
 0x469   : > { %v1222_v49 = vsel %vm1102_vm4, %v1217_v48, 0  ;;  %v1334_v52 = vsel %vm1102_vm4, %v1329_v50, 0 }
 0x46a   : > { %3476 = vmatpush3.bf16.xpose.msra.mxu1 %v1222_v49 }
 0x46b   : > { %3487 = vmatprep.subr.bf16.mxu1 %v4593_v0 }
 0x46c   : > { %v1214_v51 = vpop.permute.xlu0 %1213  ;;  %v1327_v54 = vpop.permute.xlu1 %1326 }
 0x470   : > { %v1440_v53 = vpop.permute.xlu0 %1439  ;;  %v1438_v56 = vpop.permute.xlu1 %1437 }
 0x471   : > { %3478 = vmatmul.mubr.msk.bf16.vlgmr.msra.gmra.mrb[8].mxu1 %vm1102_vm4, %v1214_v51  ;;  %v1445_v55 = vsel %vm1102_vm4, %v1440_v53, 0 }
 0x472   : > { %3488 = vmatpush3.bf16.xpose.msra.mxu1 %v1334_v52  ;;  %3489 = vmatprep.mubr.msk.bf16.mxu1 %vm4594_vm0, %v4593_v0 }
 0x473   : > { %3499 = vmatprep.subr.bf16.mxu1 %v4593_v0 }
 0x479   : > { %3490 = vmatmul.mubr.msk.bf16.vlgmr.msra.gmra.mrb[12].mxu1 %vm1102_vm4, %v1327_v54 }
 0x47a   : > { %3500 = vmatpush3.bf16.xpose.msra.mxu1 %v1445_v55  ;;  %3501 = vmatprep.mubr.msk.bf16.mxu1 %vm4594_vm0, %v4593_v0 }
 0x47b   : > { %3511 = vmatprep.subr.bf16.mxu1 %v4593_v0 }
 0x481   : > { %3502 = vmatmul.mubr.msk.bf16.vlgmr.msra.gmra.mrb[16].mxu1 %vm1102_vm4, %v1438_v56 }
 0x482   : > { %3527 = vmatprep.mubr.msk.bf16.mxu1 %vm4594_vm0, %v4593_v0 }
 0x4d2   : > { %v1143_v57 = vpop.f32.mrb[4].mxu1 }
 0x4d3   : > { %v1149_v58 = vmul.f32 0.17677669, %v1143_v57  ;;  %v3467_v59 = vpop.f32.mrb[5].mxu1 }
 0x4d4   : > { %v1146_v60 = vpop.f32.mrb[6].mxu1 }
 0x4d5   : > { %v3468_v61 = vpop.f32.mrb[7].mxu1  ;;  %v1151_v62 = vsel %vm1150_vm5, %v1149_v58, -inf }
 0x4d6   : > { %1152 = vmax.xlane.f32.xlu0 %v1151_v62 }
 0x544   : > { %v1258_v63 = vpop.f32.mrb[8].mxu1 }
 0x545   : > { %v1264_v1 = vmul.f32 0.17677669, %v1258_v63  ;;  %v3479_v2 = vpop.f32.mrb[9].mxu1 }
 0x546   : > { %v1261_v3 = vpop.f32.mrb[10].mxu1 }
 0x547   : > { %v3480_v4 = vpop.f32.mrb[11].mxu1  ;;  %v1265_v5 = vsel %vm1150_vm5, %v1264_v1, -inf }
 0x548   : > { %1266 = vmax.xlane.f32.xlu1 %v1265_v5 }
 0x54c   : > { %v1370_v6 = vpop.f32.mrb[12].mxu1 }
 0x54d   : > { %v1376_v7 = vmul.f32 0.17677669, %v1370_v6  ;;  %v3491_v8 = vpop.f32.mrb[13].mxu1 }
 0x54e   : > { %v1373_v9 = vpop.f32.mrb[14].mxu1  ;;  %v1566_v8 = vld [vmem:[#allocation11 + $0x8] sm:$0xff] }
 0x54f   : > { %v3492_v10 = vpop.f32.mrb[15].mxu1  ;;  %v1377_v11 = vsel %vm1150_vm5, %v1376_v7, -inf  ;;  %v1567_v9 = vld [vmem:[#allocation11 + $0x10] sm:$0xff] }
 0x550   : > { %1378 = vmax.xlane.f32.xlu0 %v1377_v11  ;;  %v1568_v11 = vld [vmem:[#allocation11 + $0x18] sm:$0xff] }
 0x554   : > { %v1481_v12 = vpop.f32.mrb[16].mxu1 }
 0x555   : > { %v1487_v13 = vmul.f32 0.17677669, %v1481_v12  ;;  %v3503_v14 = vpop.f32.mrb[17].mxu1  ;;  %v1584_v12 = vpack.c.bf16 %v1568_v11, %v1567_v9  ;;  %v1675_v11 = vld [vmem:[#allocation17 + $0x30] sm:$0xff] }
 0x556   : > { %v1484_v16 = vpop.f32.mrb[18].mxu1  ;;  %v1570_v14 = vld [vmem:[#allocation11 + $0x28] sm:$0xff] }
 0x557   : > { %v3504_v17 = vpop.f32.mrb[19].mxu1  ;;  %v1488_v19 = vsel %vm1150_vm5, %v1487_v13, -inf }
 0x558   : > { %1489 = vmax.xlane.f32.xlu0 %v1488_v19  ;;  %v1571_v17 = vld [vmem:[#allocation11 + $0x30] sm:$0xff]  ;;  %v1572_v19 = vld [vmem:[#allocation11 + $0x38] sm:$0xff] }
 0x563   : > { %v1153_v20 = vpop.xlane.xlu0 %1152 }
 0x564   : > { %v1154_v21 = vsub.f32 %v1149_v58, %v1153_v20  ;;  %v1573_v20 = vld [vmem:[#allocation11 + $0x40] sm:$0xff] }
 0x566   : > { %v1155_v22 = vmul.f32 1.442695, %v1154_v21  ;;  %v1586_v21 = vpack.c.bf16 %v1572_v19, %v1571_v17 }
 0x568   : > { %3883 = vpow2.f32 %v1155_v22  ;;  %v1574_v22 = vld [vmem:[#allocation11 + $0x48] sm:$0xff] }
 0x572   : > { %v3884_v23 = vpop.eup %3883 }
 0x573   : > { %v1157_v26 = vsel %vm1150_vm5, %v3884_v23, 0.0 }
 0x574   : > { %1158 = vadd.xlane.f32.xlu1 %v1157_v26  ;;  %v1575_v26 = vld [vmem:[#allocation11 + $0x50] sm:$0xff] }
 0x585   : > { %1278 = vrot.lane.b32.xlu1 %v5294_v40, %s4597_s19 }
 0x5d5   : > { %v1267_v29 = vpop.xlane.xlu1 %1266 }
 0x5d6   : > { %v1268_v30 = vsub.f32 %v1264_v1, %v1267_v29  ;;  %v1576_v29 = vld [vmem:[#allocation11 + $0x58] sm:$0xff] }
 0x5d8   : > { %v1269_v31 = vmul.f32 1.442695, %v1268_v30  ;;  %v1588_v30 = vpack.c.bf16 %v1576_v29, %v1575_v26  ;;  %v1682_v29 = vld [vmem:[#allocation17 + $0x68] sm:$0xff] }
 0x5da   : > { %3885 = vpow2.f32 %v1269_v31  ;;  %v1577_v31 = vld [vmem:[#allocation11 + $0x60] sm:$0xff] }
 0x5dd   : > { %v1379_v32 = vpop.xlane.xlu0 %1378 }
 0x5de   : > { %v1380_v33 = vsub.f32 %v1376_v7, %v1379_v32  ;;  %v1565_v7 = vld [vmem:[#allocation11] sm:$0xff]  ;;  %v1578_v32 = vld [vmem:[#allocation11 + $0x68] sm:$0xff] }
 0x5df   : > { %v1583_v10 = vpack.c.bf16 %v1566_v8, %v1565_v7  ;;  %v1676_v7 = vld [vmem:[#allocation17 + $0x38] sm:$0xff] }
 0x5e0   : > { %v1381_v34 = vmul.f32 1.442695, %v1380_v33  ;;  %v1589_v33 = vpack.c.bf16 %v1578_v32, %v1577_v31  ;;  %v1681_v32 = vld [vmem:[#allocation17 + $0x60] sm:$0xff] }
 0x5e1   : > { %3512 = vmatpush3.bf16.msra.mxu1 %v1583_v10  ;;  %v1673_v10 = vld [vmem:[#allocation17 + $0x20] sm:$0xff] }
 0x5e2   : > { %3887 = vpow2.f32 %v1381_v34  ;;  %3513 = vmatprep.subr.bf16.mxu1 %v4593_v0 }
 0x5e4   : > { %v3886_v35 = vpop.eup %3885 }
 0x5e5   : > { %v1490_v36 = vpop.xlane.xlu0 %1489  ;;  %v1271_v37 = vsel %vm1150_vm5, %v3886_v35, 0.0  ;;  %3514 = vmatpush3.bf16.msra.mxu1 %v1584_v12  ;;  %v1678_v12 = vld [vmem:[#allocation17 + $0x48] sm:$0xff] }
 0x5e6   : > { %v1491_v38 = vsub.f32 %v1487_v13, %v1490_v36  ;;  %1272 = vadd.xlane.f32.xlu0 %v1271_v37  ;;  %v1569_v13 = vld [vmem:[#allocation11 + $0x20] sm:$0xff]  ;;  %3515 = vmatprep.subr.bf16.mxu1 %v4593_v0 }
 0x5e7   : > { %v1585_v16 = vpack.c.bf16 %v1570_v14, %v1569_v13  ;;  %v1680_v13 = vld [vmem:[#allocation17 + $0x58] sm:$0xff]  ;;  %v1705_v14 = vpack.c.bf16 %v1675_v11, %v1673_v10  ;;  %v1777_v11 = vld [vmem:[#allocation20 + $0x20] sm:$0xff] }
 0x5e8   : > { %v1492_v39 = vmul.f32 1.442695, %v1491_v38  ;;  %v1579_v38 = vld [vmem:[#allocation11 + $0x70] sm:$0xff] }
 0x5e9   : > { %3516 = vmatpush3.bf16.msra.mxu1 %v1585_v16 }
 0x5ea   : > { %3889 = vpow2.f32 %v1492_v39  ;;  %3517 = vmatprep.subr.bf16.mxu1 %v4593_v0  ;;  %v1580_v39 = vld [vmem:[#allocation11 + $0x78] sm:$0xff] }
 0x5ec   : > { %v3888_v41 = vpop.eup %3887 }
 0x5ed   : > { %v1383_v42 = vsel %vm1150_vm5, %v3888_v41, 0.0  ;;  %3518 = vmatpush3.bf16.msra.mxu1 %v1586_v21 }
 0x5ee   : > { %1384 = vadd.xlane.f32.xlu1 %v1383_v42  ;;  %3519 = vmatprep.subr.bf16.mxu1 %v4593_v0 }
 0x5f4   : > { %v3890_v43 = vpop.eup %3889 }
 0x5f5   : > { %v1494_v44 = vsel %vm1150_vm5, %v3890_v43, 0.0 }
 0x5f6   : > { %1495 = vadd.xlane.f32.xlu0 %v1494_v44 }
 0x5ff   : > { %1500 = vrot.lane.b32.xlu1 %v5294_v40, %s4598_s23 }
 0x601   : > { %v1159_v45 = vpop.xlane.xlu1 %1158 }
 0x602   : > { %3891 = vrcp.f32 %v1159_v45 }
 0x605   : > { %v1279_v48 = vpop.permute.xlu1 %1278 }
 0x606   : > { %v1284_v50 = vsel %vm1168_vm3, %v1279_v48, 0 }
 0x60c   : > { %v3892_v46 = vpop.eup %3891  ;;  %1389 = vrot.lane.b32.xlu0 %v5294_v40, %s4596_s6 }
 0x60d   : > { %v1161_v47 = vmul.f32 %v3892_v46, %v3884_v23  ;;  %v1587_v23 = vpack.c.bf16 %v1574_v22, %v1573_v20  ;;  %v1677_v22 = vld [vmem:[#allocation17 + $0x40] sm:$0xff] }
 0x60f   : > { %v1162_v49 = vpack.c.bf16 %v1161_v47, %v1161_v47  ;;  %3520 = vmatpush3.bf16.msra.mxu1 %v1587_v23  ;;  %v1679_v23 = vld [vmem:[#allocation17 + $0x50] sm:$0xff] }
 0x610   : > { %3521 = vmatprep.subr.bf16.mxu1 %v4593_v0  ;;  %v1707_v26 = vpack.c.bf16 %v1679_v23, %v1677_v22  ;;  %v1798_v22 = vld [vmem:[#allocation20 + $0xc8] sm:$0xff] }
 0x611   : > { %3472 = vmatmul.mubr.msk.bf16.vlgmr.msra.gmra.mrb[8].mxu0 %vm1164_vm6, %v1162_v49 }
 0x612   : > { %3482 = vmatpush3.bf16.msra.mxu0 %v1284_v50  ;;  %3483 = vmatprep.mubr.msk.bf16.mxu0 %vm4594_vm0, %v4593_v0 }
 0x613   : > { %3493 = vmatprep.subr.bf16.mxu0 %v4593_v0  ;;  %3522 = vmatpush3.bf16.msra.mxu1 %v1588_v30  ;;  %v1684_v30 = vld [vmem:[#allocation17 + $0x78] sm:$0xff] }
 0x614   : > { %3523 = vmatprep.subr.bf16.mxu1 %v4593_v0  ;;  %v1710_v31 = vpack.c.bf16 %v1684_v30, %v1682_v29  ;;  %v1781_v29 = vld [vmem:[#allocation20 + $0x40] sm:$0xff]  ;;  %v1782_v30 = vld [vmem:[#allocation20 + $0x48] sm:$0xff] }
 0x617   : > { %3524 = vmatpush3.bf16.msra.mxu1 %v1589_v33  ;;  %v1683_v33 = vld [vmem:[#allocation17 + $0x70] sm:$0xff] }
 0x618   : > { %3525 = vmatprep.subr.bf16.mxu1 %v4593_v0 }
 0x673   : > { %v1273_v51 = vpop.xlane.xlu0 %1272 }
 0x674   : > { %3893 = vrcp.f32 %v1273_v51 }
 0x67b   : > { %v1385_v52 = vpop.xlane.xlu1 %1384 }
 0x67c   : > { %3895 = vrcp.f32 %v1385_v52 }
 0x67e   : > { %v3894_v53 = vpop.eup %3893 }
 0x67f   : > { %v1275_v40 = vmul.f32 %v3894_v53, %v3886_v35  ;;  %v1501_v60 = vpop.permute.xlu1 %1500 }
 0x680   : > { %v1506_v62 = vsel %vm1168_vm3, %v1501_v60, 0 }
 0x681   : > { %v1276_v54 = vpack.c.bf16 %v1275_v40, %v1275_v40 }
 0x683   : > { %v1496_v55 = vpop.xlane.xlu0 %1495  ;;  %3484 = vmatmul.mubr.msk.bf16.vlgmr.msra.gmra.mrb[12].mxu0 %vm1164_vm6, %v1276_v54 }
 0x684   : > { %3897 = vrcp.f32 %v1496_v55  ;;  %3495 = vmatprep.mubr.msk.bf16.mxu0 %vm4594_vm0, %v4593_v0 }
 0x686   : > { %v3896_v56 = vpop.eup %3895 }
 0x687   : > { %v1387_v57 = vmul.f32 %v3896_v56, %v3888_v41  ;;  %v1390_v58 = vpop.permute.xlu0 %1389  ;;  %v1590_v41 = vpack.c.bf16 %v1580_v39, %v1579_v38  ;;  %v3287_v56 = vld [vmem:[#allocation13] ss:$0 sm:$0xff]  ;;  %v1685_v38 = vld [vmem:[#allocation17 + $0x80] sm:$0xff]  ;;  %v1687_v39 = vld [vmem:[#allocation17 + $0x90] sm:$0xff] }
 0x688   : > { %v1395_v59 = vsel %vm1168_vm3, %v1390_v58, 0 }
 0x689   : > { %3494 = vmatpush3.bf16.msra.mxu0 %v1395_v59  ;;  %v1388_v61 = vpack.c.bf16 %v1387_v57, %v1387_v57  ;;  %3526 = vmatpush3.bf16.msra.mxu1 %v1590_v41  ;;  %v1711_v41 = vpack.c.bf16 %v1687_v39, %v1685_v38 }
 0x68a   : > { %3505 = vmatprep.subr.bf16.mxu0 %v4593_v0 }
 0x68c   : > { %3496 = vmatmul.mubr.msk.bf16.vlgmr.msra.gmra.mrb[16].mxu0 %vm1164_vm6, %v1388_v61 }
 0x68d   : > { %3506 = vmatpush3.bf16.msra.mxu0 %v1506_v62  ;;  %3507 = vmatprep.mubr.msk.bf16.mxu0 %vm4594_vm0, %v4593_v0 }
 0x68e   : > { %v3898_v63 = vpop.eup %3897 }
 0x68f   : > { %v1498_v1 = vmul.f32 %v3898_v63, %v3890_v43 }
 0x691   : > { %v1499_v2 = vpack.c.bf16 %v1498_v1, %v1498_v1  ;;  %v1670_v1 = vld [vmem:[#allocation17 + $0x8] sm:$0xff] }
 0x694   : > { %3508 = vmatmul.mubr.msk.bf16.vlgmr.msra.gmra.mrb[20].mxu0 %vm1164_vm6, %v1499_v2  ;;  %v1672_v2 = vld [vmem:[#allocation17 + $0x18] sm:$0xff] }
 0x695   : > { %1762 = vmatprep.mubr.bf16.mxu0 %v4595_v15 }
 0x6e4   : > { %v5355_v3 = vpop.f32.mrb[8].mxu0 }
 0x6e5   : > { %v3473_v4 = vpop.f32.mrb[9].mxu0 }
 0x6e6   : > { %v1209_v5 = vpop.f32.mrb[10].mxu0  ;;  %v1704_v4 = vpack.c.bf16 %v1672_v2, %v1670_v1  ;;  %v1791_v1 = vld [vmem:[#allocation20 + $0x90] sm:$0xff]  ;;  %v1792_v2 = vld [vmem:[#allocation20 + $0x98] sm:$0xff] }
 0x6e7   : > { %v3474_v6 = vpop.f32.mrb[11].mxu0  ;;  %v1671_v5 = vld [vmem:[#allocation17 + $0x10] sm:$0xff] }
 0x6e8   : > { %v1674_v6 = vld [vmem:[#allocation17 + $0x28] sm:$0xff]  ;;  %1730 = vmatprep.subr.bf16.mxu0 %v1704_v4  ;;  %v1817_v4 = vpack.c.bf16 %v1792_v2, %v1791_v1 }
 0x6e9   : > { %v1706_v9 = vpack.c.bf16 %v1676_v7, %v1674_v6  ;;  %v1776_v6 = vld [vmem:[#allocation20 + $0x18] sm:$0xff]  ;;  %v1793_v7 = vld [vmem:[#allocation20 + $0xa0] sm:$0xff] }
 0x756   : > { %v1320_v34 = vpop.f32.mrb[12].mxu0 }
 0x757   : > { %1549 = vrot.lane.b32.xlu1 %v1320_v34, %s4598_s23  ;;  %v3485_v35 = vpop.f32.mrb[13].mxu0  ;;  %v1709_v34 = vpack.c.bf16 %v1683_v33, %v1681_v32  ;;  %v1800_v32 = vld [vmem:[#allocation20 + $0xd8] sm:$0xff]  ;;  %v1812_v33 = vpack.c.bf16 %v1782_v30, %v1781_v29  ;;  %v1903_v29 = vld [vmem:[#allocation8 + $0x190] sm:$0xff] }
 0x758   : > { %v1323_v36 = vpop.f32.mrb[14].mxu0  ;;  %v1686_v35 = vld [vmem:[#allocation17 + $0x88] sm:$0xff]  ;;  %v1906_v30 = vld [vmem:[#allocation8 + $0x1a8] sm:$0xff] }
 0x759   : > { %v3486_v37 = vpop.f32.mrb[15].mxu0  ;;  %v1688_v36 = vld [vmem:[#allocation17 + $0x98] sm:$0xff] }
 0x75a   : > { %v1712_v37 = vpack.c.bf16 %v1688_v36, %v1686_v35  ;;  %v1783_v35 = vld [vmem:[#allocation20 + $0x50] sm:$0xff]  ;;  %v1784_v36 = vld [vmem:[#allocation20 + $0x58] sm:$0xff] }
 0x75f   : > { %v1431_v42 = vpop.f32.mrb[16].mxu0 }
 0x760   : > { %1553 = vrot.lane.b32.xlu0 %v1431_v42, %s4596_s6  ;;  %v3497_v43 = vpop.f32.mrb[17].mxu0  ;;  %v1690_v42 = vld [vmem:[#allocation17 + $0xa8] sm:$0xff] }
 0x761   : > { %v1434_v44 = vpop.f32.mrb[18].mxu0  ;;  %v1692_v43 = vld [vmem:[#allocation17 + $0xb8] sm:$0xff] }
 0x762   : > { %v3498_v45 = vpop.f32.mrb[19].mxu0  ;;  %v1714_v44 = vpack.c.bf16 %v1692_v43, %v1690_v42  ;;  %v3288_v43 = vld [vmem:[#allocation14] ss:$0 sm:$0xff] }
 0x763   : > { %v1689_v45 = vld [vmem:[#allocation17 + $0xa0] sm:$0xff] }
 0x767   : > { %v1542_v46 = vpop.f32.mrb[20].mxu0 }
 0x768   : > { %1557 = vrot.lane.b32.xlu1 %v1542_v46, %s4597_s19  ;;  %v3509_v47 = vpop.f32.mrb[21].mxu0  ;;  %v1691_v46 = vld [vmem:[#allocation17 + $0xb0] sm:$0xff] }
 0x769   : > { %v1545_v48 = vpop.f32.mrb[22].mxu0  ;;  %v1713_v47 = vpack.c.bf16 %v1691_v46, %v1689_v45  ;;  %v3289_v45 = vld [vmem:[#allocation16] ss:$0 sm:$0xff] }
 0x76a   : > { %v3510_v49 = vpop.f32.mrb[23].mxu0  ;;  %v1694_v48 = vld [vmem:[#allocation17 + $0xc8] sm:$0xff] }
 0x76b   : > { %v1696_v49 = vld [vmem:[#allocation17 + $0xd8] sm:$0xff] }
 0x7c9   : > { %v1550_v50 = vpop.permute.xlu1 %1549 }
 0x7ca   : > { %v1560_v52 = vsel %vm1102_vm4, %v5355_v3, %v1550_v50  ;;  %v1669_v3 = vld [vmem:[#allocation17] sm:$0xff]  ;;  %v1716_v50 = vpack.c.bf16 %v1696_v49, %v1694_v48 }
 0x7cb   : > { %v1703_v8 = vpack.c.bf16 %v1671_v5, %v1669_v3  ;;  %v1775_v5 = vld [vmem:[#allocation20 + $0x10] sm:$0xff]  ;;  %v1801_v49 = vld [vmem:[#allocation20 + $0xe0] sm:$0xff] }
 0x7cd   : > { %1731 = vmatpush1.bf16.msra.mxu0 %v1703_v8  ;;  %v1794_v8 = vld [vmem:[#allocation20 + $0xa8] sm:$0xff] }
 0x7ce   : > { %1732 = vmatprep.subr.bf16.mxu0 %v1706_v9  ;;  %v1809_v9 = vpack.c.bf16 %v1776_v6, %v1775_v5  ;;  %v1818_v10 = vpack.c.bf16 %v1794_v8, %v1793_v7 }
 0x7d1   : > { %1733 = vmatpush1.bf16.msra.mxu0 %v1705_v14  ;;  %v1796_v14 = vld [vmem:[#allocation20 + $0xb8] sm:$0xff] }
 0x7d2   : > { %v1554_v51 = vpop.permute.xlu0 %1553 }
 0x7d3   : > { %v1562_v53 = vsel %vm1561_vm7, %v1560_v52, %v1554_v51  ;;  %v1693_v51 = vld [vmem:[#allocation17 + $0xc0] sm:$0xff]  ;;  %v1695_v52 = vld [vmem:[#allocation17 + $0xd0] sm:$0xff] }
 0x7da   : > { %v1558_v40 = vpop.permute.xlu1 %1557 }
 0x7db   : > { %v1564_v54 = vsel %vm1563_vm8, %v1562_v53, %v1558_v40  ;;  %v1698_v53 = vld [vmem:[#allocation17 + $0xe8] sm:$0xff]  ;;  %v1715_v40 = vpack.c.bf16 %v1695_v52, %v1693_v51 }
 0x7dc   : > { %v1582_v55 = vpack.c.bf16 %v1564_v54, %v1564_v54  ;;  %v1700_v54 = vld [vmem:[#allocation17 + $0xf8] sm:$0xff]  ;;  %v1785_v52 = vld [vmem:[#allocation20 + $0x60] sm:$0xff] }
 0x7de   : > { %3528 = vmatmul.mubr.bf16.vlgmr.msra.gmra.mrb[20].mxu1 %v1582_v55  ;;  %v1697_v55 = vld [vmem:[#allocation17 + $0xe0] sm:$0xff] }
 0x8b1   : > { %v1631_v57 = vpop.f32.mrb[20].mxu1 }
 0x8b2   : > { %v1632_v58 = vadd.f32 %v3287_v56, %v1631_v57  ;;  %v3529_v59 = vpop.f32.mrb[21].mxu1  ;;  %v1699_v56 = vld [vmem:[#allocation17 + $0xf0] sm:$0xff]  ;;  %v1718_v57 = vpack.c.bf16 %v1700_v54, %v1698_v53 }
 0x8b3   : > { %v1634_v60 = vpop.f32.mrb[22].mxu1  ;;  %v1789_v59 = vld [vmem:[#allocation20 + $0x80] sm:$0xff]  ;;  %v1786_v53 = vld [vmem:[#allocation20 + $0x68] sm:$0xff]  ;;  %v1803_v54 = vld [vmem:[#allocation20 + $0xf0] sm:$0xff] }
 0x8b4   : > { %v3530_v61 = vpop.f32.mrb[23].mxu1  ;;  %v1637_v62 = vadd.f32 %v1632_v58, %v5273_v18  ;;  %v1708_v18 = vpack.c.bf16 %v1680_v13, %v1678_v12  ;;  %v1717_v58 = vpack.c.bf16 %v1699_v56, %v1697_v55  ;;  %v1790_v60 = vld [vmem:[#allocation20 + $0x88] sm:$0xff]  ;;  %v1795_v13 = vld [vmem:[#allocation20 + $0xb0] sm:$0xff]  ;;  %v1804_v55 = vld [vmem:[#allocation20 + $0xf8] sm:$0xff] }
 0x8b5   : > { %v1773_v61 = vld [vmem:[#allocation20] sm:$0xff]  ;;  %v1778_v12 = vld [vmem:[#allocation20 + $0x28] sm:$0xff]  ;;  %v1823_v56 = vpack.c.bf16 %v1804_v55, %v1803_v54  ;;  %v1918_v54 = vld [vmem:[#allocation8 + $0x208] sm:$0xff] }
 0x8b6   : > { %v1641_v63 = vsel %vm1640_vm9, %v1637_v62, 0.0  ;;  %1734 = vmatprep.subr.bf16.mxu0 %v1708_v18  ;;  %v1810_v18 = vpack.c.bf16 %v1778_v12, %v1777_v11 }
 0x8b7   : > { %1642 = vadd.xlane.f32.xlu0 %v1641_v63  ;;  %1735 = vmatpush1.bf16.msra.mxu0 %v1707_v26  ;;  %v1774_v63 = vld [vmem:[#allocation20 + $0x8] sm:$0xff] }
 0x8b8   : > { %1736 = vmatprep.subr.bf16.mxu0 %v1710_v31  ;;  %v1808_v3 = vpack.c.bf16 %v1774_v63, %v1773_v61  ;;  %v1799_v31 = vld [vmem:[#allocation20 + $0xd0] sm:$0xff] }
 0x8bb   : > { %1737 = vmatpush1.bf16.msra.mxu0 %v1709_v34  ;;  %v1821_v34 = vpack.c.bf16 %v1800_v32, %v1799_v31  ;;  %v1954_v32 = vpack.c.bf16 %v1906_v30, %v1903_v29  ;;  %v1940_v29 = vld [vmem:[#allocation8 + $0x2b8] sm:$0xff]  ;;  %v1939_v30 = vld [vmem:[#allocation8 + $0x2b0] sm:$0xff] }
 0x8bc   : > { %1738 = vmatprep.subr.bf16.mxu0 %v1712_v37  ;;  %v1813_v37 = vpack.c.bf16 %v1784_v36, %v1783_v35  ;;  %v1907_v35 = vld [vmem:[#allocation8 + $0x1b0] sm:$0xff] }
 0x8bf   : > { %1739 = vmatpush1.bf16.msra.mxu0 %v1711_v41 }
 0x8c0   : > { %1740 = vmatprep.subr.bf16.mxu0 %v1714_v44 }
 0x8c3   : > { %1741 = vmatpush1.bf16.msra.mxu0 %v1713_v47 }
 0x8c4   : > { %1742 = vmatprep.subr.bf16.mxu0 %v1716_v50  ;;  %v1802_v50 = vld [vmem:[#allocation20 + $0xe8] sm:$0xff] }
 0x8c5   : > { %v1822_v51 = vpack.c.bf16 %v1802_v50, %v1801_v49 }
 0x8c7   : > { %1743 = vmatpush1.bf16.msra.mxu0 %v1715_v40  ;;  %v1814_v40 = vpack.c.bf16 %v1786_v53, %v1785_v52  ;;  %v1916_v52 = vld [vmem:[#allocation8 + $0x1f8] sm:$0xff]  ;;  %v1915_v53 = vld [vmem:[#allocation8 + $0x1f0] sm:$0xff] }
 0x8c8   : > { %1744 = vmatprep.subr.bf16.mxu0 %v1718_v57  ;;  %v1787_v57 = vld [vmem:[#allocation20 + $0x70] sm:$0xff]  ;;  %v1960_v55 = vpack.c.bf16 %v1918_v54, %v1915_v53 }
 0x8c9   : > { %v1950_v54 = vld [vmem:[#allocation10 + $0x3] sm:$0x7] }
 0x8cb   : > { %1745 = vmatpush1.bf16.msra.mxu0 %v1717_v58 }
 0x944   : > { %v1643_v16 = vpop.xlane.xlu0 %1642 }
 0x945   : > { %v1645_v17 = vmul.f32 0.0078125, %v1643_v16  ;;  %v1819_v16 = vpack.c.bf16 %v1796_v14, %v1795_v13 }
 0x947   : > { %v5373_v19 = vsub.f32 %v1637_v62, %v1645_v17  ;;  %v1816_v62 = vpack.c.bf16 %v1790_v60, %v1789_v59  ;;  %v1779_v17 = vld [vmem:[#allocation20 + $0x30] sm:$0xff]  ;;  %v1701_v59 = vld [vmem:[#allocation19] sm:$0x3] }
 0x948   : > { %v1723_v60 = vrot.slane %v1701_v59, %v5288_v28  ;;  %v1727_v61 = vrot.slane %v1701_v59, %v5285_v27  ;;  %v1922_v59 = vld [vmem:[#allocation8 + $0x228] sm:$0xff] }
 0x949   : > { %v1647_v20 = vmul.f32 %v5373_v19, %v5373_v19  ;;  %3350 = vmatprep.subr.bf16.mxu1 %v1816_v62 }
 0x94a   : > { %3351 = vmatpush3.bf16.msra.mxu1 %v1808_v3 }
 0x94b   : > { %v1648_v21 = vsel %vm1640_vm9, %v1647_v20, 0.0  ;;  %3352 = vmatprep.subr.bf16.mxu1 %v1817_v4  ;;  %v1780_v20 = vld [vmem:[#allocation20 + $0x38] sm:$0xff] }
 0x94c   : > { %1649 = vadd.xlane.f32.xlu1 %v1648_v21  ;;  %v1797_v21 = vld [vmem:[#allocation20 + $0xc0] sm:$0xff]  ;;  %v1811_v23 = vpack.c.bf16 %v1780_v20, %v1779_v17  ;;  %v1902_v20 = vld [vmem:[#allocation8 + $0x188] sm:$0xff] }
 0x94d   : > { %v1820_v26 = vpack.c.bf16 %v1798_v22, %v1797_v21  ;;  %v1905_v21 = vld [vmem:[#allocation8 + $0x1a0] sm:$0xff] }
 0x94e   : > { %3353 = vmatpush3.bf16.msra.mxu1 %v1809_v9  ;;  %v1901_v22 = vld [vmem:[#allocation8 + $0x180] sm:$0xff] }
 0x94f   : > { %3354 = vmatprep.subr.bf16.mxu1 %v1818_v10  ;;  %v3290_v10 = vld [vmem:[#allocation22] ss:$0 sm:$0xff] }
 0x952   : > { %3355 = vmatpush3.bf16.msra.mxu1 %v1810_v18 }
 0x953   : > { %3356 = vmatprep.subr.bf16.mxu1 %v1819_v16 }
 0x956   : > { %3357 = vmatpush3.bf16.msra.mxu1 %v1811_v23  ;;  %v1953_v23 = vpack.c.bf16 %v1905_v21, %v1902_v20  ;;  %v1938_v21 = vld [vmem:[#allocation8 + $0x2a8] sm:$0xff] }
 0x957   : > { %3358 = vmatprep.subr.bf16.mxu1 %v1820_v26  ;;  %v1904_v26 = vld [vmem:[#allocation8 + $0x198] sm:$0xff] }
 0x958   : > { %v1952_v31 = vpack.c.bf16 %v1904_v26, %v1901_v22  ;;  %1992 = vmatprep.subr.bf16.mxu0 %v1953_v23  ;;  %v1941_v22 = vld [vmem:[#allocation8 + $0x2c0] sm:$0xff] }
 0x959   : > { %v1971_v23 = vpack.c.bf16 %v1941_v22, %v1938_v21  ;;  %v1937_v26 = vld [vmem:[#allocation8 + $0x2a0] sm:$0xff] }
 0x95a   : > { %3359 = vmatpush3.bf16.msra.mxu1 %v1812_v33  ;;  %v1908_v33 = vld [vmem:[#allocation8 + $0x1b8] sm:$0xff] }
 0x95b   : > { %3360 = vmatprep.subr.bf16.mxu1 %v1821_v34  ;;  %v1911_v34 = vld [vmem:[#allocation8 + $0x1d0] sm:$0xff] }
 0x95c   : > { %v1956_v36 = vpack.c.bf16 %v1911_v34, %v1908_v33  ;;  %v1944_v33 = vld [vmem:[#allocation8 + $0x2d8] sm:$0xff]  ;;  %v1947_v34 = vld [vmem:[#allocation8 + $0x2f0] sm:$0xff] }
 0x95e   : > { %3361 = vmatpush3.bf16.msra.mxu1 %v1813_v37  ;;  %v1910_v37 = vld [vmem:[#allocation8 + $0x1c8] sm:$0xff] }
 0x95f   : > { %3362 = vmatprep.subr.bf16.mxu1 %v1822_v51  ;;  %v1913_v51 = vld [vmem:[#allocation8 + $0x1e0] sm:$0xff] }
 0x962   : > { %3363 = vmatpush3.bf16.msra.mxu1 %v1814_v40  ;;  %v1958_v40 = vpack.c.bf16 %v1916_v52, %v1913_v51  ;;  %v3292_v51 = vld [vmem:[#allocation25] ss:$0 sm:$0xff] }
 0x963   : > { %3364 = vmatprep.subr.bf16.mxu1 %v1823_v56  ;;  %v1920_v56 = vld [vmem:[#allocation8 + $0x218] sm:$0xff] }
 0x9d9   : > { %v1650_v38 = vpop.xlane.xlu1 %1649 }
 0x9da   : > { %v1651_v39 = vmul.f32 0.0078125, %v1650_v38  ;;  %v1909_v38 = vld [vmem:[#allocation8 + $0x1c0] sm:$0xff] }
 0x9dc   : > { %v1652_v41 = vadd.f32 1e-05, %v1651_v39  ;;  %v1912_v39 = vld [vmem:[#allocation8 + $0x1d8] sm:$0xff] }
 0x9de   : > { %3899 = vrsqrt.f32 %v1652_v41  ;;  %v1955_v41 = vpack.c.bf16 %v1910_v37, %v1907_v35  ;;  %v1943_v37 = vld [vmem:[#allocation8 + $0x2d0] sm:$0xff] }
 0x9e8   : > { %v3900_v42 = vpop.eup %3899 }
 0x9e9   : > { %v1654_v44 = vmul.f32 %v3900_v42, %v5373_v19  ;;  %v1788_v19 = vld [vmem:[#allocation20 + $0x78] sm:$0xff]  ;;  %v1957_v42 = vpack.c.bf16 %v1912_v39, %v1909_v38  ;;  %v1945_v39 = vld [vmem:[#allocation8 + $0x2e0] sm:$0xff] }
 0x9ea   : > { %v1815_v58 = vpack.c.bf16 %v1788_v19, %v1787_v57  ;;  %v1923_v57 = vld [vmem:[#allocation8 + $0x230] sm:$0xff]  ;;  %v1946_v38 = vld [vmem:[#allocation8 + $0x2e8] sm:$0xff] }
 0x9eb   : > { %v1661_v46 = vmul.f32 %v3288_v43, %v1654_v44  ;;  %v1914_v43 = vld [vmem:[#allocation8 + $0x1e8] sm:$0xff]  ;;  %v1917_v44 = vld [vmem:[#allocation8 + $0x200] sm:$0xff]  ;;  %v1962_v19 = vpack.c.bf16 %v1923_v57, %v1920_v56 }
 0x9ec   : > { %3365 = vmatpush3.bf16.msra.mxu1 %v1815_v58  ;;  %v1919_v58 = vld [vmem:[#allocation8 + $0x210] sm:$0xff] }
 0x9ed   : > { %v1668_v47 = vadd.f32 %v3289_v45, %v1661_v46  ;;  %3531 = vmatprep.subr.bf16.mxu1 %v4593_v0  ;;  %v1959_v45 = vpack.c.bf16 %v1917_v44, %v1914_v43 }
 0x9ef   : > { %v1702_v48 = vpack.c.bf16 %v1668_v47, %v1668_v47 }
 0x9f1   : > { %1763 = vmatmul.mubr.bf16.vlgmr.msra.gmra.mrb[24].mxu0 %v1702_v48 }
 0x9f2   : > { %2024 = vmatprep.mubr.bf16.mxu0 %v4595_v15  ;;  %1993 = vmatpush1.bf16.msra.mxu0 %v1952_v31  ;;  %v1970_v31 = vpack.c.bf16 %v1940_v29, %v1937_v26 }
 0x9f3   : > { %1994 = vmatprep.subr.bf16.mxu0 %v1956_v36  ;;  %v1974_v36 = vpack.c.bf16 %v1947_v34, %v1944_v33 }
 0x9f6   : > { %1995 = vmatpush1.bf16.msra.mxu0 %v1955_v41  ;;  %v1973_v41 = vpack.c.bf16 %v1946_v38, %v1943_v37 }
 0x9f7   : > { %1996 = vmatprep.subr.bf16.mxu0 %v1959_v45 }
 0x9fa   : > { %1997 = vmatpush1.bf16.msra.mxu0 %v1958_v40 }
 0x9fb   : > { %1998 = vmatprep.subr.bf16.mxu0 %v1962_v19 }
 0xac4   : > { %v1764_v62 = vpop.f32.mrb[24].mxu0 }
 0xac5   : > { %v1765_v63 = vadd.f32 %v1764_v62, %v1723_v60  ;;  %v1766_v1 = vpop.f32.mrb[25].mxu0  ;;  %v1921_v60 = vld [vmem:[#allocation8 + $0x220] sm:$0xff]  ;;  %v1924_v62 = vld [vmem:[#allocation8 + $0x238] sm:$0xff] }
 0xac6   : > { %v1767_v2 = vadd.f32 %v1766_v1, %v1727_v61  ;;  %v1768_v3 = vpop.f32.mrb[26].mxu0  ;;  %v1961_v61 = vpack.c.bf16 %v1922_v59, %v1919_v58  ;;  %v1926_v1 = vld [vmem:[#allocation8 + $0x248] sm:$0xff]  ;;  %v1988_v58 = vrot.slane %v1950_v54, %v1014_v25 }
 0xac7   : > { %v1771_v4 = vmax.f32 %v1765_v63, 0.0  ;;  %v1769_v5 = vpop.f32.mrb[27].mxu0  ;;  %v1963_v63 = vpack.c.bf16 %v1924_v62, %v1921_v60 }
 0xac8   : > { %v1772_v6 = vmax.f32 %v1767_v2, 0.0  ;;  %1999 = vmatpush1.bf16.msra.mxu0 %v1961_v61  ;;  %v1929_v2 = vld [vmem:[#allocation8 + $0x260] sm:$0xff]  ;;  %v1928_v5 = vld [vmem:[#allocation8 + $0x258] sm:$0xff] }
 0xac9   : > { %v1806_v8 = vpack.c.bf16 %v1771_v4, %v1771_v4  ;;  %v1965_v3 = vpack.c.bf16 %v1929_v2, %v1926_v1  ;;  %v1925_v4 = vld [vmem:[#allocation8 + $0x240] sm:$0xff]  ;;  %v1980_v1 = vrot.slane %v1950_v54, %v5288_v28 }
 0xaca   : > { %v1807_v7 = vpack.c.bf16 %v1772_v6, %v1772_v6  ;;  %v1927_v6 = vld [vmem:[#allocation8 + $0x250] sm:$0xff] }
 0xacb   : > { %2000 = vmatprep.subr.bf16.mxu0 %v1965_v3 }
 0xacc   : > { %1862 = vmatprep.mubr.bf16.mxu1 %v1807_v7  ;;  %v1964_v7 = vpack.c.bf16 %v1928_v5, %v1925_v4 }
 0xacd   : > { %1863 = vmatmul.mubr.bf16.vlgmr.msra.gmra.mrb[24].mxu1 %v1806_v8  ;;  %v1930_v8 = vld [vmem:[#allocation8 + $0x268] sm:$0xff] }
 0xace   : > { %3547 = vmatprep.mubr.msk.bf16.mxu1 %vm4594_vm0, %v4593_v0  ;;  %3532 = vmatpush3.bf16.msra.mxu1 %v1954_v32  ;;  %v1942_v32 = vld [vmem:[#allocation8 + $0x2c8] sm:$0xff] }
 0xacf   : > { %3533 = vmatprep.subr.bf16.mxu1 %v4593_v0  ;;  %2001 = vmatpush1.bf16.msra.mxu0 %v1964_v7  ;;  %v1972_v35 = vpack.c.bf16 %v1942_v32, %v1939_v30 }
 0xad2   : > { %3534 = vmatpush3.bf16.msra.mxu1 %v1957_v42  ;;  %v1948_v42 = vld [vmem:[#allocation8 + $0x2f8] sm:$0xff] }
 0xad3   : > { %3535 = vmatprep.subr.bf16.mxu1 %v4593_v0  ;;  %v1975_v43 = vpack.c.bf16 %v1948_v42, %v1945_v39 }
 0xad6   : > { %3536 = vmatpush3.bf16.msra.mxu1 %v1960_v55  ;;  %v1984_v55 = vrot.slane %v1950_v54, %v5285_v27 }
 0xad7   : > { %3537 = vmatprep.subr.bf16.mxu1 %v4593_v0 }
 0xada   : > { %3538 = vmatpush3.bf16.msra.mxu1 %v1963_v63 }
 0xadb   : > { %3539 = vmatprep.subr.bf16.mxu1 %v4593_v0 }
 0xba0   : > { %v3366_v9 = vpop.f32.mrb[24].mxu1 }
 0xba1   : > { %v3367_v11 = vpop.f32.mrb[25].mxu1 }
 0xba2   : > { %v3368_v12 = vadd.f32 %v3367_v11, %v3366_v9  ;;  %v3369_v13 = vpop.f32.mrb[26].mxu1  ;;  %v1966_v9 = vpack.c.bf16 %v1930_v8, %v1927_v6  ;;  %v1935_v11 = vld [vmem:[#allocation8 + $0x290] sm:$0xff] }
 0xba3   : > { %v3370_v14 = vpop.f32.mrb[27].mxu1  ;;  %v1931_v13 = vld [vmem:[#allocation8 + $0x270] sm:$0xff] }
 0xba4   : > { %v1865_v18 = vadd.f32 %v3368_v12, %v3290_v10  ;;  %v1932_v10 = vld [vmem:[#allocation8 + $0x278] sm:$0xff]  ;;  %3540 = vmatpush3.bf16.msra.mxu1 %v1966_v9  ;;  %v1934_v14 = vld [vmem:[#allocation8 + $0x288] sm:$0xff] }
 0xba5   : > { %v1968_v12 = vpack.c.bf16 %v1935_v11, %v1932_v10  ;;  %3541 = vmatprep.subr.bf16.mxu1 %v4593_v0 }
 0xba6   : > { %v1870_v16 = vadd.f32 %v1865_v18, %v1668_v47  ;;  %v1933_v18 = vld [vmem:[#allocation8 + $0x280] sm:$0xff] }
 0xba7   : > { %2002 = vmatprep.subr.bf16.mxu0 %v1968_v12 }
 0xba8   : > { %v1873_v17 = vsel %vm1640_vm9, %v1870_v16, 0.0 }
 0xba9   : > { %1874 = vadd.xlane.f32.xlu0 %v1873_v17  ;;  %v1936_v17 = vld [vmem:[#allocation8 + $0x298] sm:$0xff] }
 0xbaa   : > { %v1969_v20 = vpack.c.bf16 %v1936_v17, %v1933_v18 }
 0xbac   : > { %3542 = vmatpush3.bf16.msra.mxu1 %v1969_v20 }
 0xbad   : > { %3543 = vmatprep.subr.bf16.mxu1 %v4593_v0 }
 0xbb0   : > { %3544 = vmatpush3.bf16.msra.mxu1 %v1972_v35 }
 0xbb1   : > { %3545 = vmatprep.subr.bf16.mxu1 %v4593_v0 }
 0xbb4   : > { %3546 = vmatpush3.bf16.msra.mxu1 %v1975_v43 }
 0xbb5   : > { %3575 = vmatprep.subr.bf16.mxu1 %v4593_v0 }
 0xc36   : > { %v1875_v46 = vpop.xlane.xlu0 %1874 }
 0xc37   : > { %v1876_v47 = vmul.f32 0.0078125, %v1875_v46 }
 0xc39   : > { %v5388_v48 = vsub.f32 %v1870_v16, %v1876_v47  ;;  %v1967_v16 = vpack.c.bf16 %v1934_v14, %v1931_v13 }
 0xc3b   : > { %v1878_v49 = vmul.f32 %v5388_v48, %v5388_v48  ;;  %2003 = vmatpush1.bf16.msra.mxu0 %v1967_v16 }
 0xc3c   : > { %2004 = vmatprep.subr.bf16.mxu0 %v1971_v23 }
 0xc3d   : > { %v1879_v50 = vsel %vm1640_vm9, %v1878_v49, 0.0  ;;  %v3291_v49 = vld [vmem:[#allocation23] ss:$0 sm:$0xff] }
 0xc3e   : > { %1880 = vadd.xlane.f32.xlu0 %v1879_v50 }
 0xc3f   : > { %2005 = vmatpush1.bf16.msra.mxu0 %v1970_v31 }
 0xc40   : > { %2006 = vmatprep.subr.bf16.mxu0 %v1974_v36 }
 0xc43   : > { %2007 = vmatpush1.bf16.msra.mxu0 %v1973_v41 }
 0xc44   : > { %3551 = vmatprep.subr.bf16.mxu0 %v4593_v0 }
 0xccb   : > { %v1881_v44 = vpop.xlane.xlu0 %1880 }
 0xccc   : > { %v1882_v45 = vmul.f32 0.0078125, %v1881_v44 }
 0xcce   : > { %v1883_v46 = vadd.f32 1e-05, %v1882_v45 }
 0xcd0   : > { %3901 = vrsqrt.f32 %v1883_v46 }
 0xcda   : > { %v3902_v47 = vpop.eup %3901 }
 0xcdb   : > { %v1885_v50 = vmul.f32 %v3902_v47, %v5388_v48 }
 0xcdd   : > { %v1892_v52 = vmul.f32 %v3291_v49, %v1885_v50 }
 0xcdf   : > { %v5401_v53 = vadd.f32 %v3292_v51, %v1892_v52 }
 0xce1   : > { %v1951_v40 = vpack.c.bf16 %v5401_v53, %v5401_v53 }
 0xce3   : > { %2025 = vmatmul.mubr.bf16.vlgmr.msra.gmra.mrb[28].mxu0 %v1951_v40  ;;  %3548 = vmatmul.mubr.bf16.vlgmr.msra.gmra.mrb[28].mxu1 %v1951_v40 }
 0xce4   : > { %3553 = vmatprep.mubr.msk.bf16.mxu0 %vm4594_vm0, %v4593_v0  ;;  %3577 = vmatprep.mubr.msk.bf16.mxu1 %vm4594_vm0, %v4593_v0 }
 0xdb6   : > { %v2026_v56 = vpop.f32.mrb[28].mxu0  ;;  %v2067_v48 = vpop.f32.mrb[28].mxu1 }
 0xdb7   : > { %v2028_v57 = vpop.f32.mrb[29].mxu0  ;;  %v3549_v19 = vpop.f32.mrb[29].mxu1  ;;  %v2068_v3 = vadd.f32 %v2067_v48, %v1988_v58  ;;  %v2027_v5 = vadd.f32 %v2026_v56, %v1980_v1 }
 0xdb8   : > { %v2029_v59 = vadd.f32 %v2028_v57, %v1984_v55  ;;  %v2030_v60 = vpop.f32.mrb[30].mxu0  ;;  %v2070_v61 = vpop.f32.mrb[30].mxu1 }
 0xdb9   : > { %v2031_v62 = vpop.f32.mrb[31].mxu0  ;;  %v3550_v63 = vpop.f32.mrb[31].mxu1  ;;  %v5415_v6 = vpack.c.bf16 %v2068_v3, %v2068_v3  ;;  %v2073_v7 = vpack.c.bf16 %v2027_v5, %v2027_v5 }
 0xdba   : > { %v2074_v2 = vpack.c.bf16 %v2029_v59, %v2029_v59 }
 0xdbb   : > { %v2139_v24 = vsel %vm1168_vm3, %v5415_v6, 0 }
 0xdbc   : > { %v2079_v4 = vsel %vm1102_vm4, %v2074_v2, 0 }
 0xdbd   : > { %3552 = vmatpush3.bf16.xpose.msra.mxu0 %v2079_v4 }
 0xdbe   : > { %3557 = vmatprep.subr.bf16.mxu0 %v4593_v0 }
 0xdc4   : > { %3554 = vmatmul.mubr.msk.bf16.vlgmr.msra.gmra.mrb[32].mxu0 %vm1102_vm4, %v2073_v7 }
 0xdc5   : > { %3558 = vmatpush3.bf16.msra.mxu0 %v2139_v24  ;;  %3559 = vmatprep.mubr.msk.bf16.mxu0 %vm4594_vm0, %v4593_v0 }
 0xdc6   : > { %3563 = vmatprep.subr.bf16.mxu0 %v4593_v0 }
 0xe97   : > { %v2115_v25 = vpop.f32.mrb[32].mxu0 }
 0xe98   : > { %v2121_v8 = vmul.f32 0.17677669, %v2115_v25  ;;  %v3555_v9 = vpop.f32.mrb[33].mxu0 }
 0xe99   : > { %v2118_v10 = vpop.f32.mrb[34].mxu0 }
 0xe9a   : > { %v3556_v11 = vpop.f32.mrb[35].mxu0  ;;  %v2122_v12 = vsel %vm1150_vm5, %v2121_v8, -inf }
 0xe9b   : > { %2123 = vmax.xlane.f32.xlu1 %v2122_v12 }
 0xeac   : > { %2185 = vrot.lane.b32.xlu1 %v2074_v2, %s4597_s19 }
 0xeb0   : > { %2297 = vrot.lane.b32.xlu1 %v2074_v2, %s4596_s6 }
 0xeb4   : > { %2295 = vrot.lane.b32.xlu1 %v2073_v7, %s4596_s6 }
 0xeb8   : > { %2406 = vrot.lane.b32.xlu1 %v2073_v7, %s4598_s23 }
 0xf28   : > { %v2124_v13 = vpop.xlane.xlu1 %2123 }
 0xf29   : > { %v2125_v14 = vsub.f32 %v2121_v8, %v2124_v13 }
 0xf2b   : > { %v2126_v18 = vmul.f32 1.442695, %v2125_v14 }
 0xf2c   : > { %v2186_v16 = vpop.permute.xlu1 %2185 }
 0xf2d   : > { %3903 = vpow2.f32 %v2126_v18  ;;  %v2191_v35 = vsel %vm1102_vm4, %v2186_v16, 0 }
 0xf30   : > { %v2298_v17 = vpop.permute.xlu1 %2297 }
 0xf31   : > { %v2303_v20 = vsel %vm1102_vm4, %v2298_v17, 0 }
 0xf32   : > { %3576 = vmatpush3.bf16.xpose.msra.mxu1 %v2303_v20 }
 0xf33   : > { %3587 = vmatprep.subr.bf16.mxu1 %v4593_v0 }
 0xf34   : > { %v2296_v22 = vpop.permute.xlu1 %2295 }
 0xf37   : > { %v3904_v21 = vpop.eup %3903 }
 0xf38   : > { %v2128_v23 = vsel %vm1150_vm5, %v3904_v21, 0.0  ;;  %v2407_v36 = vpop.permute.xlu1 %2406 }
 0xf39   : > { %2129 = vadd.xlane.f32.xlu0 %v2128_v23  ;;  %3578 = vmatmul.mubr.msk.bf16.vlgmr.msra.gmra.mrb[32].mxu1 %vm1102_vm4, %v2296_v22 }
 0xf3a   : > { %3589 = vmatprep.mubr.msk.bf16.mxu1 %vm4594_vm0, %v4593_v0 }
 0xf4f   : > { %2182 = vrot.lane.b32.xlu0 %v2073_v7, %s4597_s19 }
 0xf53   : > { %2408 = vrot.lane.b32.xlu0 %v2074_v2, %s4598_s23 }
 0xfc6   : > { %v2130_v26 = vpop.xlane.xlu0 %2129 }
 0xfc7   : > { %3905 = vrcp.f32 %v2130_v26 }
 0xfca   : > { %v2183_v29 = vpop.permute.xlu0 %2182 }
 0xfce   : > { %v2409_v30 = vpop.permute.xlu0 %2408 }
 0xfcf   : > { %v2414_v31 = vsel %vm1102_vm4, %v2409_v30, 0 }
 0xfd0   : > { %3588 = vmatpush3.bf16.xpose.msra.mxu1 %v2414_v31 }
 0xfd1   : > { %v3906_v32 = vpop.eup %3905  ;;  %3599 = vmatprep.subr.bf16.mxu1 %v4593_v0 }
 0xfd2   : > { %v2132_v33 = vmul.f32 %v3906_v32, %v3904_v21 }
 0xfd4   : > { %v2133_v34 = vpack.c.bf16 %v2132_v33, %v2132_v33  ;;  %v2533_v33 = vld [vmem:[#allocation11 + $0x80] sm:$0xff] }
 0xfd6   : > { %3560 = vmatmul.mubr.msk.bf16.vlgmr.msra.gmra.mrb[36].mxu0 %vm1164_vm6, %v2133_v34  ;;  %v2534_v34 = vld [vmem:[#allocation11 + $0x88] sm:$0xff] }
 0xfd7   : > { %3564 = vmatpush3.bf16.xpose.msra.mxu0 %v2191_v35  ;;  %3590 = vmatmul.mubr.msk.bf16.vlgmr.msra.gmra.mrb[36].mxu1 %vm1102_vm4, %v2407_v36  ;;  %v2535_v35 = vld [vmem:[#allocation11 + $0x90] sm:$0xff]  ;;  %v2552_v36 = vpack.c.bf16 %v2534_v34, %v2533_v33  ;;  %v2643_v33 = vld [vmem:[#allocation17 + $0x120] sm:$0xff] }
 0xfd8   : > { %3565 = vmatprep.mubr.msk.bf16.mxu0 %vm4594_vm0, %v4593_v0  ;;  %3569 = vmatprep.subr.bf16.mxu0 %v4593_v0  ;;  %v2645_v34 = vld [vmem:[#allocation17 + $0x130] sm:$0xff] }
 0xfd9   : > { %3615 = vmatprep.mubr.msk.bf16.mxu1 %vm4594_vm0, %v4593_v0  ;;  %3600 = vmatpush3.bf16.msra.mxu1 %v2552_v36  ;;  %v2650_v36 = vld [vmem:[#allocation17 + $0x158] sm:$0xff] }
 0xfda   : > { %3601 = vmatprep.subr.bf16.mxu1 %v4593_v0 }
 0xfde   : > { %3566 = vmatmul.mubr.msk.bf16.vlgmr.msra.gmra.mrb[40].mxu0 %vm1102_vm4, %v2183_v29 }
 0xfdf   : > { %3571 = vmatprep.mubr.msk.bf16.mxu0 %vm4594_vm0, %v4593_v0 }
0x100c   : > { %v2339_v37 = vpop.f32.mrb[32].mxu1 }
0x100d   : > { %v2345_v38 = vmul.f32 0.17677669, %v2339_v37  ;;  %v3579_v39 = vpop.f32.mrb[33].mxu1  ;;  %v2536_v37 = vld [vmem:[#allocation11 + $0x98] sm:$0xff] }
0x100e   : > { %v2342_v41 = vpop.f32.mrb[34].mxu1  ;;  %v2537_v39 = vld [vmem:[#allocation11 + $0xa0] sm:$0xff] }
0x100f   : > { %v3580_v42 = vpop.f32.mrb[35].mxu1  ;;  %v2346_v43 = vsel %vm1150_vm5, %v2345_v38, -inf  ;;  %v2538_v41 = vld [vmem:[#allocation11 + $0xa8] sm:$0xff] }
0x1010   : > { %2347 = vmax.xlane.f32.xlu1 %v2346_v43  ;;  %v2554_v42 = vpack.c.bf16 %v2538_v41, %v2537_v39  ;;  %v2539_v43 = vld [vmem:[#allocation11 + $0xb0] sm:$0xff] }
0x109d   : > { %v2348_v44 = vpop.xlane.xlu1 %2347 }
0x109e   : > { %v2349_v45 = vsub.f32 %v2345_v38, %v2348_v44  ;;  %v2553_v38 = vpack.c.bf16 %v2536_v37, %v2535_v35  ;;  %v2648_v35 = vld [vmem:[#allocation17 + $0x148] sm:$0xff]  ;;  %v2676_v37 = vpack.c.bf16 %v2645_v34, %v2643_v33  ;;  %v2767_v33 = vld [vmem:[#allocation20 + $0x1b0] sm:$0xff]  ;;  %v2768_v34 = vld [vmem:[#allocation20 + $0x1b8] sm:$0xff] }
0x10a0   : > { %v2350_v46 = vmul.f32 1.442695, %v2349_v45  ;;  %3602 = vmatpush3.bf16.msra.mxu1 %v2553_v38  ;;  %v2541_v45 = vld [vmem:[#allocation11 + $0xc0] sm:$0xff] }
0x10a1   : > { %3603 = vmatprep.subr.bf16.mxu1 %v4593_v0 }
0x10a2   : > { %3907 = vpow2.f32 %v2350_v46  ;;  %v2542_v46 = vld [vmem:[#allocation11 + $0xc8] sm:$0xff] }
0x10a4   : > { %3604 = vmatpush3.bf16.msra.mxu1 %v2554_v42 }
0x10a5   : > { %3605 = vmatprep.subr.bf16.mxu1 %v4593_v0 }
0x10a9   : > { %v5450_v47 = vpop.f32.mrb[36].mxu0 }
0x10aa   : > { %v3561_v49 = vpop.f32.mrb[37].mxu0  ;;  %v2450_v50 = vpop.f32.mrb[36].mxu1 }
0x10ab   : > { %v2178_v51 = vpop.f32.mrb[38].mxu0  ;;  %v3591_v52 = vpop.f32.mrb[37].mxu1  ;;  %v2456_v60 = vmul.f32 0.17677669, %v2450_v50  ;;  %v2556_v49 = vpack.c.bf16 %v2542_v46, %v2541_v45  ;;  %v2543_v50 = vld [vmem:[#allocation11 + $0xd0] sm:$0xff] }
0x10ac   : > { %v3908_v40 = vpop.eup %3907  ;;  %v3562_v54 = vpop.f32.mrb[39].mxu0  ;;  %v2544_v51 = vld [vmem:[#allocation11 + $0xd8] sm:$0xff]  ;;  %v2652_v46 = vld [vmem:[#allocation17 + $0x168] sm:$0xff] }
0x10ad   : > { %v2453_v55 = vpop.f32.mrb[38].mxu1  ;;  %v2352_v48 = vsel %vm1150_vm5, %v3908_v40, 0.0  ;;  %v2457_v63 = vsel %vm1150_vm5, %v2456_v60, -inf  ;;  %v2557_v52 = vpack.c.bf16 %v2544_v51, %v2543_v50  ;;  %v2546_v54 = vld [vmem:[#allocation11 + $0xe8] sm:$0xff] }
0x10ae   : > { %v3592_v56 = vpop.f32.mrb[39].mxu1  ;;  %2353 = vadd.xlane.f32.xlu1 %v2352_v48  ;;  %v2651_v51 = vld [vmem:[#allocation17 + $0x160] sm:$0xff] }
0x10b1   : > { %v2227_v57 = vpop.f32.mrb[40].mxu0 }
0x10b2   : > { %v2233_v19 = vmul.f32 0.17677669, %v2227_v57  ;;  %v3567_v58 = vpop.f32.mrb[41].mxu0 }
0x10b3   : > { %v2230_v59 = vpop.f32.mrb[42].mxu0  ;;  %v2547_v58 = vld [vmem:[#allocation11 + $0xf0] sm:$0xff] }
0x10b4   : > { %v3568_v61 = vpop.f32.mrb[43].mxu0  ;;  %v2234_v62 = vsel %vm1150_vm5, %v2233_v19, -inf  ;;  %v2548_v59 = vld [vmem:[#allocation11 + $0xf8] sm:$0xff] }
0x10b5   : > { %2235 = vmax.xlane.f32.xlu0 %v2234_v62 }
0x10b9   : > { %2458 = vmax.xlane.f32.xlu0 %v2457_v63 }
0x10bf   : > { %2247 = vrot.lane.b32.xlu1 %v5415_v6, %s4597_s19 }
0x10c3   : > { %2469 = vrot.lane.b32.xlu1 %v5415_v6, %s4598_s23 }
0x113b   : > { %v2354_v1 = vpop.xlane.xlu1 %2353 }
0x113f   : > { %v2248_v2 = vpop.permute.xlu1 %2247 }
0x1140   : > { %v2253_v3 = vsel %vm1168_vm3, %v2248_v2, 0 }
0x1141   : > { %3570 = vmatpush3.bf16.msra.mxu0 %v2253_v3 }
0x1142   : > { %v2236_v4 = vpop.xlane.xlu0 %2235  ;;  %3581 = vmatprep.subr.bf16.mxu0 %v4593_v0 }
0x1143   : > { %v2237_v5 = vsub.f32 %v2233_v19, %v2236_v4 }
0x1145   : > { %v2238_v7 = vmul.f32 1.442695, %v2237_v5 }
0x1146   : > { %v2459_v24 = vpop.xlane.xlu0 %2458 }
0x1147   : > { %3909 = vpow2.f32 %v2238_v7  ;;  %v2460_v25 = vsub.f32 %v2456_v60, %v2459_v24  ;;  %v2559_v60 = vpack.c.bf16 %v2548_v59, %v2547_v58  ;;  %v2660_v58 = vld [vmem:[#allocation17 + $0x1a8] sm:$0xff]  ;;  %v2662_v59 = vld [vmem:[#allocation17 + $0x1b8] sm:$0xff] }
0x1149   : > { %v2461_v8 = vmul.f32 1.442695, %v2460_v25 }
0x114b   : > { %3911 = vpow2.f32 %v2461_v8 }
0x1151   : > { %v3910_v9 = vpop.eup %3909 }
0x1152   : > { %v2240_v10 = vsel %vm1150_vm5, %v3910_v9, 0.0 }
0x1153   : > { %2241 = vadd.xlane.f32.xlu0 %v2240_v10 }
0x1155   : > { %v3912_v11 = vpop.eup %3911 }
0x1156   : > { %v2463_v12 = vsel %vm1150_vm5, %v3912_v11, 0.0 }
0x1157   : > { %2464 = vadd.xlane.f32.xlu0 %v2463_v12  ;;  %v3301_v12 = vld [vmem:[#allocation13 + $0x1] ss:$0 sm:$0xff] }
0x116d   : > { %2358 = vrot.lane.b32.xlu0 %v5415_v6, %s4596_s6  ;;  %v2470_v6 = vpop.permute.xlu1 %2469 }
0x116e   : > { %v2475_v30 = vsel %vm1168_vm3, %v2470_v6, 0 }
0x11e0   : > { %v2242_v13 = vpop.xlane.xlu0 %2241 }
0x11e1   : > { %3913 = vrcp.f32 %v2242_v13 }
0x11e2   : > { %3915 = vrcp.f32 %v2354_v1 }
0x11e4   : > { %v2465_v14 = vpop.xlane.xlu0 %2464 }
0x11e5   : > { %3917 = vrcp.f32 %v2465_v14 }
0x11e8   : > { %v2359_v17 = vpop.permute.xlu0 %2358 }
0x11e9   : > { %v2364_v22 = vsel %vm1168_vm3, %v2359_v17, 0 }
0x11eb   : > { %v3914_v18 = vpop.eup %3913 }
0x11ec   : > { %v2244_v16 = vmul.f32 %v3914_v18, %v3910_v9  ;;  %v3916_v21 = vpop.eup %3915 }
0x11ed   : > { %v2356_v23 = vmul.f32 %v3916_v21, %v3908_v40  ;;  %v2545_v40 = vld [vmem:[#allocation11 + $0xe0] sm:$0xff] }
0x11ee   : > { %v2245_v20 = vpack.c.bf16 %v2244_v16, %v2244_v16  ;;  %v2558_v55 = vpack.c.bf16 %v2546_v54, %v2545_v40  ;;  %v2656_v54 = vld [vmem:[#allocation17 + $0x188] sm:$0xff] }
0x11ef   : > { %v2357_v26 = vpack.c.bf16 %v2356_v23, %v2356_v23  ;;  %v3918_v29 = vpop.eup %3917  ;;  %v2639_v23 = vld [vmem:[#allocation17 + $0x100] sm:$0xff] }
0x11f0   : > { %3572 = vmatmul.mubr.msk.bf16.vlgmr.msra.gmra.mrb[44].mxu0 %vm1164_vm6, %v2245_v20  ;;  %v2467_v31 = vmul.f32 %v3918_v29, %v3912_v11  ;;  %v2644_v29 = vld [vmem:[#allocation17 + $0x128] sm:$0xff] }
0x11f1   : > { %3582 = vmatpush3.bf16.msra.mxu0 %v2364_v22  ;;  %3583 = vmatprep.mubr.msk.bf16.mxu0 %vm4594_vm0, %v4593_v0  ;;  %v2640_v22 = vld [vmem:[#allocation17 + $0x108] sm:$0xff] }
0x11f2   : > { %3593 = vmatprep.subr.bf16.mxu0 %v4593_v0  ;;  %v2468_v32 = vpack.c.bf16 %v2467_v31, %v2467_v31 }
0x11f8   : > { %3584 = vmatmul.mubr.msk.bf16.vlgmr.msra.gmra.mrb[48].mxu0 %vm1164_vm6, %v2357_v26  ;;  %v2641_v26 = vld [vmem:[#allocation17 + $0x110] sm:$0xff] }
0x11f9   : > { %3594 = vmatpush3.bf16.msra.mxu0 %v2475_v30  ;;  %3595 = vmatprep.mubr.msk.bf16.mxu0 %vm4594_vm0, %v4593_v0  ;;  %v2646_v30 = vld [vmem:[#allocation17 + $0x138] sm:$0xff]  ;;  %v2674_v31 = vpack.c.bf16 %v2641_v26, %v2639_v23  ;;  %v2766_v26 = vld [vmem:[#allocation20 + $0x1a8] sm:$0xff] }
0x11fa   : > { %v2748_v23 = vld [vmem:[#allocation20 + $0x118] sm:$0xff] }
0x1200   : > { %3596 = vmatmul.mubr.msk.bf16.vlgmr.msra.gmra.mrb[52].mxu0 %vm1164_vm6, %v2468_v32  ;;  %v2677_v32 = vpack.c.bf16 %v2646_v30, %v2644_v29 }
0x1201   : > { %2733 = vmatprep.mubr.bf16.mxu0 %v4595_v15  ;;  %v2540_v15 = vld [vmem:[#allocation11 + $0xb8] sm:$0xff] }
0x1202   : > { %v2555_v44 = vpack.c.bf16 %v2540_v15, %v2539_v43  ;;  %v2647_v15 = vld [vmem:[#allocation17 + $0x140] sm:$0xff] }
0x1204   : > { %3606 = vmatpush3.bf16.msra.mxu1 %v2555_v44  ;;  %v2649_v44 = vld [vmem:[#allocation17 + $0x150] sm:$0xff] }
0x1205   : > { %3607 = vmatprep.subr.bf16.mxu1 %v4593_v0  ;;  %v2678_v45 = vpack.c.bf16 %v2649_v44, %v2647_v15  ;;  %v2753_v15 = vld [vmem:[#allocation20 + $0x140] sm:$0xff]  ;;  %v2754_v44 = vld [vmem:[#allocation20 + $0x148] sm:$0xff] }
0x1208   : > { %3608 = vmatpush3.bf16.msra.mxu1 %v2556_v49  ;;  %v2654_v49 = vld [vmem:[#allocation17 + $0x178] sm:$0xff] }
0x1209   : > { %3609 = vmatprep.subr.bf16.mxu1 %v4593_v0  ;;  %v2681_v50 = vpack.c.bf16 %v2654_v49, %v2652_v46  ;;  %v2772_v46 = vld [vmem:[#allocation20 + $0x1d8] sm:$0xff]  ;;  %v2785_v49 = vpack.c.bf16 %v2754_v44, %v2753_v15  ;;  %v3306_v44 = vld [vmem:[#allocation25 + $0x1] ss:$0 sm:$0xff] }
0x120c   : > { %3610 = vmatpush3.bf16.msra.mxu1 %v2557_v52  ;;  %v2653_v52 = vld [vmem:[#allocation17 + $0x170] sm:$0xff] }
0x120d   : > { %3611 = vmatprep.subr.bf16.mxu1 %v4593_v0  ;;  %v2680_v40 = vpack.c.bf16 %v2653_v52, %v2651_v51  ;;  %v2755_v51 = vld [vmem:[#allocation20 + $0x150] sm:$0xff]  ;;  %v2756_v52 = vld [vmem:[#allocation20 + $0x158] sm:$0xff] }
0x1210   : > { %3612 = vmatpush3.bf16.msra.mxu1 %v2558_v55  ;;  %v2658_v55 = vld [vmem:[#allocation17 + $0x198] sm:$0xff] }
0x1211   : > { %3613 = vmatprep.subr.bf16.mxu1 %v4593_v0 }
0x1214   : > { %3614 = vmatpush3.bf16.msra.mxu1 %v2559_v60  ;;  %v2685_v60 = vpack.c.bf16 %v2662_v59, %v2660_v58  ;;  %v3303_v58 = vld [vmem:[#allocation16 + $0x1] ss:$0 sm:$0xff] }
0x12c3   : > { %v2289_v56 = vpop.f32.mrb[44].mxu0 }
0x12c4   : > { %2518 = vrot.lane.b32.xlu1 %v2289_v56, %s4598_s23  ;;  %v3573_v48 = vpop.f32.mrb[45].mxu0  ;;  %v2683_v56 = vpack.c.bf16 %v2658_v55, %v2656_v54 }
0x12c5   : > { %v2292_v57 = vpop.f32.mrb[46].mxu0  ;;  %v2655_v48 = vld [vmem:[#allocation17 + $0x180] sm:$0xff] }
0x12c6   : > { %v3574_v19 = vpop.f32.mrb[47].mxu0  ;;  %v2657_v57 = vld [vmem:[#allocation17 + $0x190] sm:$0xff] }
0x12c7   : > { %v2682_v19 = vpack.c.bf16 %v2657_v57, %v2655_v48  ;;  %v3302_v57 = vld [vmem:[#allocation14 + $0x1] ss:$0 sm:$0xff] }
0x12cb   : > { %v2400_v61 = vpop.f32.mrb[48].mxu0 }
0x12cc   : > { %2522 = vrot.lane.b32.xlu0 %v2400_v61, %s4596_s6  ;;  %v3585_v62 = vpop.f32.mrb[49].mxu0  ;;  %v2659_v61 = vld [vmem:[#allocation17 + $0x1a0] sm:$0xff]  ;;  %s4599_s6 = smov [#allocation32]  }
0x12cd   : > { %v2403_v63 = vpop.f32.mrb[50].mxu0  ;;  %v2661_v62 = vld [vmem:[#allocation17 + $0x1b0] sm:$0xff] }
0x12ce   : > { %v3586_v1 = vpop.f32.mrb[51].mxu0  ;;  %v2684_v63 = vpack.c.bf16 %v2661_v62, %v2659_v61  ;;  %v2773_v62 = vld [vmem:[#allocation20 + $0x1e0] sm:$0xff] }
0x12cf   : > { %v2664_v1 = vld [vmem:[#allocation17 + $0x1c8] sm:$0xff] }
0x12d3   : > { %v2511_v2 = vpop.f32.mrb[52].mxu0 }
0x12d4   : > { %2526 = vrot.lane.b32.xlu1 %v2511_v2, %s4597_s19  ;;  %v3597_v3 = vpop.f32.mrb[53].mxu0  ;;  %v2666_v2 = vld [vmem:[#allocation17 + $0x1d8] sm:$0xff]  ;;  %s4463_s19 = sshll.u32 %s4599_s6, 4  ;;  %s4464_s19 = int_to_ptr.vmem [resolvable:$false] %s4463_s19 }
0x12d5   : > { %v2514_v4 = vpop.f32.mrb[54].mxu0  ;;  %v2687_v3 = vpack.c.bf16 %v2666_v2, %v2664_v1  ;;  %v2757_v2 = vld [vmem:[#allocation20 + $0x160] sm:$0xff]  ;;  %s4465_s23 = scalar_lea.vmem %s4464_s19, 256  ;;  %p4466_p5 = scmp.lt.s32.totalorder %s5522_s29, %s4464_s19 }
0x12d6   : > { %v3598_v5 = vpop.f32.mrb[55].mxu0  ;;  %v2663_v4 = vld [vmem:[#allocation17 + $0x1c0] sm:$0xff]  ;;  %p4467_p7 = scmp.lt.s32.totalorder %s4465_s23, %s4459_s21 }
0x12d7   : > { %v2665_v5 = vld [vmem:[#allocation17 + $0x1d0] sm:$0xff] }
0x12d8   : > { %p4468_p4 = por %p4467_p7, %p4466_p5 }
0x12da   : > { %p4469_p1 = pnand %p4468_p4, %p4462_p13 }
0x1336   : > { %v2519_v7 = vpop.permute.xlu1 %2518 }
0x1337   : > { %v2529_v25 = vsel %vm1102_vm4, %v5450_v47, %v2519_v7  ;;  %v2642_v47 = vld [vmem:[#allocation17 + $0x118] sm:$0xff]  ;;  %v2668_v7 = vld [vmem:[#allocation17 + $0x1e8] sm:$0xff] }
0x1338   : > { %v2675_v6 = vpack.c.bf16 %v2642_v47, %v2640_v22  ;;  %v2747_v47 = vld [vmem:[#allocation20 + $0x110] sm:$0xff] }
0x1339   : > { %v2782_v29 = vpack.c.bf16 %v2748_v23, %v2747_v47 }
0x133a   : > { %2701 = vmatprep.subr.bf16.mxu0 %v2675_v6  ;;  %v2765_v6 = vld [vmem:[#allocation20 + $0x1a0] sm:$0xff] }
0x133b   : > { %2702 = vmatpush1.bf16.msra.mxu0 %v2674_v31  ;;  %v2791_v30 = vpack.c.bf16 %v2766_v26, %v2765_v6  ;;  %v2749_v31 = vld [vmem:[#allocation20 + $0x120] sm:$0xff] }
0x133c   : > { %2703 = vmatprep.subr.bf16.mxu0 %v2677_v32  ;;  %v2750_v32 = vld [vmem:[#allocation20 + $0x128] sm:$0xff]  ;;  %v3304_v6 = vld [vmem:[#allocation22 + $0x1] ss:$0 sm:$0xff] }
0x133e   : > { %v2523_v24 = vpop.permute.xlu0 %2522 }
0x133f   : > { %v2530_v8 = vsel %vm1561_vm7, %v2529_v25, %v2523_v24  ;;  %2704 = vmatpush1.bf16.msra.mxu0 %v2676_v37  ;;  %v2686_v24 = vpack.c.bf16 %v2665_v5, %v2663_v4  ;;  %v2670_v25 = vld [vmem:[#allocation17 + $0x1f8] sm:$0xff] }
0x1340   : > { %v2751_v37 = vld [vmem:[#allocation20 + $0x130] sm:$0xff] }
0x1341   : > { %v2775_v5 = vld [vmem:[#allocation20 + $0x1f0] sm:$0xff] }
0x1346   : > { %v2527_v9 = vpop.permute.xlu1 %2526 }
0x1347   : > { %v2531_v10 = vsel %vm1563_vm8, %v2530_v8, %v2527_v9  ;;  %v2667_v8 = vld [vmem:[#allocation17 + $0x1e0] sm:$0xff]  ;;  %v2669_v9 = vld [vmem:[#allocation17 + $0x1f0] sm:$0xff] }
0x1348   : > { %v2551_v11 = vpack.c.bf16 %v2531_v10, %v2531_v10  ;;  %v2689_v10 = vpack.c.bf16 %v2670_v25, %v2668_v7  ;;  %v2776_v7 = vld [vmem:[#allocation20 + $0x1f8] sm:$0xff] }
0x1349   : > { %v2760_v25 = vld [vmem:[#allocation20 + $0x178] sm:$0xff] }
0x134a   : > { %3616 = vmatmul.mubr.bf16.vlgmr.msra.gmra.mrb[40].mxu1 %v2551_v11  ;;  %v2688_v11 = vpack.c.bf16 %v2669_v9, %v2667_v8  ;;  %v2672_v9 = vld [vmem:[#allocation19 + $0x2] sm:$0x3] }
0x141d   : > { %v2600_v13 = vpop.f32.mrb[40].mxu1 }
0x141e   : > { %v2601_v14 = vadd.f32 %v3301_v12, %v2600_v13  ;;  %v3617_v18 = vpop.f32.mrb[41].mxu1  ;;  %v2761_v12 = vld [vmem:[#allocation20 + $0x180] sm:$0xff]  ;;  %v2762_v13 = vld [vmem:[#allocation20 + $0x188] sm:$0xff] }
0x141f   : > { %v2603_v16 = vpop.f32.mrb[42].mxu1  ;;  %v2789_v18 = vpack.c.bf16 %v2762_v13, %v2761_v12 }
0x1420   : > { %v3618_v17 = vpop.f32.mrb[43].mxu1  ;;  %v2606_v20 = vadd.f32 %v2601_v14, %v5401_v53  ;;  %v2679_v53 = vpack.c.bf16 %v2650_v36, %v2648_v35  ;;  %v2745_v14 = vld [vmem:[#allocation20 + $0x100] sm:$0xff]  ;;  %v2746_v16 = vld [vmem:[#allocation20 + $0x108] sm:$0xff]  ;;  %v2783_v35 = vpack.c.bf16 %v2750_v32, %v2749_v31  ;;  %v2792_v36 = vpack.c.bf16 %v2768_v34, %v2767_v33 }
0x1421   : > { %v2763_v17 = vld [vmem:[#allocation20 + $0x190] sm:$0xff]  ;;  %3406 = vmatprep.subr.bf16.mxu1 %v2789_v18 }
0x1422   : > { %v2611_v21 = vsel %vm1640_vm9, %v2606_v20, 0.0  ;;  %2705 = vmatprep.subr.bf16.mxu0 %v2679_v53  ;;  %v2752_v53 = vld [vmem:[#allocation20 + $0x138] sm:$0xff] }
0x1423   : > { %2612 = vadd.xlane.f32.xlu0 %v2611_v21  ;;  %2706 = vmatpush1.bf16.msra.mxu0 %v2678_v45  ;;  %v2781_v21 = vpack.c.bf16 %v2746_v16, %v2745_v14  ;;  %v2771_v45 = vld [vmem:[#allocation20 + $0x1d0] sm:$0xff] }
0x1424   : > { %2707 = vmatprep.subr.bf16.mxu0 %v2681_v50  ;;  %v2794_v50 = vpack.c.bf16 %v2772_v46, %v2771_v45 }
0x1425   : > { %3407 = vmatpush3.bf16.msra.mxu1 %v2781_v21 }
0x1427   : > { %2708 = vmatpush1.bf16.msra.mxu0 %v2680_v40  ;;  %v2786_v40 = vpack.c.bf16 %v2756_v52, %v2755_v51  ;;  %v2905_v51 = vld [vmem:[#allocation29 + $0x8] sm:$0xff]  ;;  %v2906_v52 = vld [vmem:[#allocation29 + $0x10] sm:$0xff] }
0x1428   : > { %2709 = vmatprep.subr.bf16.mxu0 %v2683_v56 }
0x142b   : > { %2710 = vmatpush1.bf16.msra.mxu0 %v2682_v19 }
0x142c   : > { %2711 = vmatprep.subr.bf16.mxu0 %v2685_v60 }
0x142f   : > { %2712 = vmatpush1.bf16.msra.mxu0 %v2684_v63  ;;  %v2774_v63 = vld [vmem:[#allocation20 + $0x1e8] sm:$0xff] }
0x1430   : > { %2713 = vmatprep.subr.bf16.mxu0 %v2687_v3  ;;  %v2795_v1 = vpack.c.bf16 %v2774_v63, %v2773_v62  ;;  %v2758_v3 = vld [vmem:[#allocation20 + $0x168] sm:$0xff]  ;;  %v2910_v62 = vld [vmem:[#allocation29 + $0x30] sm:$0xff] }
0x1431   : > { %v2787_v4 = vpack.c.bf16 %v2758_v3, %v2757_v2  ;;  %v2911_v63 = vld [vmem:[#allocation29 + $0x38] sm:$0xff]  ;;  %v2912_v2 = vld [vmem:[#allocation29 + $0x40] sm:$0xff]  ;;  %v2913_v3 = vld [vmem:[#allocation29 + $0x48] sm:$0xff] }
0x1433   : > { %2714 = vmatpush1.bf16.msra.mxu0 %v2686_v24  ;;  %v2796_v24 = vpack.c.bf16 %v2776_v7, %v2775_v5  ;;  %v2914_v5 = vld [vmem:[#allocation29 + $0x50] sm:$0xff]  ;;  %v2915_v7 = vld [vmem:[#allocation29 + $0x58] sm:$0xff] }
0x1434   : > { %2715 = vmatprep.subr.bf16.mxu0 %v2689_v10  ;;  %v2694_v10 = vrot.slane %v2672_v9, %v5288_v28 }
0x1437   : > { %2716 = vmatpush1.bf16.msra.mxu0 %v2688_v11  ;;  %v2698_v11 = vrot.slane %v2672_v9, %v5285_v27 }
0x1438   : > { %3619 = vmatprep.subr.bf16.mxu0 %v4593_v0 }
0x14b0   : > { %v2613_v38 = vpop.xlane.xlu0 %2612 }
0x14b1   : > { %v2614_v39 = vmul.f32 0.0078125, %v2613_v38  ;;  %v2769_v38 = vld [vmem:[#allocation20 + $0x1c0] sm:$0xff] }
0x14b3   : > { %v5492_v41 = vsub.f32 %v2606_v20, %v2614_v39  ;;  %v2764_v20 = vld [vmem:[#allocation20 + $0x198] sm:$0xff]  ;;  %v2770_v39 = vld [vmem:[#allocation20 + $0x1c8] sm:$0xff] }
0x14b4   : > { %v2790_v22 = vpack.c.bf16 %v2764_v20, %v2763_v17 }
0x14b5   : > { %v2616_v42 = vmul.f32 %v5492_v41, %v5492_v41 }
0x14b6   : > { %3408 = vmatprep.subr.bf16.mxu1 %v2790_v22 }
0x14b7   : > { %v2617_v43 = vsel %vm1640_vm9, %v2616_v42, 0.0  ;;  %3409 = vmatpush3.bf16.msra.mxu1 %v2782_v29  ;;  %v2784_v42 = vpack.c.bf16 %v2752_v53, %v2751_v37 }
0x14b8   : > { %2618 = vadd.xlane.f32.xlu1 %v2617_v43  ;;  %3410 = vmatprep.subr.bf16.mxu1 %v2791_v30  ;;  %v2793_v43 = vpack.c.bf16 %v2770_v39, %v2769_v38 }
0x14bb   : > { %3411 = vmatpush3.bf16.msra.mxu1 %v2783_v35 }
0x14bc   : > { %3412 = vmatprep.subr.bf16.mxu1 %v2792_v36 }
0x14bf   : > { %3413 = vmatpush3.bf16.msra.mxu1 %v2784_v42 }
0x14c0   : > { %3414 = vmatprep.subr.bf16.mxu1 %v2793_v43  ;;  %v3305_v43 = vld [vmem:[#allocation23 + $0x1] ss:$0 sm:$0xff] }
0x14c3   : > { %3415 = vmatpush3.bf16.msra.mxu1 %v2785_v49 }
0x14c4   : > { %3416 = vmatprep.subr.bf16.mxu1 %v2794_v50  ;;  %v2904_v50 = vld [vmem:[#allocation29] sm:$0xff] }
0x14c7   : > { %3417 = vmatpush3.bf16.msra.mxu1 %v2786_v40  ;;  %v2922_v40 = vpack.c.bf16 %v2905_v51, %v2904_v50 }
0x14c8   : > { %3418 = vmatprep.subr.bf16.mxu1 %v2795_v1  ;;  %v2925_v1 = vpack.c.bf16 %v2911_v63, %v2910_v62 }
0x14cb   : > { %3419 = vmatpush3.bf16.msra.mxu1 %v2787_v4  ;;  %v2926_v4 = vpack.c.bf16 %v2913_v3, %v2912_v2 }
0x14cc   : > { %3420 = vmatprep.subr.bf16.mxu1 %v2796_v24  ;;  %v2927_v24 = vpack.c.bf16 %v2915_v7, %v2914_v5 }
0x1545   : > { %v2619_v54 = vpop.xlane.xlu1 %2618 }
0x1546   : > { %v2620_v55 = vmul.f32 0.0078125, %v2619_v54  ;;  %v2907_v54 = vld [vmem:[#allocation29 + $0x18] sm:$0xff] }
0x1548   : > { %v2621_v56 = vadd.f32 1e-05, %v2620_v55  ;;  %v2923_v55 = vpack.c.bf16 %v2907_v54, %v2906_v52 }
0x154a   : > { %3919 = vrsqrt.f32 %v2621_v56 }
0x1554   : > { %v3920_v48 = vpop.eup %3919 }
0x1555   : > { %v2623_v19 = vmul.f32 %v3920_v48, %v5492_v41  ;;  %v2759_v41 = vld [vmem:[#allocation20 + $0x170] sm:$0xff] }
0x1556   : > { %v2788_v8 = vpack.c.bf16 %v2760_v25, %v2759_v41  ;;  %v2916_v41 = vld [vmem:[#allocation29 + $0x60] sm:$0xff]  ;;  %v2917_v25 = vld [vmem:[#allocation29 + $0x68] sm:$0xff] }
0x1557   : > { %v2630_v59 = vmul.f32 %v3302_v57, %v2623_v19  ;;  %v2928_v9 = vpack.c.bf16 %v2917_v25, %v2916_v41 }
0x1558   : > { %3421 = vmatpush3.bf16.msra.mxu1 %v2788_v8  ;;  %v2918_v8 = vld [vmem:[#allocation29 + $0x70] sm:$0xff] }
0x1559   : > { %v2637_v60 = vadd.f32 %v3303_v58, %v2630_v59  ;;  %v2908_v59 = vld [vmem:[#allocation29 + $0x20] sm:$0xff] }
0x155b   : > { %v2673_v61 = vpack.c.bf16 %v2637_v60, %v2637_v60 }
0x155d   : > { %2734 = vmatmul.mubr.bf16.vlgmr.msra.gmra.mrb[56].mxu0 %v2673_v61 }
0x155e   : > { %3635 = vmatprep.mubr.msk.bf16.mxu0 %vm4594_vm0, %v4593_v0  ;;  %3620 = vmatpush3.bf16.msra.mxu0 %v2922_v40 }
0x155f   : > { %3621 = vmatprep.subr.bf16.mxu0 %v4593_v0 }
0x1562   : > { %3622 = vmatpush3.bf16.msra.mxu0 %v2923_v55 }
0x1563   : > { %3623 = vmatprep.subr.bf16.mxu0 %v4593_v0 }
0x1630   : > { %v2735_v12 = vpop.f32.mrb[56].mxu0 }
0x1631   : > { %v2736_v13 = vadd.f32 %v2735_v12, %v2694_v10  ;;  %v2737_v14 = vpop.f32.mrb[57].mxu0  ;;  %v2919_v10 = vld [vmem:[#allocation29 + $0x78] sm:$0xff] }
0x1632   : > { %v2738_v18 = vadd.f32 %v2737_v14, %v2698_v11  ;;  %v2739_v16 = vpop.f32.mrb[58].mxu0  ;;  %v2929_v11 = vpack.c.bf16 %v2919_v10, %v2918_v8 }
0x1633   : > { %v2742_v17 = vmax.f32 %v2736_v13, 0.0  ;;  %v2740_v20 = vpop.f32.mrb[59].mxu0  ;;  %v3307_v16 = vld [vmem:[#allocation26] ss:$0 sm:$0xff] }
0x1634   : > { %v2743_v21 = vmax.f32 %v2738_v18, 0.0  ;;  %v3308_v20 = vld [vmem:[#allocation28] ss:$0 sm:$0xff] }
0x1635   : > { %v2779_v47 = vpack.c.bf16 %v2742_v17, %v2742_v17 }
0x1636   : > { %v2780_v22 = vpack.c.bf16 %v2743_v21, %v2743_v21 }
0x1638   : > { %2835 = vmatprep.mubr.bf16.mxu1 %v2780_v22 }
0x1639   : > { %2836 = vmatmul.mubr.bf16.vlgmr.msra.gmra.mrb[44].mxu1 %v2779_v47 }
0x170c   : > { %v3422_v23 = vpop.f32.mrb[44].mxu1 }
0x170d   : > { %v3423_v26 = vpop.f32.mrb[45].mxu1 }
0x170e   : > { %v3424_v29 = vadd.f32 %v3423_v26, %v3422_v23  ;;  %v3425_v30 = vpop.f32.mrb[46].mxu1  ;;  %v3309_v23 = vld [vmem:[#allocation31] ss:$0 sm:$0xff] }
0x170f   : > { %v3426_v28 = vpop.f32.mrb[47].mxu1 }
0x1710   : > { %v2838_v31 = vadd.f32 %v3424_v29, %v3304_v6 }
0x1712   : > { %v2843_v27 = vadd.f32 %v2838_v31, %v2637_v60  ;;  %v2909_v60 = vld [vmem:[#allocation29 + $0x28] sm:$0xff] }
0x1713   : > { %v2924_v61 = vpack.c.bf16 %v2909_v60, %v2908_v59 }
0x1714   : > { %v2848_v32 = vsel %vm1640_vm9, %v2843_v27, 0.0 }
0x1715   : > { %2849 = vadd.xlane.f32.xlu0 %v2848_v32  ;;  %3624 = vmatpush3.bf16.msra.mxu0 %v2924_v61 }
0x1716   : > { %3625 = vmatprep.subr.bf16.mxu0 %v4593_v0 }
0x1719   : > { %3626 = vmatpush3.bf16.msra.mxu0 %v2925_v1 }
0x171a   : > { %3627 = vmatprep.subr.bf16.mxu0 %v4593_v0 }
0x171d   : > { %3628 = vmatpush3.bf16.msra.mxu0 %v2926_v4 }
0x171e   : > { %3629 = vmatprep.subr.bf16.mxu0 %v4593_v0 }
0x1721   : > { %3630 = vmatpush3.bf16.msra.mxu0 %v2927_v24 }
0x1722   : > { %3631 = vmatprep.subr.bf16.mxu0 %v4593_v0 }
0x1725   : > { %3632 = vmatpush3.bf16.msra.mxu0 %v2928_v9 }
0x1726   : > { %3633 = vmatprep.subr.bf16.mxu0 %v4593_v0 }
0x1729   : > { %3634 = vmatpush3.bf16.msra.mxu0 %v2929_v11 }
0x17a2   : > { %v2850_v33 = vpop.xlane.xlu0 %2849 }
0x17a3   : > { %v2851_v34 = vmul.f32 0.0078125, %v2850_v33 }
0x17a5   : > { %v2852_v35 = vsub.f32 %v2843_v27, %v2851_v34 }
0x17a7   : > { %v2853_v36 = vmul.f32 %v2852_v35, %v2852_v35 }
0x17a9   : > { %v2854_v37 = vsel %vm1640_vm9, %v2853_v36, 0.0 }
0x17aa   : > { %2855 = vadd.xlane.f32.xlu0 %v2854_v37 }
0x1837   : > { %v2856_v53 = vpop.xlane.xlu0 %2855 }
0x1838   : > { %v2857_v38 = vmul.f32 0.0078125, %v2856_v53 }
0x183a   : > { %v2858_v39 = vadd.f32 1e-05, %v2857_v38 }
0x183c   : > { %3921 = vrsqrt.f32 %v2858_v39 }
0x1846   : > { %v3922_v42 = vpop.eup %3921 }
0x1847   : > { %v2860_v15 = vmul.f32 %v3922_v42, %v2852_v35 }
0x1849   : > { %v2867_v45 = vmul.f32 %v3305_v43, %v2860_v15 }
0x184b   : > { %v2874_v46 = vadd.f32 %v3306_v44, %v2867_v45 }
0x184d   : > { %v2877_v49 = vsel %vm1640_vm9, %v2874_v46, 0.0 }
0x184e   : > { %2878 = vadd.xlane.f32.xlu1 %v2877_v49 }
0x18db   : > { %v2879_v56 = vpop.xlane.xlu1 %2878 }
0x18dc   : > { %v2880_v48 = vmul.f32 0.0078125, %v2879_v56 }
0x18de   : > { %v2881_v57 = vsub.f32 %v2874_v46, %v2880_v48 }
0x18e0   : > { %v2882_v19 = vmul.f32 %v2881_v57, %v2881_v57 }
0x18e2   : > { %v2883_v58 = vsel %vm1640_vm9, %v2882_v19, 0.0 }
0x18e3   : > { %2884 = vadd.xlane.f32.xlu0 %v2883_v58 }
0x1970   : > { %v2885_v12 = vpop.xlane.xlu0 %2884 }
0x1971   : > { %v2886_v13 = vmul.f32 0.0078125, %v2885_v12 }
0x1973   : > { %v2887_v14 = vadd.f32 1e-05, %v2886_v13 }
0x1975   : > { %3923 = vrsqrt.f32 %v2887_v14 }
0x197f   : > { %v3924_v18 = vpop.eup %3923 }
0x1980   : > { %v2889_v17 = vmul.f32 %v3924_v18, %v2881_v57 }
0x1982   : > { %v2896_v21 = vmul.f32 %v3307_v16, %v2889_v17 }
0x1984   : > { %v2903_v22 = vadd.f32 %v3308_v20, %v2896_v21 }
0x1986   : > { %v2921_v47 = vpack.c.bf16 %v2903_v22, %v2903_v22 }
0x1988   : > { %3636 = vmatmul.mubr.bf16.vlgmr.msra.gmra.mrb[60].mxu0 %v2921_v47 }
0x1a5b   : > { %v2970_v0 = vpop.f32.mrb[60].mxu0 }
0x1a5c   : > { %v2971_v6 = vadd.f32 %v3309_v23, %v2970_v0  ;;  %v3637_v26 = vpop.f32.mrb[61].mxu0 }
0x1a5d   : > { %v2973_v29 = vpop.f32.mrb[62].mxu0 }
0x1a5e   : > { %v3638_v30 = vpop.f32.mrb[63].mxu0  ;;  %2977 = vst.msk [vmem:[%s868_s0] sm:$0x3f] %vm2976_vm10, %v2971_v6 }
0x1a5f   : > { %4472 = shalt.err (!%p4469_p1)
}
0x1a60   : > { %s4473_s20 = scalar_lea.hbm %s5520_s25, 128  ;;  %s4477_s1 = scalar_lea.hbm %s5670_s16, 256 }
0x1a61   : > { %p4474_p3 = scmp.ne.s32.totalorder %s5520_s25, %s4473_s20  ;;  %p4478_p0 = scmp.lt.u32.totalorder %s5520_s25, %s5670_s16 }
0x1a62   : > { %p4479_p2 = scmp.lt.u32.totalorder %s4477_s1, %s4473_s20  ;;  %p4481_p10 = scmp.lt.u32.totalorder %s4473_s20, %s5520_s25 }
0x1a63   : > { %p4475_p9 = pnand %p4474_p3, %p5671_p12 }
0x1a64   : > { %p4480_p8 = por %p4479_p2, %p4478_p0 }
0x1a65   : > { %p4476_p6 = pneg %p4475_p9 }
0x1a66   : > { %p4482_p11 = por %p4481_p10, %p4480_p8 }
0x1a68   : > { %p4483_p13 = pnand %p4482_p11, %p4476_p6 }
0x1a6a   : > { %4486 = shalt.err (!%p4483_p13)
}
0x1a6b   : > { %3713 = dma.vmem_to_hbm [thread:$0]  (%p5671_p12), %s5522_s29, 128, %s5520_s25, %s2979_s18  }
0x1a6c PF: > { %s5672_s21 = sld [smem:[#allocation44_spill]]  ;;  %s5673_s19 = sld [smem:[#allocation47_spill]] }
0x1a6d   : > { %p5674_p5 = scmp.ne.s32.totalorder %s5645_s30, 0 }
0x1a72   : > { %s3004_s23 = sand.u32 1, %s5672_s21   ;;  %p5675_p7 = scmp.ge.s32.totalorder %s5673_s19, 2 }
0x1a73   : > { %s3005_s2 = scalar_lea.sflag [#allocation4], %s3004_s23 }
0x1a74   : > { %p3775_p4 = pnand %p5675_p7, %p5674_p5 }
0x1a76   : > { %4544 = dma.done.wait (!%p3775_p4), %s3005_s2, 128  }
0x1a77   : > { %4546 = vsyncadd (!%p3775_p4), %s3005_s2, 4294967168  ;;  %s5676_s0 = sld [smem:[#allocation45_spill]]  ;;  %s5677_s30 = sld [smem:[#allocation46_spill]] }
0x1a78   : > { %p41_p1 = scmp.ge.s32.totalorder %s5141_s3, 4   ;;  %s5678_s20 = smov %s5153_s5 }
0x1a79   : > { %s5679_s21 = smov %s5141_s3 }
0x1a7a   :  { %43 = sbr.rel (!%p41_p1) target bundleno = 25 (0x19), region = 225 }
0x1a81   :  { %3010 = vsyncpa [#allocation3], 1 }
0x1a82   :  { %3012 = vsyncpa [#allocation3 + $0x1], 1 }
0x1a83   :  { %3013 = vsyncpa [#allocation6], 1 }
0x1a84   :  { %3014 = vsyncpa [#allocation9], 1 }
0x1a85   :  { %3015 = vsyncpa [#allocation12], 1 }
0x1a86   :  { %3016 = vsyncpa [#allocation15], 1 }
0x1a87   :  { %3017 = vsyncpa [#allocation18], 1 }
0x1a88   :  { %3018 = vsyncpa [#allocation21], 1 }
0x1a89   :  { %3019 = vsyncpa [#allocation24], 1 }
0x1a8a   :  { %3020 = vsyncpa [#allocation27], 1 }
0x1a8b   :  { %3021 = vsyncpa [#allocation30], 1 }
0x1a8c   :  { %3022 = vsyncpa [#allocation4], 1 }
0x1a8d   :  { %3024 = vsyncpa [#allocation4 + $0x1], 1 }

</bundles_post_ra>
